<compile_context>
chip_gen: v5e
topology: v5e:2x2
jax: 0.10.0
libtpu: 0.0.40
codegen_flags: <defaults>
</compile_context>

<pallas_src>
import jax
import jax.numpy as jnp
from jax.experimental import pallas as pl
from jax.experimental.pallas import tpu as pltpu


# ----------------------------------------------------------------------------
# Kernel: Linear(L, D) -> Tanh -> Linear(D, n_classes), per row tile.
# ----------------------------------------------------------------------------
def attn_net_kernel(x_ref, w1_ref, b1_ref, w2_ref, b2_ref, a_ref):
    # First Linear on the MXU: bf16 inputs, f32 accumulation, f32 bias.
    h = jnp.dot(x_ref[...], w1_ref[...],
                preferred_element_type=jnp.float32) + b1_ref[...]
    # Tanh in f32 on the VPU/EUP (no bf16 transcendental path on v5e).
    t = jnp.tanh(h)
    # TODO(synk): nn.Dropout(0.25) exists only when dropout=True and is an
    # identity in eval mode, so it is omitted here.
    #
    # Second Linear, emitted lane-dense as (n_classes, TN): contract the D axis
    # of both operands (trans-B matmul), so the result lands with TN on the
    # lane axis and stores are unmasked full-lane vst.
    a = jax.lax.dot_general(
        w2_ref[...],                      # (n_classes, D)  bf16
        t.astype(jnp.bfloat16),           # (TN, D)         bf16
        dimension_numbers=(((1,), (1,)), ((), ())),
        preferred_element_type=jnp.float32,
    )                                     # -> (n_classes, TN) f32
    a_ref[...] = a + b2_ref[...]          # b2 is (n_classes, 1), broadcasts over lanes


# ----------------------------------------------------------------------------
# Wrapper
# ----------------------------------------------------------------------------
def _pick_block_rows(n_rows):
    """Generation-aware row-tile size (see performance review)."""
    try:
        kind = jax.devices()[0].device_kind.lower()
    except Exception:  # pragma: no cover - defensive only
        kind = ""
    if ("v5" in kind) or ("v4" in kind) or ("v3" in kind):
        tn = 128          # 4x128^2 MXU: 128-row tiles already saturate it
    else:
        tn = 256          # v6e / v7x: 256-wide MXU
    # v7x has 2 TensorCores per chip: keep >= 2 parallel grid steps if possible.
    if ("7" in kind) and n_rows > 128 and pl.cdiv(n_rows, tn) < 2:
        tn = 128
    return tn


def attn_net_forward(x, params):
    """Pallas implementation of Attn_Net.forward: returns (A, x)."""
    N, L = x.shape
    D = params["w1"].shape[1]
    nc = params["w2"].shape[0]

    tn = _pick_block_rows(N)
    n_pad = tn * pl.cdiv(N, tn)
    x_p = x if n_pad == N else jnp.pad(x, ((0, n_pad - N), (0, 0)))

    # bf16 matmul inputs; biases stay f32 (f32 accumulation inside the kernel).
    x_bf = x_p.astype(jnp.bfloat16)
    w1_bf = params["w1"].astype(jnp.bfloat16)
    w2_bf = params["w2"].astype(jnp.bfloat16)

    a_dense = pl.pallas_call(
        attn_net_kernel,
        out_shape=jax.ShapeDtypeStruct((nc, n_pad), jnp.float32),
        grid=(n_pad // tn,),
        in_specs=[
            pl.BlockSpec((tn, L), lambda i: (i, 0)),    # x rows
            pl.BlockSpec((L, D), lambda i: (0, 0)),     # W1 (in, out)
            pl.BlockSpec((1, D), lambda i: (0, 0)),     # b1
            pl.BlockSpec((nc, D), lambda i: (0, 0)),    # W2 (out, in)  (PyTorch layout)
            pl.BlockSpec((nc, 1), lambda i: (0, 0)),    # b2
        ],
        out_specs=pl.BlockSpec((nc, tn), lambda i: (0, i)),   # lane-dense output
        compiler_params=pltpu.CompilerParams(
            dimension_semantics=("parallel",)),
    )(x_bf, w1_bf, params["b1"], w2_bf, params["b2"])

    # Back to the module's (N, n_classes) orientation; for n_classes == 1 this
    # transpose is a free reshape in XLA. Pad rows (if any) are dropped.
    A = a_dense[:, :N].T
    return A, x


# ----------------------------------------------------------------------------
if __name__ == "__main__":
    key = jax.random.PRNGKey(0)
    kx, k1, k2, k3, k4 = jax.random.split(key, 5)

    # Module defaults: L=1024, D=256, n_classes=1; small instance count N=256.
    L, D, nc = 1024, 256, 1
    N = 256

    x = jax.random.normal(kx, (N, L), jnp.float32)
    params = dict(
        w1=0.02 * jax.random.normal(k1, (L, D), jnp.float32),   # Linear(L, D) weight^T
        b1=0.01 * jax.random.normal(k2, (1, D), jnp.float32),   # Linear(L, D) bias
        w2=0.02 * jax.random.normal(k3, (nc, D), jnp.float32),  # Linear(D, nc) weight (out, in)
        b2=0.01 * jax.random.normal(k4, (nc, 1), jnp.float32),  # Linear(D, nc) bias
    )

    A, x_out = jax.block_until_ready(attn_net_forward(x, params))

    assert A.shape == (N, nc)
    assert x_out.shape == (N, L)
    assert bool(jnp.isfinite(A).all())

    # Pure-JAX f32 reference of the same forward pass.
    ref = jnp.tanh(x @ params["w1"] + params["b1"]) @ params["w2"].T + params["b2"].T
    max_err = float(jnp.max(jnp.abs(A - ref)))
    assert max_err < 5e-2, f"max abs error {max_err}"

    print("KERNEL_OK")
</pallas_src>

<mosaic_0001>
module attributes {stable_mosaic.version = 11 : i64} {
  func.func @attn_net_kernel(%arg0: i32, %arg1: memref<256x1024xbf16, #tpu.memory_space<vmem>>, %arg2: memref<1024x256xbf16, #tpu.memory_space<vmem>>, %arg3: memref<1x256xf32, #tpu.memory_space<vmem>>, %arg4: memref<1x256xbf16, #tpu.memory_space<vmem>>, %arg5: memref<1x1xf32, #tpu.memory_space<vmem>>, %arg6: memref<1x256xf32, #tpu.memory_space<vmem>>) attributes {dimension_semantics = [#tpu.dimension_semantics<parallel>], iteration_bounds = array<i64: 1>, scalar_prefetch = 0 : i64, scratch_operands = 0 : i64, tpu.core_type = #tpu.core_type<tc>, window_params = [{transform_indices = @transform_0, window_bounds = array<i64: 256, 1024>}, {pipeline_mode = #tpu.pipeline_mode<synchronous>, transform_indices = @transform_1, window_bounds = array<i64: 1024, 256>}, {pipeline_mode = #tpu.pipeline_mode<synchronous>, transform_indices = @transform_2, window_bounds = array<i64: 1, 256>}, {pipeline_mode = #tpu.pipeline_mode<synchronous>, transform_indices = @transform_3, window_bounds = array<i64: 1, 256>}, {pipeline_mode = #tpu.pipeline_mode<synchronous>, transform_indices = @transform_4, window_bounds = array<i64: 1, 1>}, {transform_indices = @transform_5, window_bounds = array<i64: 1, 256>}]} {
    %c0 = arith.constant 0 : index
    %c0_0 = arith.constant 0 : index
    %0 = vector.load %arg1[%c0, %c0_0] : memref<256x1024xbf16, #tpu.memory_space<vmem>>, vector<256x1024xbf16>
    %c0_1 = arith.constant 0 : index
    %c0_2 = arith.constant 0 : index
    %1 = vector.load %arg2[%c0_1, %c0_2] : memref<1024x256xbf16, #tpu.memory_space<vmem>>, vector<1024x256xbf16>
    %cst = arith.constant dense<0.000000e+00> : vector<256x256xf32>
    %2 = tpu.matmul %0, %1, %cst {dimension_numbers = #tpu.dot_dimension_numbers<[1], [0], [0], [1], [0, 0, 1, 1], [], []>} : vector<256x1024xbf16>, vector<1024x256xbf16>, vector<256x256xf32> -> vector<256x256xf32>
    %c0_3 = arith.constant 0 : index
    %c0_4 = arith.constant 0 : index
    %3 = vector.load %arg3[%c0_3, %c0_4] : memref<1x256xf32, #tpu.memory_space<vmem>>, vector<1x256xf32>
    %4 = vector.broadcast %3 : vector<1x256xf32> to vector<256x256xf32>
    %5 = arith.addf %2, %4 : vector<256x256xf32>
    %6 = math.tanh %5 : vector<256x256xf32>
    %c0_5 = arith.constant 0 : index
    %c0_6 = arith.constant 0 : index
    %7 = vector.load %arg4[%c0_5, %c0_6] : memref<1x256xbf16, #tpu.memory_space<vmem>>, vector<1x256xbf16>
    %8 = arith.truncf %6 : vector<256x256xf32> to vector<256x256xbf16>
    %cst_7 = arith.constant dense<0.000000e+00> : vector<1x256xf32>
    %9 = tpu.matmul %7, %8, %cst_7 {dimension_numbers = #tpu.dot_dimension_numbers<[1], [1], [0], [0], [0, 0, 1, 0], [], []>} : vector<1x256xbf16>, vector<256x256xbf16>, vector<1x256xf32> -> vector<1x256xf32>
    %c0_8 = arith.constant 0 : index
    %c0_9 = arith.constant 0 : index
    %10 = vector.load %arg5[%c0_8, %c0_9] : memref<1x1xf32, #tpu.memory_space<vmem>>, vector<1x1xf32>
    %11 = vector.broadcast %10 : vector<1x1xf32> to vector<1x256xf32>
    %12 = arith.addf %9, %11 : vector<1x256xf32>
    %c0_10 = arith.constant 0 : index
    %c0_11 = arith.constant 0 : index
    %13 = vector.load %arg6[%c0_10, %c0_11] : memref<1x256xf32, #tpu.memory_space<vmem>>, vector<1x256xf32>
    tpu.vector_store %arg6[%c0_10, %c0_11], %12 {strides = array<i32>} : memref<1x256xf32, #tpu.memory_space<vmem>>, vector<1x256xf32>,
    return
  }
  func.func @transform_0(%arg0: i32) -> (i32, i32) {
    %c0_i32 = arith.constant 0 : i32
    %c0_i32_0 = arith.constant 0 : i32
    return %arg0, %c0_i32 : i32, i32
  }
  func.func @transform_1(%arg0: i32) -> (i32, i32) {
    %c0_i32 = arith.constant 0 : i32
    %c0_i32_0 = arith.constant 0 : i32
    %c0_i32_1 = arith.constant 0 : i32
    return %c0_i32, %c0_i32_0 : i32, i32
  }
  func.func @transform_2(%arg0: i32) -> (i32, i32) {
    %c0_i32 = arith.constant 0 : i32
    %c0_i32_0 = arith.constant 0 : i32
    %c0_i32_1 = arith.constant 0 : i32
    return %c0_i32, %c0_i32_0 : i32, i32
  }
  func.func @transform_3(%arg0: i32) -> (i32, i32) {
    %c0_i32 = arith.constant 0 : i32
    %c0_i32_0 = arith.constant 0 : i32
    %c0_i32_1 = arith.constant 0 : i32
    return %c0_i32, %c0_i32_0 : i32, i32
  }
  func.func @transform_4(%arg0: i32) -> (i32, i32) {
    %c0_i32 = arith.constant 0 : i32
    %c0_i32_0 = arith.constant 0 : i32
    %c0_i32_1 = arith.constant 0 : i32
    return %c0_i32, %c0_i32_0 : i32, i32
  }
  func.func @transform_5(%arg0: i32) -> (i32, i32) {
    %c0_i32 = arith.constant 0 : i32
    %c0_i32_0 = arith.constant 0 : i32
    return %c0_i32, %arg0 : i32, i32
  }
}

</mosaic_0001>

<bundles_post_ra>
// kernel: tpu_custom_call.1
= control target key start
LH: loop header
LB: loop body
LE: loop exit
PB: predicated region body
PF: predicated region fallthrough
CT: control target
= control target key end

     0   :  { %s5743_s0 = inlined_call_operand.hbm [shape: bf16[256,1024], index: 0, kind: input, shape index: {}]   ;;  %s5744_s1 = inlined_call_operand.hbm [shape: bf16[1024,256], index: 1, kind: input, shape index: {}]   ;;  %s5745_s2 = inlined_call_operand.vmem [shape: f32[1,256], index: 2, kind: input, shape index: {}]   ;;  %s5746_s3 = inlined_call_operand.vmem [shape: bf16[1,256], index: 3, kind: input, shape index: {}]   ;;  %s5747_s4 = inlined_call_operand.<no memory space> [shape: f32[1,1], index: 4, kind: input, shape index: {}]   ;;  %s5748_s5 = inlined_call_operand.hbm [shape: f32[1,256], index: 5, kind: output, shape index: {}]  }
   0x1   :  { %v10_v0 = vstv %s5747_s4 }
   0x2   :  { %11 = vst [vmem:[#allocation2] sm:$0x1] %v10_v0 }
   0x3   :  { %12 = vsyncpa [#allocation4], 0 }
   0x4   :  { %13 = vsyncpa [#allocation7], 0 }
   0x5   :  { %14 = vsyncpa [#allocation5], 0  ;;  %s19_s22 = sshll.u32 %s5743_s0, 4  ;;  %s4708_s23 = smov [#allocation3]   ;;  %s20_s22 = int_to_ptr.hbm [resolvable:$true] %s19_s22 }
   0x6   :  { %s21_s24 = sshll.u32 %s4708_s23, 4  ;;  %s32_s27 = sshll.u32 %s5744_s1, 4  ;;  %s22_s24 = int_to_ptr.vmem [resolvable:$true] %s21_s24  ;;  %s33_s27 = int_to_ptr.hbm [resolvable:$true] %s32_s27 }
   0x7   :  { %s4709_s28 = smov 512   ;;  %s4710_s29 = smov 32  }
   0x8   :  { %27 = dma.hbm_to_vmem [thread:$0]  %s20_s22, 16384, %s22_s24, [#allocation4], %s4709_s28, %s4709_s28, %s4710_s29  }
   0x9   :  { %s4711_s4 = smov [#allocation6]   ;;  %s4712_s6 = smov 128  }
   0xa   :  { %s34_s30 = sshll.u32 %s4711_s4, 4  ;;  %s4713_s7 = smov 8   ;;  %s35_s30 = int_to_ptr.vmem [resolvable:$true] %s34_s30 }
   0xb   :  { %40 = dma.hbm_to_vmem [thread:$0]  %s33_s27, 16384, %s35_s30, [#allocation7], %s4712_s6, %s4712_s6, %s4713_s7  }
   0xc   :  { %4702 = dma.done.wait [#allocation4], 16384  }
   0xd   :  { %4703 = vsyncadd [#allocation4], 4294950912 }
   0xe   :  { %4704 = dma.done.wait [#allocation7], 16384  }
   0xf   :  { %4705 = vsyncadd [#allocation7], 4294950912  ;;  %v3782_v1 = vld [vmem:[#allocation6 + $0x70] sm:$0xf]  ;;  %v4379_v2 = vld [vmem:[#allocation6 + $0x74] sm:$0xf0] }
  0x10   :  { %v3846_v3 = vld [vmem:[#allocation6 + $0xf0] sm:$0xf]  ;;  %v3783_v4 = vor.u32 %v4379_v2, %v3782_v1  ;;  %v4395_v5 = vld [vmem:[#allocation6 + $0xf4] sm:$0xf0]  ;;  %v3774_v12 = vld [vmem:[#allocation6 + $0x60] sm:$0xf] }
  0x11   :  { %v3910_v6 = vld [vmem:[#allocation6 + $0x170] sm:$0xf]  ;;  %v4411_v7 = vld [vmem:[#allocation6 + $0x174] sm:$0xf0]  ;;  %v3847_v8 = vor.u32 %v4395_v5, %v3846_v3  ;;  %v4377_v14 = vld [vmem:[#allocation6 + $0x64] sm:$0xf0] }
  0x12   :  { %v3911_v9 = vor.u32 %v4411_v7, %v3910_v6  ;;  %v3974_v10 = vld [vmem:[#allocation6 + $0x1f0] sm:$0xf]  ;;  %v4427_v11 = vld [vmem:[#allocation6 + $0x1f4] sm:$0xf0]  ;;  %1597 = vmatpush.bf16.msra.mxu0 %v3783_v4  ;;  %v3838_v15 = vld [vmem:[#allocation6 + $0xe0] sm:$0xf]  ;;  %v3775_v17 = vor.u32 %v4377_v14, %v3774_v12 }
  0x13   :  { %v3975_v13 = vor.u32 %v4427_v11, %v3974_v10  ;;  %v4393_v16 = vld [vmem:[#allocation6 + $0xe4] sm:$0xf0]  ;;  %1686 = vmatpush.bf16.msra.mxu1 %v3847_v8  ;;  %v3902_v19 = vld [vmem:[#allocation6 + $0x160] sm:$0xf]  ;;  %v3766_v24 = vld [vmem:[#allocation6 + $0x50] sm:$0xf] }
  0x14   :  { %1775 = vmatpush.bf16.msra.mxu2 %v3911_v9  ;;  %v3839_v18 = vor.u32 %v4393_v16, %v3838_v15  ;;  %v4409_v20 = vld [vmem:[#allocation6 + $0x164] sm:$0xf0]  ;;  %v3966_v21 = vld [vmem:[#allocation6 + $0x1e0] sm:$0xf]  ;;  %v4375_v25 = vld [vmem:[#allocation6 + $0x54] sm:$0xf0] }
  0x15   :  { %1864 = vmatpush.bf16.msra.mxu3 %v3975_v13  ;;  %v3903_v22 = vor.u32 %v4409_v20, %v3902_v19  ;;  %v4425_v23 = vld [vmem:[#allocation6 + $0x1e4] sm:$0xf0]  ;;  %v3830_v27 = vld [vmem:[#allocation6 + $0xd0] sm:$0xf]  ;;  %v4391_v28 = vld [vmem:[#allocation6 + $0xd4] sm:$0xf0]  ;;  %v3767_v30 = vor.u32 %v4375_v25, %v3766_v24 }
  0x16   :  { %v3967_v26 = vor.u32 %v4425_v23, %v3966_v21  ;;  %v3894_v29 = vld [vmem:[#allocation6 + $0x150] sm:$0xf]  ;;  %1598 = vmatpush.bf16.msra.mxu0 %v3775_v17  ;;  %v4407_v31 = vld [vmem:[#allocation6 + $0x154] sm:$0xf0]  ;;  %v3831_v34 = vor.u32 %v4391_v28, %v3830_v27  ;;  %v3758_v36 = vld [vmem:[#allocation6 + $0x40] sm:$0xf] }
  0x17   :  { %v3958_v32 = vld [vmem:[#allocation6 + $0x1d0] sm:$0xf]  ;;  %v4423_v33 = vld [vmem:[#allocation6 + $0x1d4] sm:$0xf0]  ;;  %1687 = vmatpush.bf16.msra.mxu1 %v3839_v18  ;;  %v3895_v35 = vor.u32 %v4407_v31, %v3894_v29  ;;  %v4373_v37 = vld [vmem:[#allocation6 + $0x44] sm:$0xf0] }
  0x18   :  { %1776 = vmatpush.bf16.msra.mxu2 %v3903_v22  ;;  %v3822_v38 = vld [vmem:[#allocation6 + $0xc0] sm:$0xf]  ;;  %v3959_v39 = vor.u32 %v4423_v33, %v3958_v32  ;;  %v4389_v40 = vld [vmem:[#allocation6 + $0xc4] sm:$0xf0]  ;;  %v3759_v45 = vor.u32 %v4373_v37, %v3758_v36  ;;  %v3750_v48 = vld [vmem:[#allocation6 + $0x30] sm:$0xf] }
  0x19   :  { %1865 = vmatpush.bf16.msra.mxu3 %v3967_v26  ;;  %v3886_v41 = vld [vmem:[#allocation6 + $0x140] sm:$0xf]  ;;  %v4405_v42 = vld [vmem:[#allocation6 + $0x144] sm:$0xf0]  ;;  %v3823_v46 = vor.u32 %v4389_v40, %v3822_v38  ;;  %v4371_v49 = vld [vmem:[#allocation6 + $0x34] sm:$0xf0] }
  0x1a   :  { %v3950_v43 = vld [vmem:[#allocation6 + $0x1c0] sm:$0xf]  ;;  %v4421_v44 = vld [vmem:[#allocation6 + $0x1c4] sm:$0xf0]  ;;  %1599 = vmatpush.bf16.msra.mxu0 %v3767_v30  ;;  %v3887_v47 = vor.u32 %v4405_v42, %v3886_v41  ;;  %v3814_v50 = vld [vmem:[#allocation6 + $0xb0] sm:$0xf]  ;;  %v3751_v57 = vor.u32 %v4371_v49, %v3750_v48 }
  0x1b   :  { %1688 = vmatpush.bf16.msra.mxu1 %v3831_v34  ;;  %v3951_v51 = vor.u32 %v4421_v44, %v3950_v43  ;;  %v4387_v52 = vld [vmem:[#allocation6 + $0xb4] sm:$0xf0]  ;;  %v3878_v53 = vld [vmem:[#allocation6 + $0x130] sm:$0xf]  ;;  %v3742_v60 = vld [vmem:[#allocation6 + $0x20] sm:$0xf] }
  0x1c   :  { %1777 = vmatpush.bf16.msra.mxu2 %v3895_v35  ;;  %v4403_v54 = vld [vmem:[#allocation6 + $0x134] sm:$0xf0]  ;;  %v3942_v55 = vld [vmem:[#allocation6 + $0x1b0] sm:$0xf]  ;;  %v3815_v58 = vor.u32 %v4387_v52, %v3814_v50  ;;  %v4369_v61 = vld [vmem:[#allocation6 + $0x24] sm:$0xf0] }
  0x1d   :  { %1866 = vmatpush.bf16.msra.mxu3 %v3959_v39  ;;  %v4419_v56 = vld [vmem:[#allocation6 + $0x1b4] sm:$0xf0]  ;;  %v3879_v59 = vor.u32 %v4403_v54, %v3878_v53  ;;  %v3806_v62 = vld [vmem:[#allocation6 + $0xa0] sm:$0xf]  ;;  %v4385_v0 = vld [vmem:[#allocation6 + $0xa4] sm:$0xf0]  ;;  %v3743_v5 = vor.u32 %v4369_v61, %v3742_v60 }
  0x1e   :  { %1600 = vmatpush.bf16.msra.mxu0 %v3759_v45  ;;  %v3943_v63 = vor.u32 %v4419_v56, %v3942_v55  ;;  %v3870_v1 = vld [vmem:[#allocation6 + $0x120] sm:$0xf]  ;;  %v4401_v2 = vld [vmem:[#allocation6 + $0x124] sm:$0xf0]  ;;  %v3807_v6 = vor.u32 %v4385_v0, %v3806_v62  ;;  %v3734_v8 = vld [vmem:[#allocation6 + $0x10] sm:$0xf] }
  0x1f   :  { %1689 = vmatpush.bf16.msra.mxu1 %v3823_v46  ;;  %v3934_v3 = vld [vmem:[#allocation6 + $0x1a0] sm:$0xf]  ;;  %v4417_v4 = vld [vmem:[#allocation6 + $0x1a4] sm:$0xf0]  ;;  %v3871_v7 = vor.u32 %v4401_v2, %v3870_v1  ;;  %v4367_v9 = vld [vmem:[#allocation6 + $0x14] sm:$0xf0] }
  0x20   :  { %1778 = vmatpush.bf16.msra.mxu2 %v3887_v47  ;;  %v3798_v10 = vld [vmem:[#allocation6 + $0x90] sm:$0xf]  ;;  %v3935_v11 = vor.u32 %v4417_v4, %v3934_v3  ;;  %v4383_v12 = vld [vmem:[#allocation6 + $0x94] sm:$0xf0]  ;;  %v3735_v17 = vor.u32 %v4367_v9, %v3734_v8  ;;  %v3726_v20 = vld [vmem:[#allocation6] sm:$0xf] }
  0x21   :  { %1867 = vmatpush.bf16.msra.mxu3 %v3951_v51  ;;  %v3862_v13 = vld [vmem:[#allocation6 + $0x110] sm:$0xf]  ;;  %v4399_v14 = vld [vmem:[#allocation6 + $0x114] sm:$0xf0]  ;;  %v3799_v18 = vor.u32 %v4383_v12, %v3798_v10  ;;  %v4365_v21 = vld [vmem:[#allocation6 + $0x4] sm:$0xf0] }
  0x22   :  { %1601 = vmatpush.bf16.msra.mxu0 %v3751_v57  ;;  %v3926_v15 = vld [vmem:[#allocation6 + $0x190] sm:$0xf]  ;;  %v4415_v16 = vld [vmem:[#allocation6 + $0x194] sm:$0xf0]  ;;  %v3863_v19 = vor.u32 %v4399_v14, %v3862_v13  ;;  %v3790_v22 = vld [vmem:[#allocation6 + $0x80] sm:$0xf]  ;;  %v3727_v29 = vor.u32 %v4365_v21, %v3726_v20 }
  0x23   :  { %1690 = vmatpush.bf16.msra.mxu1 %v3815_v58  ;;  %v3927_v23 = vor.u32 %v4415_v16, %v3926_v15  ;;  %v4381_v24 = vld [vmem:[#allocation6 + $0x84] sm:$0xf0]  ;;  %v3854_v25 = vld [vmem:[#allocation6 + $0x100] sm:$0xf]  ;;  %v4236_v32 = vld [vmem:[#allocation3 + $0x4] sm:$0xf] }
  0x24   :  { %1779 = vmatpush.bf16.msra.mxu2 %v3879_v59  ;;  %v4397_v26 = vld [vmem:[#allocation6 + $0x104] sm:$0xf0]  ;;  %v3918_v27 = vld [vmem:[#allocation6 + $0x180] sm:$0xf]  ;;  %v3791_v33 = vor.u32 %v4381_v24, %v3790_v22  ;;  %v3216_v35 = vld [vmem:[#allocation3 + $0x20] sm:$0xf0] }
  0x25   :  { %1868 = vmatpush.bf16.msra.mxu3 %v3943_v63  ;;  %v4413_v28 = vld [vmem:[#allocation6 + $0x184] sm:$0xf0]  ;;  %v3214_v30 = vld [vmem:[#allocation3] sm:$0xf]  ;;  %v3855_v34 = vor.u32 %v4397_v26, %v3854_v25  ;;  %v4237_v39 = vld [vmem:[#allocation3 + $0xc] sm:$0xf]  ;;  %v4757_v42 = vor.u32 %v4236_v32, %v3216_v35 }
  0x26   :  { %1602 = vmatpush.bf16.msra.mxu0 %v3743_v5  ;;  %v4240_v31 = vld [vmem:[#allocation3 + $0x1c] sm:$0xf0]  ;;  %v3222_v36 = vld [vmem:[#allocation3 + $0x8] sm:$0xf]  ;;  %v3919_v38 = vor.u32 %v4413_v28, %v3918_v27  ;;  %v3224_v40 = vld [vmem:[#allocation3 + $0x28] sm:$0xf0] }
  0x27   :  { %1691 = vmatpush.bf16.msra.mxu1 %v3807_v6  ;;  %v4241_v37 = vld [vmem:[#allocation3 + $0x24] sm:$0xf0]  ;;  %v4755_v41 = vor.u32 %v4240_v31, %v3214_v30  ;;  %v4761_v44 = vor.u32 %v4237_v39, %v3224_v40  ;;  %v3246_v45 = vld [vmem:[#allocation3 + $0x40] sm:$0xf]  ;;  %v4244_v47 = vld [vmem:[#allocation3 + $0x44] sm:$0xf] }
  0x28   :  { %1780 = vmatpush.bf16.msra.mxu2 %v3871_v7  ;;  %v4759_v43 = vor.u32 %v4241_v37, %v3222_v36  ;;  %v4248_v46 = vld [vmem:[#allocation3 + $0x5c] sm:$0xf0]  ;;  %v3248_v48 = vld [vmem:[#allocation3 + $0x60] sm:$0xf0]  ;;  %v3254_v49 = vld [vmem:[#allocation3 + $0x48] sm:$0xf] }
  0x29   :  { %1869 = vmatpush.bf16.msra.mxu3 %v3935_v11  ;;  %v4249_v50 = vld [vmem:[#allocation3 + $0x64] sm:$0xf0]  ;;  %v4245_v51 = vld [vmem:[#allocation3 + $0x4c] sm:$0xf]  ;;  %v4767_v53 = vor.u32 %v4248_v46, %v3246_v45  ;;  %v4769_v54 = vor.u32 %v4244_v47, %v3248_v48  ;;  %v3278_v57 = vld [vmem:[#allocation3 + $0x80] sm:$0xf] }
  0x2a   :  { %1603 = vmatpush.bf16.msra.mxu0 %v3735_v17  ;;  %v3256_v52 = vld [vmem:[#allocation3 + $0x68] sm:$0xf0]  ;;  %v4771_v55 = vor.u32 %v4249_v50, %v3254_v49  ;;  %v4256_v58 = vld [vmem:[#allocation3 + $0x9c] sm:$0xf0]  ;;  %v4252_v59 = vld [vmem:[#allocation3 + $0x84] sm:$0xf] }
  0x2b   :  { %1692 = vmatpush.bf16.msra.mxu1 %v3799_v18  ;;  %v4773_v56 = vor.u32 %v4245_v51, %v3256_v52  ;;  %v3280_v60 = vld [vmem:[#allocation3 + $0xa0] sm:$0xf0]  ;;  %v3286_v61 = vld [vmem:[#allocation3 + $0x88] sm:$0xf]  ;;  %v4253_v63 = vld [vmem:[#allocation3 + $0x8c] sm:$0xf]  ;;  %v4779_v1 = vor.u32 %v4256_v58, %v3278_v57 }
  0x2c   :  { %1781 = vmatpush.bf16.msra.mxu2 %v3863_v19  ;;  %v4257_v62 = vld [vmem:[#allocation3 + $0xa4] sm:$0xf0]  ;;  %v3288_v0 = vld [vmem:[#allocation3 + $0xa8] sm:$0xf0]  ;;  %v4781_v2 = vor.u32 %v4252_v59, %v3280_v60  ;;  %v3310_v5 = vld [vmem:[#allocation3 + $0xc0] sm:$0xf] }
  0x2d   :  { %1870 = vmatpush.bf16.msra.mxu3 %v3927_v23  ;;  %v4783_v3 = vor.u32 %v4257_v62, %v3286_v61  ;;  %v4785_v4 = vor.u32 %v4253_v63, %v3288_v0  ;;  %v4264_v6 = vld [vmem:[#allocation3 + $0xdc] sm:$0xf0]  ;;  %v4260_v7 = vld [vmem:[#allocation3 + $0xc4] sm:$0xf]  ;;  %v3318_v9 = vld [vmem:[#allocation3 + $0xc8] sm:$0xf] }
  0x2e   :  { %1604 = vmatpush.bf16.msra.mxu0 %v3727_v29  ;;  %v3312_v8 = vld [vmem:[#allocation3 + $0xe0] sm:$0xf0]  ;;  %v4265_v10 = vld [vmem:[#allocation3 + $0xe4] sm:$0xf0]  ;;  %v4261_v11 = vld [vmem:[#allocation3 + $0xcc] sm:$0xf]  ;;  %v4791_v13 = vor.u32 %v4264_v6, %v3310_v5 }
  0x2f   :  { %1693 = vmatpush.bf16.msra.mxu1 %v3791_v33  ;;  %v3320_v12 = vld [vmem:[#allocation3 + $0xe8] sm:$0xf0]  ;;  %v4793_v14 = vor.u32 %v4260_v7, %v3312_v8  ;;  %v4795_v15 = vor.u32 %v4265_v10, %v3318_v9  ;;  %v3342_v17 = vld [vmem:[#allocation3 + $0x100] sm:$0xf]  ;;  %v4268_v19 = vld [vmem:[#allocation3 + $0x104] sm:$0xf] }
  0x30   :  { %1782 = vmatpush.bf16.msra.mxu2 %v3855_v34  ;;  %v4797_v16 = vor.u32 %v4261_v11, %v3320_v12  ;;  %v4272_v18 = vld [vmem:[#allocation3 + $0x11c] sm:$0xf0]  ;;  %v3344_v20 = vld [vmem:[#allocation3 + $0x120] sm:$0xf0]  ;;  %v3350_v21 = vld [vmem:[#allocation3 + $0x108] sm:$0xf] }
  0x31   :  { %1871 = vmatpush.bf16.msra.mxu3 %v3919_v38  ;;  %1605 = vmatmul.bf16.vlgmr.msra.gmra.mxu0 %v4755_v41  ;;  %5861 = vst [vmem:[#allocation12_spill] sm:$0xff] %v4795_v15  ;;  %v4273_v22 = vld [vmem:[#allocation3 + $0x124] sm:$0xf0]  ;;  %v4269_v23 = vld [vmem:[#allocation3 + $0x10c] sm:$0xf]  ;;  %v4803_v25 = vor.u32 %v4272_v18, %v3342_v17  ;;  %v4805_v26 = vor.u32 %v4268_v19, %v3344_v20  ;;  %s3201_s14 = sshll.u32 %s5748_s5, 4  ;;  %s3202_s14 = int_to_ptr.hbm [resolvable:$true] %s3201_s14 }
  0x32   :  { %1694 = vmatmul.bf16.vlgmr.msra.gmra.mxu1 %v4757_v42  ;;  %5862 = vst [vmem:[#allocation13_spill] sm:$0xff] %v4797_v16  ;;  %v3352_v24 = vld [vmem:[#allocation3 + $0x128] sm:$0xf0]  ;;  %v4807_v27 = vor.u32 %v4273_v22, %v3350_v21  ;;  %v3374_v29 = vld [vmem:[#allocation3 + $0x140] sm:$0xf]  ;;  %vm3186_vm0 = vcmask 1040384  }
  0x33   :  { %1783 = vmatmul.bf16.vlgmr.msra.gmra.mxu2 %v4759_v43  ;;  %5863 = vst [vmem:[#allocation14_spill] sm:$0xff] %v4803_v25  ;;  %v4809_v28 = vor.u32 %v4269_v23, %v3352_v24  ;;  %v4280_v30 = vld [vmem:[#allocation3 + $0x15c] sm:$0xf0]  ;;  %v4276_v31 = vld [vmem:[#allocation3 + $0x144] sm:$0xf] }
  0x34   :  { %1872 = vmatmul.bf16.vlgmr.msra.gmra.mxu3 %v4761_v44  ;;  %5864 = vst [vmem:[#allocation15_spill] sm:$0xff] %v4805_v26  ;;  %v3376_v32 = vld [vmem:[#allocation3 + $0x160] sm:$0xf0]  ;;  %v3382_v33 = vld [vmem:[#allocation3 + $0x148] sm:$0xf]  ;;  %v4815_v37 = vor.u32 %v4280_v30, %v3374_v29 }
  0x35   :  { %5865 = vst [vmem:[#allocation16_spill] sm:$0xff] %v4807_v27  ;;  %v4281_v34 = vld [vmem:[#allocation3 + $0x164] sm:$0xf0]  ;;  %v4277_v35 = vld [vmem:[#allocation3 + $0x14c] sm:$0xf]  ;;  %v4817_v38 = vor.u32 %v4276_v31, %v3376_v32 }
  0x36   :  { %5866 = vst [vmem:[#allocation17_spill] sm:$0xff] %v4809_v28  ;;  %v3384_v36 = vld [vmem:[#allocation3 + $0x168] sm:$0xf0]  ;;  %v4819_v39 = vor.u32 %v4281_v34, %v3382_v33  ;;  %v3406_v45 = vld [vmem:[#allocation3 + $0x180] sm:$0xf] }
  0x37   :  { %5867 = vst [vmem:[#allocation18_spill] sm:$0xff] %v4815_v37  ;;  %v4821_v40 = vor.u32 %v4277_v35, %v3384_v36  ;;  %v4288_v46 = vld [vmem:[#allocation3 + $0x19c] sm:$0xf0]  ;;  %v4284_v47 = vld [vmem:[#allocation3 + $0x184] sm:$0xf] }
  0x38   :  { %5868 = vst [vmem:[#allocation19_spill] sm:$0xff] %v4817_v38  ;;  %v3408_v48 = vld [vmem:[#allocation3 + $0x1a0] sm:$0xf0]  ;;  %v3414_v49 = vld [vmem:[#allocation3 + $0x188] sm:$0xf]  ;;  %v4827_v57 = vor.u32 %v4288_v46, %v3406_v45 }
  0x39   :  { %5869 = vst [vmem:[#allocation20_spill] sm:$0xff] %v4819_v39  ;;  %v4289_v50 = vld [vmem:[#allocation3 + $0x1a4] sm:$0xf0]  ;;  %v4285_v51 = vld [vmem:[#allocation3 + $0x18c] sm:$0xf]  ;;  %v4829_v58 = vor.u32 %v4284_v47, %v3408_v48 }
  0x3a   :  { %5870 = vst [vmem:[#allocation21_spill] sm:$0xff] %v4821_v40  ;;  %v3416_v52 = vld [vmem:[#allocation3 + $0x1a8] sm:$0xf0]  ;;  %v4831_v59 = vor.u32 %v4289_v50, %v3414_v49  ;;  %v3438_v61 = vld [vmem:[#allocation3 + $0x1c0] sm:$0xf] }
  0x3b   :  { %5871 = vst [vmem:[#allocation22_spill] sm:$0xff] %v4827_v57  ;;  %v4833_v60 = vor.u32 %v4285_v51, %v3416_v52  ;;  %v4296_v62 = vld [vmem:[#allocation3 + $0x1dc] sm:$0xf0]  ;;  %v4292_v63 = vld [vmem:[#allocation3 + $0x1c4] sm:$0xf] }
  0x3c   :  { %5872 = vst [vmem:[#allocation23_spill] sm:$0xff] %v4829_v58  ;;  %v3440_v0 = vld [vmem:[#allocation3 + $0x1e0] sm:$0xf0]  ;;  %v3446_v5 = vld [vmem:[#allocation3 + $0x1c8] sm:$0xf]  ;;  %v4839_v9 = vor.u32 %v4296_v62, %v3438_v61 }
  0x3d   :  { %5873 = vst [vmem:[#allocation24_spill] sm:$0xff] %v4831_v59  ;;  %v4297_v6 = vld [vmem:[#allocation3 + $0x1e4] sm:$0xf0]  ;;  %v4293_v7 = vld [vmem:[#allocation3 + $0x1cc] sm:$0xf]  ;;  %v4841_v10 = vor.u32 %v4292_v63, %v3440_v0 }
  0x3e   :  { %5874 = vst [vmem:[#allocation25_spill] sm:$0xff] %v4833_v60  ;;  %v3448_v8 = vld [vmem:[#allocation3 + $0x1e8] sm:$0xf0]  ;;  %v4843_v11 = vor.u32 %v4297_v6, %v3446_v5  ;;  %v311_v17 = vld [vmem:[%s5745_s2] sm:$0x3] }
  0x3f   :  { %5875 = vst [vmem:[#allocation26_spill] sm:$0xff] %v4839_v9  ;;  %v4845_v12 = vor.u32 %v4293_v7, %v3448_v8  ;;  %v4854_v18 = vperm.slane %v311_v17, 0  ;;  %v3470_v19 = vld [vmem:[#allocation3 + $0x200] sm:$0xf]  ;;  %v4300_v21 = vld [vmem:[#allocation3 + $0x204] sm:$0xf] }
  0x40   :  { %5876 = vst [vmem:[#allocation27_spill] sm:$0xff] %v4841_v10  ;;  %v4304_v20 = vld [vmem:[#allocation3 + $0x21c] sm:$0xf0]  ;;  %v3472_v22 = vld [vmem:[#allocation3 + $0x220] sm:$0xf0] }
  0x41   :  { %1610 = vmatmul.bf16.gmra.mxu0 %v4767_v53  ;;  %5877 = vst [vmem:[#allocation28_spill] sm:$0xff] %v4843_v11  ;;  %v3478_v23 = vld [vmem:[#allocation3 + $0x208] sm:$0xf]  ;;  %v4301_v29 = vld [vmem:[#allocation3 + $0x20c] sm:$0xf]  ;;  %v4856_v31 = vor.u32 %v4304_v20, %v3470_v19  ;;  %v4858_v33 = vor.u32 %v4300_v21, %v3472_v22 }
  0x42   :  { %1699 = vmatmul.bf16.gmra.mxu1 %v4769_v54  ;;  %5878 = vst [vmem:[#allocation29_spill] sm:$0xff] %v4845_v12  ;;  %v4305_v24 = vld [vmem:[#allocation3 + $0x224] sm:$0xf0]  ;;  %v3480_v30 = vld [vmem:[#allocation3 + $0x228] sm:$0xf0] }
  0x43   :  { %1788 = vmatmul.bf16.gmra.mxu2 %v4771_v55  ;;  %5879 = vst [vmem:[#allocation30_spill] sm:$0xff] %v4856_v31  ;;  %v4860_v34 = vor.u32 %v4305_v24, %v3478_v23  ;;  %v4863_v45 = vor.u32 %v4301_v29, %v3480_v30  ;;  %v3502_v63 = vld [vmem:[#allocation3 + $0x240] sm:$0xf]  ;;  %v4308_v5 = vld [vmem:[#allocation3 + $0x244] sm:$0xf] }
  0x44   :  { %1877 = vmatmul.bf16.gmra.mxu3 %v4773_v56  ;;  %5880 = vst [vmem:[#allocation31_spill] sm:$0xff] %v4858_v33  ;;  %v4312_v0 = vld [vmem:[#allocation3 + $0x25c] sm:$0xf0]  ;;  %v3504_v6 = vld [vmem:[#allocation3 + $0x260] sm:$0xf0] }
  0x45   :  { %5881 = vst [vmem:[#allocation32_spill] sm:$0xff] %v4860_v34  ;;  %v3510_v7 = vld [vmem:[#allocation3 + $0x248] sm:$0xf]  ;;  %v4309_v17 = vld [vmem:[#allocation3 + $0x24c] sm:$0xf]  ;;  %v4872_v21 = vor.u32 %v4312_v0, %v3502_v63  ;;  %v4874_v29 = vor.u32 %v4308_v5, %v3504_v6 }
  0x46   :  { %5882 = vst [vmem:[#allocation33_spill] sm:$0xff] %v4863_v45  ;;  %v4313_v8 = vld [vmem:[#allocation3 + $0x264] sm:$0xf0]  ;;  %v3512_v19 = vld [vmem:[#allocation3 + $0x268] sm:$0xf0] }
  0x47   :  { %5883 = vst [vmem:[#allocation34_spill] sm:$0xff] %v4872_v21  ;;  %v4876_v30 = vor.u32 %v4313_v8, %v3510_v7  ;;  %v3534_v5 = vld [vmem:[#allocation3 + $0x280] sm:$0xf]  ;;  %v4316_v7 = vld [vmem:[#allocation3 + $0x284] sm:$0xf] }
  0x48   :  { %5884 = vst [vmem:[#allocation35_spill] sm:$0xff] %v4874_v29  ;;  %v4320_v6 = vld [vmem:[#allocation3 + $0x29c] sm:$0xf0]  ;;  %v3536_v8 = vld [vmem:[#allocation3 + $0x2a0] sm:$0xf0] }
  0x49   :  { %5885 = vst [vmem:[#allocation36_spill] sm:$0xff] %v4876_v30 }
  0x51   :  { %1615 = vmatmul.bf16.gmra.mxu0 %v4779_v1 }
  0x52   :  { %1704 = vmatmul.bf16.gmra.mxu1 %v4781_v2 }
  0x53   :  { %1793 = vmatmul.bf16.gmra.mxu2 %v4783_v3 }
  0x54   :  { %1882 = vmatmul.bf16.gmra.mxu3 %v4785_v4 }
  0x61   :  { %1620 = vmatmul.bf16.gmra.mxu0 %v4791_v13 }
  0x62   :  { %1709 = vmatmul.bf16.gmra.mxu1 %v4793_v14 }
  0x63   :  { %1798 = vmatmul.bf16.gmra.mxu2 %v4795_v15 }
  0x64   :  { %1887 = vmatmul.bf16.gmra.mxu3 %v4797_v16 }
  0x71   :  { %1625 = vmatmul.bf16.gmra.mxu0 %v4803_v25 }
  0x72   :  { %1714 = vmatmul.bf16.gmra.mxu1 %v4805_v26 }
  0x73   :  { %1803 = vmatmul.bf16.gmra.mxu2 %v4807_v27 }
  0x74   :  { %1892 = vmatmul.bf16.gmra.mxu3 %v4809_v28 }
  0x81   :  { %1630 = vmatmul.bf16.gmra.mxu0 %v4815_v37 }
  0x82   :  { %1719 = vmatmul.bf16.gmra.mxu1 %v4817_v38 }
  0x83   :  { %1808 = vmatmul.bf16.gmra.mxu2 %v4819_v39 }
  0x84   :  { %1897 = vmatmul.bf16.gmra.mxu3 %v4821_v40 }
  0x91   :  { %1635 = vmatmul.bf16.gmra.mxu0 %v4827_v57  ;;  %v3982_v57 = vld [vmem:[#allocation6 + $0x200] sm:$0xf] }
  0x92   :  { %1724 = vmatmul.bf16.gmra.mxu1 %v4829_v58 }
  0x93   :  { %1813 = vmatmul.bf16.gmra.mxu2 %v4831_v59 }
  0x94   :  { %1902 = vmatmul.bf16.gmra.mxu3 %v4833_v60 }
  0xa1   :  { %1640 = vmatmul.bf16.gmra.mxu0 %v4839_v9 }
  0xa2   :  { %1729 = vmatmul.bf16.gmra.mxu1 %v4841_v10 }
  0xa3   :  { %1818 = vmatmul.bf16.gmra.mxu2 %v4843_v11  ;;  %v4471_v11 = vld [vmem:[#allocation6 + $0x354] sm:$0xf0] }
  0xa4   :  { %1907 = vmatmul.bf16.gmra.mxu3 %v4845_v12  ;;  %v4455_v12 = vld [vmem:[#allocation6 + $0x2d4] sm:$0xf0] }
  0xae   :  { %v1606_v32 = vpop.f32.mrf.mxu0 }
  0xaf   :  { %v1607_v35 = vadd.f32 %v1606_v32, %v4854_v18  ;;  %v1695_v36 = vpop.f32.mrf.mxu1 }
  0xb1   :  { %v1696_v46 = vadd.f32 %v1695_v36, %v1607_v35  ;;  %1645 = vmatmul.bf16.gmra.mxu0 %v4856_v31  ;;  %v4879_v36 = vor.u32 %v4309_v17, %v3512_v19  ;;  %v3542_v17 = vld [vmem:[#allocation3 + $0x288] sm:$0xf] }
  0xb2   :  { %1734 = vmatmul.bf16.gmra.mxu1 %v4858_v33  ;;  %v4321_v19 = vld [vmem:[#allocation3 + $0x2a4] sm:$0xf0]  ;;  %v4340_v33 = vld [vmem:[#allocation3 + $0x344] sm:$0xf] }
  0xb3   :  { %1823 = vmatmul.bf16.gmra.mxu2 %v4860_v34  ;;  %5886 = vst [vmem:[#allocation37_spill] sm:$0xff] %v4879_v36 }
  0xb4   :  { %1912 = vmatmul.bf16.gmra.mxu3 %v4863_v45 }
  0xb6   :  { %v1784_v47 = vpop.f32.mrf.mxu2  ;;  %v1608_v50 = vpop.f32.mrf.mxu0 }
  0xb7   :  { %v1785_v48 = vadd.f32 %v1784_v47, %v1696_v46  ;;  %v1873_v49 = vpop.f32.mrf.mxu3  ;;  %v1609_v51 = vadd.f32 %v1608_v50, %v4854_v18  ;;  %v1697_v52 = vpop.f32.mrf.mxu1 }
  0xb9   :  { %v4870_v61 = vadd.f32 %v1873_v49, %v1785_v48  ;;  %v1698_v62 = vadd.f32 %v1697_v52, %v1609_v51 }
  0xbe   :  { %v1786_v20 = vpop.f32.mrf.mxu2  ;;  %v1611_v24 = vpop.f32.mrf.mxu0 }
  0xbf   :  { %v1787_v22 = vadd.f32 %v1786_v20, %v1698_v62  ;;  %v1875_v23 = vpop.f32.mrf.mxu3  ;;  %v1612_v32 = vadd.f32 %v1611_v24, %v4854_v18  ;;  %v1700_v35 = vpop.f32.mrf.mxu1  ;;  %v4317_v20 = vld [vmem:[#allocation3 + $0x28c] sm:$0xf]  ;;  %v4890_v24 = vor.u32 %v4320_v6, %v3534_v5  ;;  %v4475_v5 = vld [vmem:[#allocation6 + $0x374] sm:$0xf0] }
  0xc1   :  { %v4881_v46 = vadd.f32 %v1875_v23, %v1787_v22  ;;  %v1701_v47 = vadd.f32 %v1700_v35, %v1612_v32  ;;  %1650 = vmatmul.bf16.gmra.mxu0 %v4872_v21  ;;  %v3544_v22 = vld [vmem:[#allocation3 + $0x2a8] sm:$0xf0]  ;;  %5887 = vst [vmem:[#allocation38_spill] sm:$0xff] %v4890_v24 }
  0xc2   :  { %1739 = vmatmul.bf16.gmra.mxu1 %v4874_v29  ;;  %v4329_v29 = vld [vmem:[#allocation3 + $0x2e4] sm:$0xf0] }
  0xc3   :  { %1828 = vmatmul.bf16.gmra.mxu2 %v4876_v30  ;;  %v3568_v30 = vld [vmem:[#allocation3 + $0x2e0] sm:$0xf0] }
  0xc4   :  { %1917 = vmatmul.bf16.gmra.mxu3 %v4879_v36 }
  0xc6   :  { %v1789_v48 = vpop.f32.mrf.mxu2  ;;  %v1613_v51 = vpop.f32.mrf.mxu0 }
  0xc7   :  { %v1790_v49 = vadd.f32 %v1789_v48, %v1701_v47  ;;  %v1878_v50 = vpop.f32.mrf.mxu3  ;;  %v1614_v52 = vadd.f32 %v1613_v51, %v4854_v18  ;;  %v1702_v62 = vpop.f32.mrf.mxu1  ;;  %v4892_v48 = vor.u32 %v4316_v7, %v3536_v8  ;;  %v4894_v51 = vor.u32 %v4321_v19, %v3542_v17 }
  0xc9   :  { %v4888_v63 = vadd.f32 %v1878_v50, %v1790_v49  ;;  %v1703_v0 = vadd.f32 %v1702_v62, %v1614_v52  ;;  %5888 = vst [vmem:[#allocation39_spill] sm:$0xff] %v4892_v48  ;;  %v4897_v52 = vor.u32 %v4317_v20, %v3544_v22 }
  0xca   :  { %5889 = vst [vmem:[#allocation40_spill] sm:$0xff] %v4894_v51 }
  0xcb   :  { %5890 = vst [vmem:[#allocation41_spill] sm:$0xff] %v4897_v52 }
  0xce   :  { %v1791_v23 = vpop.f32.mrf.mxu2  ;;  %v1616_v47 = vpop.f32.mrf.mxu0 }
  0xcf   :  { %v1792_v32 = vadd.f32 %v1791_v23, %v1703_v0  ;;  %v1880_v35 = vpop.f32.mrf.mxu3  ;;  %v1617_v49 = vadd.f32 %v1616_v47, %v4854_v18  ;;  %v1705_v50 = vpop.f32.mrf.mxu1  ;;  %v4166_v0 = vld [vmem:[#allocation6 + $0x370] sm:$0xf] }
  0xd0   :  { %v4167_v6 = vor.u32 %v4475_v5, %v4166_v0  ;;  %v4230_v47 = vld [vmem:[#allocation6 + $0x3f0] sm:$0xf]  ;;  %v4328_v0 = vld [vmem:[#allocation3 + $0x2dc] sm:$0xf0]  ;;  %v4324_v5 = vld [vmem:[#allocation3 + $0x2c4] sm:$0xf] }
  0xd1   :  { %v4899_v62 = vadd.f32 %v1880_v35, %v1792_v32  ;;  %v1706_v36 = vadd.f32 %v1705_v50, %v1617_v49  ;;  %1655 = vmatmul.bf16.gmra.mxu0 %v4890_v24  ;;  %v4038_v32 = vld [vmem:[#allocation6 + $0x270] sm:$0xf]  ;;  %v4443_v35 = vld [vmem:[#allocation6 + $0x274] sm:$0xf0]  ;;  %v3566_v24 = vld [vmem:[#allocation3 + $0x2c0] sm:$0xf] }
  0xd2   :  { %1744 = vmatmul.bf16.gmra.mxu1 %v4892_v48  ;;  %2131 = vmatpush.bf16.msrb.mxu2 %v4167_v6  ;;  %v4039_v50 = vor.u32 %v4443_v35, %v4038_v32  ;;  %v4459_v48 = vld [vmem:[#allocation6 + $0x2f4] sm:$0xf0]  ;;  %v3574_v6 = vld [vmem:[#allocation3 + $0x2c8] sm:$0xf]  ;;  %v4908_v21 = vor.u32 %v4328_v0, %v3566_v24  ;;  %v4910_v35 = vor.u32 %v4324_v5, %v3568_v30 }
  0xd3   :  { %1833 = vmatmul.bf16.gmra.mxu2 %v4894_v51  ;;  %v4491_v51 = vld [vmem:[#allocation6 + $0x3f4] sm:$0xf0]  ;;  %v4912_v45 = vor.u32 %v4329_v29, %v3574_v6  ;;  %v3598_v6 = vld [vmem:[#allocation3 + $0x300] sm:$0xf] }
  0xd4   :  { %1922 = vmatmul.bf16.gmra.mxu3 %v4897_v52  ;;  %v4102_v52 = vld [vmem:[#allocation6 + $0x2f0] sm:$0xf]  ;;  %1953 = vmatpush.bf16.msrb.mxu0 %v4039_v50  ;;  %5891 = vst [vmem:[#allocation42_spill] sm:$0xff] %v4908_v21 }
  0xd5   :  { %5892 = vst [vmem:[#allocation43_spill] sm:$0xff] %v4910_v35 }
  0xd6   :  { %v1794_v7 = vpop.f32.mrf.mxu2  ;;  %v1618_v19 = vpop.f32.mrf.mxu0  ;;  %5893 = vst [vmem:[#allocation44_spill] sm:$0xff] %v4912_v45 }
  0xd7   :  { %v1795_v8 = vadd.f32 %v1794_v7, %v1706_v36  ;;  %v1883_v17 = vpop.f32.mrf.mxu3  ;;  %v1619_v20 = vadd.f32 %v1618_v19, %v4854_v18  ;;  %v1707_v22 = vpop.f32.mrf.mxu1  ;;  %v4231_v36 = vor.u32 %v4491_v51, %v4230_v47  ;;  %v4103_v7 = vor.u32 %v4459_v48, %v4102_v52  ;;  %v4325_v19 = vld [vmem:[#allocation3 + $0x2cc] sm:$0xf] }
  0xd9   :  { %v4906_v23 = vadd.f32 %v1883_v17, %v1795_v8  ;;  %v1708_v49 = vadd.f32 %v1707_v22, %v1619_v20  ;;  %v3576_v8 = vld [vmem:[#allocation3 + $0x2e8] sm:$0xf0]  ;;  %2220 = vmatpush.bf16.msrb.mxu3 %v4231_v36  ;;  %2042 = vmatpush.bf16.msrb.mxu1 %v4103_v7 }
  0xda   :  { %v4915_v52 = vor.u32 %v4325_v19, %v3576_v8  ;;  %v4336_v19 = vld [vmem:[#allocation3 + $0x31c] sm:$0xf0]  ;;  %v4332_v8 = vld [vmem:[#allocation3 + $0x304] sm:$0xf] }
  0xdc   :  { %5894 = vst [vmem:[#allocation45_spill] sm:$0xff] %v4915_v52 }
  0xde   :  { %v1796_v17 = vpop.f32.mrf.mxu2  ;;  %v1621_v32 = vpop.f32.mrf.mxu0 }
  0xdf   :  { %v1797_v20 = vadd.f32 %v1796_v17, %v1708_v49  ;;  %v1885_v22 = vpop.f32.mrf.mxu3  ;;  %v1622_v48 = vadd.f32 %v1621_v32, %v4854_v18  ;;  %v1710_v51 = vpop.f32.mrf.mxu1  ;;  %v3600_v17 = vld [vmem:[#allocation3 + $0x320] sm:$0xf0]  ;;  %v4333_v32 = vld [vmem:[#allocation3 + $0x30c] sm:$0xf] }
  0xe1   :  { %v4917_v47 = vadd.f32 %v1885_v22, %v1797_v20  ;;  %v1711_v50 = vadd.f32 %v1710_v51, %v1622_v48  ;;  %1660 = vmatmul.bf16.gmra.mxu0 %v4908_v21  ;;  %v3606_v20 = vld [vmem:[#allocation3 + $0x308] sm:$0xf]  ;;  %v3608_v48 = vld [vmem:[#allocation3 + $0x328] sm:$0xf0] }
  0xe2   :  { %1749 = vmatmul.bf16.gmra.mxu1 %v4910_v35  ;;  %v4337_v22 = vld [vmem:[#allocation3 + $0x324] sm:$0xf0]  ;;  %v4928_v35 = vor.u32 %v4332_v8, %v3600_v17  ;;  %v4030_v17 = vld [vmem:[#allocation6 + $0x260] sm:$0xf] }
  0xe3   :  { %1838 = vmatmul.bf16.gmra.mxu2 %v4912_v45 }
  0xe4   :  { %1927 = vmatmul.bf16.gmra.mxu3 %v4915_v52  ;;  %v4926_v52 = vor.u32 %v4336_v19, %v3598_v6  ;;  %5896 = vst [vmem:[#allocation47_spill] sm:$0xff] %v4928_v35  ;;  %v4473_v6 = vld [vmem:[#allocation6 + $0x364] sm:$0xf0] }
  0xe6   :  { %v1799_v30 = vpop.f32.mrf.mxu2  ;;  %v1623_v49 = vpop.f32.mrf.mxu0  ;;  %5895 = vst [vmem:[#allocation46_spill] sm:$0xff] %v4926_v52 }
  0xe7   :  { %v1800_v24 = vadd.f32 %v1799_v30, %v1711_v50  ;;  %v1888_v29 = vpop.f32.mrf.mxu3  ;;  %v1624_v0 = vadd.f32 %v1623_v49, %v4854_v18  ;;  %v1712_v5 = vpop.f32.mrf.mxu1  ;;  %v4930_v49 = vor.u32 %v4337_v22, %v3606_v20  ;;  %v4222_v20 = vld [vmem:[#allocation6 + $0x3e0] sm:$0xf] }
  0xe9   :  { %v4924_v36 = vadd.f32 %v1888_v29, %v1800_v24  ;;  %v1713_v7 = vadd.f32 %v1712_v5, %v1624_v0  ;;  %5897 = vst [vmem:[#allocation48_spill] sm:$0xff] %v4930_v49  ;;  %v4933_v0 = vor.u32 %v4333_v32, %v3608_v48 }
  0xeb   :  { %5898 = vst [vmem:[#allocation49_spill] sm:$0xff] %v4933_v0 }
  0xee   :  { %v1801_v51 = vpop.f32.mrf.mxu2  ;;  %v1626_v45 = vpop.f32.mrf.mxu0 }
  0xef   :  { %v1802_v50 = vadd.f32 %v1801_v51, %v1713_v7  ;;  %v1890_v30 = vpop.f32.mrf.mxu3  ;;  %v1627_v24 = vadd.f32 %v1626_v45, %v4854_v18  ;;  %v1715_v29 = vpop.f32.mrf.mxu1  ;;  %v4158_v7 = vld [vmem:[#allocation6 + $0x360] sm:$0xf]  ;;  %v4441_v45 = vld [vmem:[#allocation6 + $0x264] sm:$0xf0] }
  0xf0   :  { %v4159_v19 = vor.u32 %v4473_v6, %v4158_v7  ;;  %v4031_v51 = vor.u32 %v4441_v45, %v4030_v17  ;;  %v3630_v7 = vld [vmem:[#allocation3 + $0x340] sm:$0xf]  ;;  %v4439_v17 = vld [vmem:[#allocation6 + $0x254] sm:$0xf0]  ;;  %v4086_v45 = vld [vmem:[#allocation6 + $0x2d0] sm:$0xf] }
  0xf1   :  { %v4935_v5 = vadd.f32 %v1890_v30, %v1802_v50  ;;  %v1716_v21 = vadd.f32 %v1715_v29, %v1627_v24  ;;  %1665 = vmatmul.bf16.gmra.mxu0 %v4926_v52  ;;  %v4489_v50 = vld [vmem:[#allocation6 + $0x3e4] sm:$0xf0]  ;;  %v4094_v30 = vld [vmem:[#allocation6 + $0x2e0] sm:$0xf] }
  0xf2   :  { %1754 = vmatmul.bf16.gmra.mxu1 %v4928_v35  ;;  %2132 = vmatpush.bf16.msrb.mxu2 %v4159_v19  ;;  %v4457_v24 = vld [vmem:[#allocation6 + $0x2e4] sm:$0xf0]  ;;  %v4223_v35 = vor.u32 %v4489_v50, %v4222_v20  ;;  %v4344_v6 = vld [vmem:[#allocation3 + $0x35c] sm:$0xf0]  ;;  %v4022_v19 = vld [vmem:[#allocation6 + $0x250] sm:$0xf]  ;;  %v4087_v50 = vor.u32 %v4455_v12, %v4086_v45 }
  0xf3   :  { %1843 = vmatmul.bf16.gmra.mxu2 %v4930_v49  ;;  %1954 = vmatpush.bf16.msrb.mxu0 %v4031_v51  ;;  %v4023_v31 = vor.u32 %v4439_v17, %v4022_v19  ;;  %v4345_v20 = vld [vmem:[#allocation3 + $0x364] sm:$0xf0]  ;;  %v3640_v51 = vld [vmem:[#allocation3 + $0x368] sm:$0xf0]  ;;  %v4944_v10 = vor.u32 %v4344_v6, %v3630_v7  ;;  %v4078_v19 = vld [vmem:[#allocation6 + $0x2c0] sm:$0xf] }
  0xf4   :  { %1932 = vmatmul.bf16.gmra.mxu3 %v4933_v0  ;;  %v4095_v0 = vor.u32 %v4457_v24, %v4094_v30  ;;  %v4487_v30 = vld [vmem:[#allocation6 + $0x3d4] sm:$0xf0]  ;;  %v4341_v24 = vld [vmem:[#allocation3 + $0x34c] sm:$0xf]  ;;  %v4453_v45 = vld [vmem:[#allocation6 + $0x2c4] sm:$0xf0] }
  0xf5   :  { %2221 = vmatpush.bf16.msrb.mxu3 %v4223_v35  ;;  %5899 = vst [vmem:[#allocation50_spill] sm:$0xff] %v4944_v10  ;;  %v4014_v35 = vld [vmem:[#allocation6 + $0x240] sm:$0xf] }
  0xf6   :  { %v1804_v8 = vpop.f32.mrf.mxu2  ;;  %v1628_v48 = vpop.f32.mrf.mxu0  ;;  %2043 = vmatpush.bf16.msrb.mxu1 %v4095_v0  ;;  %v4437_v0 = vld [vmem:[#allocation6 + $0x244] sm:$0xf0] }
  0xf7   :  { %v1805_v22 = vadd.f32 %v1804_v8, %v1716_v21  ;;  %v1893_v32 = vpop.f32.mrf.mxu3  ;;  %v1629_v29 = vadd.f32 %v1628_v48, %v4854_v18  ;;  %v1717_v49 = vpop.f32.mrf.mxu1  ;;  %v3632_v21 = vld [vmem:[#allocation3 + $0x360] sm:$0xf0]  ;;  %v3638_v8 = vld [vmem:[#allocation3 + $0x348] sm:$0xf]  ;;  %v4150_v48 = vld [vmem:[#allocation6 + $0x350] sm:$0xf]  ;;  %1955 = vmatpush.bf16.msrb.mxu0 %v4023_v31  ;;  %v4015_v12 = vor.u32 %v4437_v0, %v4014_v35 }
  0xf8   :  { %v4946_v59 = vor.u32 %v4340_v33, %v3632_v21  ;;  %v4142_v31 = vld [vmem:[#allocation6 + $0x340] sm:$0xf]  ;;  %v4467_v35 = vld [vmem:[#allocation6 + $0x334] sm:$0xf0]  ;;  %v4198_v0 = vld [vmem:[#allocation6 + $0x3b0] sm:$0xf] }
  0xf9   :  { %v4942_v52 = vadd.f32 %v1893_v32, %v1805_v22  ;;  %v1718_v34 = vadd.f32 %v1717_v49, %v1629_v29  ;;  %v4151_v22 = vor.u32 %v4471_v11, %v4150_v48  ;;  %v4214_v32 = vld [vmem:[#allocation6 + $0x3d0] sm:$0xf]  ;;  %v4948_v11 = vor.u32 %v4345_v20, %v3638_v8  ;;  %v4469_v48 = vld [vmem:[#allocation6 + $0x344] sm:$0xf0]  ;;  %v4435_v8 = vld [vmem:[#allocation6 + $0x234] sm:$0xf0] }
  0xfa   :  { %v4215_v49 = vor.u32 %v4487_v30, %v4214_v32  ;;  %2044 = vmatpush.bf16.msrb.mxu1 %v4087_v50  ;;  %5900 = vst [vmem:[#allocation51_spill] sm:$0xff] %v4946_v59  ;;  %v4951_v50 = vor.u32 %v4341_v24, %v3640_v51  ;;  %v4143_v32 = vor.u32 %v4469_v48, %v4142_v31  ;;  %v4206_v30 = vld [vmem:[#allocation6 + $0x3c0] sm:$0xf]  ;;  %v4070_v20 = vld [vmem:[#allocation6 + $0x2b0] sm:$0xf] }
  0xfb   :  { %2133 = vmatpush.bf16.msrb.mxu2 %v4151_v22  ;;  %5901 = vst [vmem:[#allocation52_spill] sm:$0xff] %v4948_v11  ;;  %v4079_v22 = vor.u32 %v4453_v45, %v4078_v19  ;;  %1956 = vmatpush.bf16.msrb.mxu0 %v4015_v12  ;;  %v4451_v24 = vld [vmem:[#allocation6 + $0x2b4] sm:$0xf0]  ;;  %v3998_v45 = vld [vmem:[#allocation6 + $0x220] sm:$0xf] }
  0xfc   :  { %2222 = vmatpush.bf16.msrb.mxu3 %v4215_v49  ;;  %5902 = vst [vmem:[#allocation53_spill] sm:$0xff] %v4951_v50  ;;  %v4071_v51 = vor.u32 %v4451_v24, %v4070_v20  ;;  %v4134_v49 = vld [vmem:[#allocation6 + $0x330] sm:$0xf]  ;;  %v4483_v12 = vld [vmem:[#allocation6 + $0x3b4] sm:$0xf0] }
  0xfd   :  { %v4433_v31 = vld [vmem:[#allocation6 + $0x224] sm:$0xf0] }
  0xfe   :  { %v1806_v29 = vpop.f32.mrf.mxu2  ;;  %v1631_v60 = vpop.f32.mrf.mxu0  ;;  %2045 = vmatpush.bf16.msrb.mxu1 %v4079_v22  ;;  %v4199_v22 = vor.u32 %v4483_v12, %v4198_v0  ;;  %v4465_v24 = vld [vmem:[#allocation6 + $0x324] sm:$0xf0]  ;;  %v4348_v12 = vld [vmem:[#allocation3 + $0x384] sm:$0xf] }
  0xff   :  { %v1807_v17 = vadd.f32 %v1806_v29, %v1718_v34  ;;  %v1895_v9 = vpop.f32.mrf.mxu3  ;;  %v1632_v7 = vadd.f32 %v1631_v60, %v4854_v18  ;;  %v1720_v6 = vpop.f32.mrf.mxu1  ;;  %v4485_v34 = vld [vmem:[#allocation6 + $0x3c4] sm:$0xf0]  ;;  %v4006_v60 = vld [vmem:[#allocation6 + $0x230] sm:$0xf]  ;;  %2134 = vmatpush.bf16.msrb.mxu2 %v4143_v32  ;;  %v3999_v32 = vor.u32 %v4433_v31, %v3998_v45  ;;  %v3664_v45 = vld [vmem:[#allocation3 + $0x3a0] sm:$0xf0] }
 0x100   :  { %v4207_v33 = vor.u32 %v4485_v34, %v4206_v30  ;;  %v4062_v30 = vld [vmem:[#allocation6 + $0x2a0] sm:$0xf]  ;;  %v4449_v34 = vld [vmem:[#allocation6 + $0x2a4] sm:$0xf0]  ;;  %v4964_v39 = vor.u32 %v4348_v12, %v3664_v45 }
 0x101   :  { %v4953_v29 = vadd.f32 %v1895_v9, %v1807_v17  ;;  %v1721_v21 = vadd.f32 %v1720_v6, %v1632_v7  ;;  %1670 = vmatmul.bf16.gmra.mxu0 %v4944_v10  ;;  %v4007_v9 = vor.u32 %v4435_v8, %v4006_v60  ;;  %v4135_v17 = vor.u32 %v4467_v35, %v4134_v49  ;;  %v4190_v49 = vld [vmem:[#allocation6 + $0x3a0] sm:$0xf]  ;;  %v4481_v35 = vld [vmem:[#allocation6 + $0x3a4] sm:$0xf0]  ;;  %v4463_v10 = vld [vmem:[#allocation6 + $0x314] sm:$0xf0] }
 0x102   :  { %1759 = vmatmul.bf16.gmra.mxu1 %v4946_v59  ;;  %2223 = vmatpush.bf16.msrb.mxu3 %v4207_v33  ;;  %v4126_v33 = vld [vmem:[#allocation6 + $0x320] sm:$0xf]  ;;  %v4063_v20 = vor.u32 %v4449_v34, %v4062_v30  ;;  %v3670_v31 = vld [vmem:[#allocation3 + $0x388] sm:$0xf]  ;;  %v4431_v59 = vld [vmem:[#allocation6 + $0x214] sm:$0xf0] }
 0x103   :  { %1848 = vmatmul.bf16.gmra.mxu2 %v4948_v11  ;;  %1957 = vmatpush.bf16.msrb.mxu0 %v4007_v9  ;;  %v4127_v9 = vor.u32 %v4465_v24, %v4126_v33  ;;  %v3990_v11 = vld [vmem:[#allocation6 + $0x210] sm:$0xf]  ;;  %v4447_v30 = vld [vmem:[#allocation6 + $0x294] sm:$0xf0]  ;;  %v4349_v24 = vld [vmem:[#allocation3 + $0x38c] sm:$0xf] }
 0x104   :  { %1937 = vmatmul.bf16.gmra.mxu3 %v4951_v50  ;;  %2046 = vmatpush.bf16.msrb.mxu1 %v4071_v51  ;;  %v4191_v51 = vor.u32 %v4481_v35, %v4190_v49  ;;  %v4118_v34 = vld [vmem:[#allocation6 + $0x310] sm:$0xf]  ;;  %v4479_v33 = vld [vmem:[#allocation6 + $0x394] sm:$0xf0]  ;;  %5904 = vst [vmem:[#allocation55_spill] sm:$0xff] %v4964_v39 }
 0x105   :  { %2135 = vmatpush.bf16.msrb.mxu2 %v4135_v17  ;;  %v3991_v17 = vor.u32 %v4431_v59, %v3990_v11  ;;  %v4119_v58 = vor.u32 %v4463_v10, %v4118_v34  ;;  %v4445_v10 = vld [vmem:[#allocation6 + $0x284] sm:$0xf0] }
 0x106   :  { %v1809_v19 = vpop.f32.mrf.mxu2  ;;  %v1633_v6 = vpop.f32.mrf.mxu0  ;;  %2224 = vmatpush.bf16.msrb.mxu3 %v4199_v22  ;;  %v4182_v22 = vld [vmem:[#allocation6 + $0x390] sm:$0xf] }
 0x107   :  { %v1810_v48 = vadd.f32 %v1809_v19, %v1721_v21  ;;  %v1898_v7 = vpop.f32.mrf.mxu3  ;;  %v1634_v60 = vadd.f32 %v1633_v6, %v4854_v18  ;;  %v1722_v8 = vpop.f32.mrf.mxu1  ;;  %v3662_v21 = vld [vmem:[#allocation3 + $0x380] sm:$0xf]  ;;  %v4054_v6 = vld [vmem:[#allocation6 + $0x290] sm:$0xf]  ;;  %1958 = vmatpush.bf16.msrb.mxu0 %v3999_v32  ;;  %v4429_v32 = vld [vmem:[#allocation6 + $0x204] sm:$0xf0] }
 0x108   :  { %v4352_v19 = vld [vmem:[#allocation3 + $0x39c] sm:$0xf0]  ;;  %2047 = vmatpush.bf16.msrb.mxu1 %v4063_v20 }
 0x109   :  { %v4960_v50 = vadd.f32 %v1898_v7, %v1810_v48  ;;  %v1723_v0 = vadd.f32 %v1722_v8, %v1634_v60  ;;  %v4353_v48 = vld [vmem:[#allocation3 + $0x3a4] sm:$0xf0]  ;;  %2136 = vmatpush.bf16.msrb.mxu2 %v4127_v9  ;;  %v4055_v7 = vor.u32 %v4447_v30, %v4054_v6  ;;  %v3672_v60 = vld [vmem:[#allocation3 + $0x3a8] sm:$0xf0]  ;;  %v4183_v8 = vor.u32 %v4479_v33, %v4182_v22  ;;  %v4046_v20 = vld [vmem:[#allocation6 + $0x280] sm:$0xf] }
 0x10a   :  { %2225 = vmatpush.bf16.msrb.mxu3 %v4191_v51  ;;  %v4962_v35 = vor.u32 %v4352_v19, %v3662_v21  ;;  %v4966_v9 = vor.u32 %v4353_v48, %v3670_v31  ;;  %v4110_v6 = vld [vmem:[#allocation6 + $0x300] sm:$0xf]  ;;  %v4461_v30 = vld [vmem:[#allocation6 + $0x304] sm:$0xf0]  ;;  %v4969_v21 = vor.u32 %v4349_v24, %v3672_v60  ;;  %v3983_v19 = vor.u32 %v4429_v32, %v3982_v57 }
 0x10b   :  { %1959 = vmatpush.bf16.msrb.mxu0 %v3991_v17  ;;  %v4174_v22 = vld [vmem:[#allocation6 + $0x380] sm:$0xf]  ;;  %v4047_v12 = vor.u32 %v4445_v10, %v4046_v20  ;;  %v4111_v45 = vor.u32 %v4461_v30, %v4110_v6  ;;  %v4356_v20 = vld [vmem:[#allocation3 + $0x3c4] sm:$0xf]  ;;  %v4361_v10 = vld [vmem:[#allocation3 + $0x3e4] sm:$0xf0] }
 0x10c   :  { %5903 = vst [vmem:[#allocation54_spill] sm:$0xff] %v4962_v35  ;;  %2048 = vmatpush.bf16.msrb.mxu1 %v4055_v7  ;;  %v4360_v32 = vld [vmem:[#allocation3 + $0x3dc] sm:$0xf0]  ;;  %v4357_v6 = vld [vmem:[#allocation3 + $0x3cc] sm:$0xf] }
 0x10d   :  { %5905 = vst [vmem:[#allocation56_spill] sm:$0xff] %v4966_v9  ;;  %2137 = vmatpush.bf16.msrb.mxu2 %v4119_v58  ;;  %v3704_v30 = vld [vmem:[#allocation3 + $0x3e8] sm:$0xf0] }
 0x10e   :  { %v1811_v49 = vpop.f32.mrf.mxu2  ;;  %v1636_v40 = vpop.f32.mrf.mxu0  ;;  %5906 = vst [vmem:[#allocation57_spill] sm:$0xff] %v4969_v21  ;;  %2226 = vmatpush.bf16.msrb.mxu3 %v4183_v8 }
 0x10f   :  { %v1812_v59 = vadd.f32 %v1811_v49, %v1723_v0  ;;  %v1900_v11 = vpop.f32.mrf.mxu3  ;;  %v1637_v51 = vadd.f32 %v1636_v40, %v4854_v18  ;;  %v1725_v34 = vpop.f32.mrf.mxu1  ;;  %v4477_v0 = vld [vmem:[#allocation6 + $0x384] sm:$0xf0]  ;;  %1960 = vmatpush.bf16.msrb.mxu0 %v3983_v19  ;;  %v3694_v49 = vld [vmem:[#allocation3 + $0x3c0] sm:$0xf] }
 0x110   :  { %v4175_v17 = vor.u32 %v4477_v0, %v4174_v22  ;;  %2049 = vmatpush.bf16.msrb.mxu1 %v4047_v12 }
 0x111   :  { %v4971_v33 = vadd.f32 %v1900_v11, %v1812_v59  ;;  %v1726_v31 = vadd.f32 %v1725_v34, %v1637_v51  ;;  %1675 = vmatmul.bf16.gmra.mxu0 %v4962_v35  ;;  %2138 = vmatpush.bf16.msrb.mxu2 %v4111_v45  ;;  %v3696_v59 = vld [vmem:[#allocation3 + $0x3e0] sm:$0xf0]  ;;  %v3702_v11 = vld [vmem:[#allocation3 + $0x3c8] sm:$0xf]  ;;  %v4980_v34 = vor.u32 %v4360_v32, %v3694_v49 }
 0x112   :  { %1764 = vmatmul.bf16.gmra.mxu1 %v4964_v39  ;;  %2227 = vmatpush.bf16.msrb.mxu3 %v4175_v17  ;;  %v4982_v12 = vor.u32 %v4356_v20, %v3696_v59  ;;  %v4984_v45 = vor.u32 %v4361_v10, %v3702_v11  ;;  %v3230_v11 = vld [vmem:[#allocation3 + $0x10] sm:$0xf] }
 0x113   :  { %1853 = vmatmul.bf16.gmra.mxu2 %v4966_v9  ;;  %5907 = vst [vmem:[#allocation58_spill] sm:$0xff] %v4980_v34  ;;  %v4242_v10 = vld [vmem:[#allocation3 + $0x2c] sm:$0xf0] }
 0x114   :  { %1942 = vmatmul.bf16.gmra.mxu3 %v4969_v21  ;;  %5908 = vst [vmem:[#allocation59_spill] sm:$0xff] %v4982_v12 }
 0x115   :  { %5909 = vst [vmem:[#allocation60_spill] sm:$0xff] %v4984_v45 }
 0x116   :  { %v1814_v40 = vpop.f32.mrf.mxu2  ;;  %v1638_v48 = vpop.f32.mrf.mxu0 }
 0x117   :  { %v1815_v57 = vadd.f32 %v1814_v40, %v1726_v31  ;;  %v1903_v58 = vpop.f32.mrf.mxu3  ;;  %v1639_v7 = vadd.f32 %v1638_v48, %v4854_v18  ;;  %v1727_v24 = vpop.f32.mrf.mxu1  ;;  %v4987_v40 = vor.u32 %v4357_v6, %v3704_v30  ;;  %v4238_v6 = vld [vmem:[#allocation3 + $0x14] sm:$0xf] }
 0x118   :  { %v3232_v30 = vld [vmem:[#allocation3 + $0x30] sm:$0xf0] }
 0x119   :  { %v4978_v60 = vadd.f32 %v1903_v58, %v1815_v57  ;;  %v1728_v8 = vadd.f32 %v1727_v24, %v1639_v7  ;;  %5910 = vst [vmem:[#allocation61_spill] sm:$0xff] %v4987_v40 }
 0x11e   :  { %v1816_v51 = vpop.f32.mrf.mxu2  ;;  %v1641_v0 = vpop.f32.mrf.mxu0 }
 0x11f   :  { %v1817_v19 = vadd.f32 %v1816_v51, %v1728_v8  ;;  %v1905_v22 = vpop.f32.mrf.mxu3  ;;  %v1642_v31 = vadd.f32 %v1641_v0, %v4854_v18  ;;  %v1730_v17 = vpop.f32.mrf.mxu1  ;;  %v3238_v51 = vld [vmem:[#allocation3 + $0x18] sm:$0xf]  ;;  %v3240_v0 = vld [vmem:[#allocation3 + $0x38] sm:$0xf0] }
 0x121   :  { %v4989_v57 = vadd.f32 %v1905_v22, %v1817_v19  ;;  %v1731_v58 = vadd.f32 %v1730_v17, %v1642_v31  ;;  %1680 = vmatmul.bf16.gmra.mxu0 %v4980_v34  ;;  %v4243_v19 = vld [vmem:[#allocation3 + $0x34] sm:$0xf0]  ;;  %v4239_v22 = vld [vmem:[#allocation3 + $0x1c] sm:$0xf]  ;;  %v4998_v17 = vor.u32 %v4242_v10, %v3230_v11 }
 0x122   :  { %1769 = vmatmul.bf16.gmra.mxu1 %v4982_v12 }
 0x123   :  { %1858 = vmatmul.bf16.gmra.mxu2 %v4984_v45  ;;  %5911 = vst [vmem:[#allocation62_spill] sm:$0xff] %v4998_v17  ;;  %v5000_v45 = vor.u32 %v4238_v6, %v3232_v30 }
 0x124   :  { %1947 = vmatmul.bf16.gmra.mxu3 %v4987_v40 }
 0x125   :  { %5912 = vst [vmem:[#allocation63_spill] sm:$0xff] %v5000_v45 }
 0x126   :  { %v1819_v48 = vpop.f32.mrf.mxu2  ;;  %v1643_v8 = vpop.f32.mrf.mxu0 }
 0x127   :  { %v1820_v7 = vadd.f32 %v1819_v48, %v1731_v58  ;;  %v1908_v24 = vpop.f32.mrf.mxu3  ;;  %v1644_v49 = vadd.f32 %v1643_v8, %v4854_v18  ;;  %v1732_v32 = vpop.f32.mrf.mxu1  ;;  %v5002_v8 = vor.u32 %v4243_v19, %v3238_v51 }
 0x129   :  { %v4996_v20 = vadd.f32 %v1908_v24, %v1820_v7  ;;  %v1733_v59 = vadd.f32 %v1732_v32, %v1644_v49  ;;  %5913 = vst [vmem:[#allocation64_spill] sm:$0xff] %v5002_v8  ;;  %v5005_v49 = vor.u32 %v4239_v22, %v3240_v0  ;;  %v3262_v22 = vld [vmem:[#allocation3 + $0x50] sm:$0xf] }
 0x12a   :  { %v4250_v0 = vld [vmem:[#allocation3 + $0x6c] sm:$0xf0] }
 0x12b   :  { %5914 = vst [vmem:[#allocation65_spill] sm:$0xff] %v5005_v49 }
 0x12e   :  { %v1821_v31 = vpop.f32.mrf.mxu2  ;;  %v1646_v40 = vpop.f32.mrf.mxu0 }
 0x12f   :  { %v1822_v58 = vadd.f32 %v1821_v31, %v1733_v59  ;;  %v1910_v48 = vpop.f32.mrf.mxu3  ;;  %v1647_v7 = vadd.f32 %v1646_v40, %v4854_v18  ;;  %v1735_v24 = vpop.f32.mrf.mxu1  ;;  %v4246_v31 = vld [vmem:[#allocation3 + $0x54] sm:$0xf] }
 0x131   :  { %v5007_v32 = vadd.f32 %v1910_v48, %v1822_v58  ;;  %v1736_v12 = vadd.f32 %v1735_v24, %v1647_v7  ;;  %1961 = vmatmul.bf16.vlgmr.msrb.gmra.mxu0 %v4998_v17  ;;  %v3264_v58 = vld [vmem:[#allocation3 + $0x70] sm:$0xf0]  ;;  %v3270_v48 = vld [vmem:[#allocation3 + $0x58] sm:$0xf]  ;;  %v4247_v24 = vld [vmem:[#allocation3 + $0x5c] sm:$0xf] }
 0x132   :  { %2050 = vmatmul.bf16.vlgmr.msrb.gmra.mxu1 %v5000_v45  ;;  %v4251_v7 = vld [vmem:[#allocation3 + $0x74] sm:$0xf0]  ;;  %v5018_v34 = vor.u32 %v4246_v31, %v3264_v58 }
 0x133   :  { %2139 = vmatmul.bf16.vlgmr.msrb.gmra.mxu2 %v5002_v8  ;;  %v3272_v8 = vld [vmem:[#allocation3 + $0x78] sm:$0xf0] }
 0x134   :  { %2228 = vmatmul.bf16.vlgmr.msrb.gmra.mxu3 %v5005_v49  ;;  %v5016_v49 = vor.u32 %v4250_v0, %v3262_v22  ;;  %5916 = vst [vmem:[#allocation67_spill] sm:$0xff] %v5018_v34 }
 0x136   :  { %v1824_v59 = vpop.f32.mrf.mxu2  ;;  %v1648_v6 = vpop.f32.mrf.mxu0  ;;  %5915 = vst [vmem:[#allocation66_spill] sm:$0xff] %v5016_v49 }
 0x137   :  { %v1825_v11 = vadd.f32 %v1824_v59, %v1736_v12  ;;  %v1913_v10 = vpop.f32.mrf.mxu3  ;;  %v1649_v40 = vadd.f32 %v1648_v6, %v4854_v18  ;;  %v1737_v30 = vpop.f32.mrf.mxu1  ;;  %v5020_v6 = vor.u32 %v4251_v7, %v3270_v48  ;;  %v3294_v48 = vld [vmem:[#allocation3 + $0x90] sm:$0xf] }
 0x138   :  { %v4258_v7 = vld [vmem:[#allocation3 + $0xac] sm:$0xf0] }
 0x139   :  { %v5014_v51 = vadd.f32 %v1913_v10, %v1825_v11  ;;  %v1738_v19 = vadd.f32 %v1737_v30, %v1649_v40  ;;  %5917 = vst [vmem:[#allocation68_spill] sm:$0xff] %v5020_v6  ;;  %v5023_v40 = vor.u32 %v4247_v24, %v3272_v8  ;;  %v4254_v24 = vld [vmem:[#allocation3 + $0x94] sm:$0xf] }
 0x13b   :  { %5918 = vst [vmem:[#allocation69_spill] sm:$0xff] %v5023_v40 }
 0x13e   :  { %v1826_v45 = vpop.f32.mrf.mxu2  ;;  %v1651_v17 = vpop.f32.mrf.mxu0 }
 0x13f   :  { %v1827_v12 = vadd.f32 %v1826_v45, %v1738_v19  ;;  %v1915_v59 = vpop.f32.mrf.mxu3  ;;  %v1652_v11 = vadd.f32 %v1651_v17, %v4854_v18  ;;  %v1740_v10 = vpop.f32.mrf.mxu1 }
 0x141   :  { %v5025_v30 = vadd.f32 %v1915_v59, %v1827_v12  ;;  %v1741_v21 = vadd.f32 %v1740_v10, %v1652_v11  ;;  %1966 = vmatmul.bf16.gmra.mxu0 %v5016_v49  ;;  %v3296_v12 = vld [vmem:[#allocation3 + $0xb0] sm:$0xf0]  ;;  %v3302_v59 = vld [vmem:[#allocation3 + $0x98] sm:$0xf]  ;;  %v4255_v10 = vld [vmem:[#allocation3 + $0x9c] sm:$0xf] }
 0x142   :  { %2055 = vmatmul.bf16.gmra.mxu1 %v5018_v34  ;;  %v4259_v11 = vld [vmem:[#allocation3 + $0xb4] sm:$0xf0]  ;;  %v5036_v9 = vor.u32 %v4254_v24, %v3296_v12 }
 0x143   :  { %2144 = vmatmul.bf16.gmra.mxu2 %v5020_v6  ;;  %v3304_v6 = vld [vmem:[#allocation3 + $0xb8] sm:$0xf0] }
 0x144   :  { %2233 = vmatmul.bf16.gmra.mxu3 %v5023_v40  ;;  %v5034_v40 = vor.u32 %v4258_v7, %v3294_v48  ;;  %5920 = vst [vmem:[#allocation71_spill] sm:$0xff] %v5036_v9 }
 0x146   :  { %v1829_v45 = vpop.f32.mrf.mxu2  ;;  %v1653_v0 = vpop.f32.mrf.mxu0  ;;  %5919 = vst [vmem:[#allocation70_spill] sm:$0xff] %v5034_v40 }
 0x147   :  { %v1830_v19 = vadd.f32 %v1829_v45, %v1741_v21  ;;  %v1918_v22 = vpop.f32.mrf.mxu3  ;;  %v1654_v17 = vadd.f32 %v1653_v0, %v4854_v18  ;;  %v1742_v31 = vpop.f32.mrf.mxu1  ;;  %v5038_v0 = vor.u32 %v4259_v11, %v3302_v59  ;;  %v3326_v59 = vld [vmem:[#allocation3 + $0xd0] sm:$0xf] }
 0x148   :  { %v4266_v11 = vld [vmem:[#allocation3 + $0xec] sm:$0xf0] }
 0x149   :  { %v5032_v8 = vadd.f32 %v1918_v22, %v1830_v19  ;;  %v1743_v58 = vadd.f32 %v1742_v31, %v1654_v17  ;;  %5921 = vst [vmem:[#allocation72_spill] sm:$0xff] %v5038_v0  ;;  %v5041_v17 = vor.u32 %v4255_v10, %v3304_v6  ;;  %v4262_v10 = vld [vmem:[#allocation3 + $0xd4] sm:$0xf] }
 0x14b   :  { %5922 = vst [vmem:[#allocation73_spill] sm:$0xff] %v5041_v17 }
 0x14e   :  { %v1831_v34 = vpop.f32.mrf.mxu2  ;;  %v1656_v49 = vpop.f32.mrf.mxu0 }
 0x14f   :  { %v1832_v21 = vadd.f32 %v1831_v34, %v1743_v58  ;;  %v1920_v45 = vpop.f32.mrf.mxu3  ;;  %v1657_v19 = vadd.f32 %v1656_v49, %v4854_v18  ;;  %v1745_v22 = vpop.f32.mrf.mxu1 }
 0x151   :  { %v5043_v31 = vadd.f32 %v1920_v45, %v1832_v21  ;;  %v1746_v39 = vadd.f32 %v1745_v22, %v1657_v19  ;;  %1971 = vmatmul.bf16.gmra.mxu0 %v5034_v40  ;;  %v3328_v21 = vld [vmem:[#allocation3 + $0xf0] sm:$0xf0]  ;;  %v3334_v45 = vld [vmem:[#allocation3 + $0xd8] sm:$0xf]  ;;  %v4263_v22 = vld [vmem:[#allocation3 + $0xdc] sm:$0xf] }
 0x152   :  { %2060 = vmatmul.bf16.gmra.mxu1 %v5036_v9  ;;  %v4267_v19 = vld [vmem:[#allocation3 + $0xf4] sm:$0xf0]  ;;  %v5054_v35 = vor.u32 %v4262_v10, %v3328_v21 }
 0x153   :  { %2149 = vmatmul.bf16.gmra.mxu2 %v5038_v0  ;;  %v3336_v0 = vld [vmem:[#allocation3 + $0xf8] sm:$0xf0] }
 0x154   :  { %2238 = vmatmul.bf16.gmra.mxu3 %v5041_v17  ;;  %v5052_v17 = vor.u32 %v4266_v11, %v3326_v59  ;;  %5924 = vst [vmem:[#allocation75_spill] sm:$0xff] %v5054_v35 }
 0x156   :  { %v1834_v34 = vpop.f32.mrf.mxu2  ;;  %v1658_v7 = vpop.f32.mrf.mxu0  ;;  %5923 = vst [vmem:[#allocation74_spill] sm:$0xff] %v5052_v17 }
 0x157   :  { %v1835_v58 = vadd.f32 %v1834_v34, %v1746_v39  ;;  %v1923_v48 = vpop.f32.mrf.mxu3  ;;  %v1659_v49 = vadd.f32 %v1658_v7, %v4854_v18  ;;  %v1747_v24 = vpop.f32.mrf.mxu1  ;;  %v5056_v7 = vor.u32 %v4267_v19, %v3334_v45  ;;  %v3358_v45 = vld [vmem:[#allocation3 + $0x110] sm:$0xf] }
 0x158   :  { %v4274_v19 = vld [vmem:[#allocation3 + $0x12c] sm:$0xf0] }
 0x159   :  { %v5050_v6 = vadd.f32 %v1923_v48, %v1835_v58  ;;  %v1748_v12 = vadd.f32 %v1747_v24, %v1659_v49  ;;  %5925 = vst [vmem:[#allocation76_spill] sm:$0xff] %v5056_v7  ;;  %v5059_v49 = vor.u32 %v4263_v22, %v3336_v0  ;;  %v4270_v22 = vld [vmem:[#allocation3 + $0x114] sm:$0xf] }
 0x15b   :  { %5926 = vst [vmem:[#allocation77_spill] sm:$0xff] %v5059_v49 }
 0x15e   :  { %v1836_v9 = vpop.f32.mrf.mxu2  ;;  %v1661_v40 = vpop.f32.mrf.mxu0 }
 0x15f   :  { %v1837_v39 = vadd.f32 %v1836_v9, %v1748_v12  ;;  %v1925_v34 = vpop.f32.mrf.mxu3  ;;  %v1662_v58 = vadd.f32 %v1661_v40, %v4854_v18  ;;  %v1750_v48 = vpop.f32.mrf.mxu1 }
 0x161   :  { %v5061_v24 = vadd.f32 %v1925_v34, %v1837_v39  ;;  %v1751_v38 = vadd.f32 %v1750_v48, %v1662_v58  ;;  %1976 = vmatmul.bf16.gmra.mxu0 %v5052_v17  ;;  %v3360_v39 = vld [vmem:[#allocation3 + $0x130] sm:$0xf0]  ;;  %v3366_v34 = vld [vmem:[#allocation3 + $0x118] sm:$0xf]  ;;  %v4271_v48 = vld [vmem:[#allocation3 + $0x11c] sm:$0xf] }
 0x162   :  { %2065 = vmatmul.bf16.gmra.mxu1 %v5054_v35  ;;  %v4275_v58 = vld [vmem:[#allocation3 + $0x134] sm:$0xf0]  ;;  %v5072_v37 = vor.u32 %v4270_v22, %v3360_v39 }
 0x163   :  { %2154 = vmatmul.bf16.gmra.mxu2 %v5056_v7  ;;  %v3368_v7 = vld [vmem:[#allocation3 + $0x138] sm:$0xf0] }
 0x164   :  { %2243 = vmatmul.bf16.gmra.mxu3 %v5059_v49  ;;  %v5070_v49 = vor.u32 %v4274_v19, %v3358_v45  ;;  %5928 = vst [vmem:[#allocation79_spill] sm:$0xff] %v5072_v37 }
 0x166   :  { %v1839_v9 = vpop.f32.mrf.mxu2  ;;  %v1663_v11 = vpop.f32.mrf.mxu0  ;;  %5927 = vst [vmem:[#allocation78_spill] sm:$0xff] %v5070_v49 }
 0x167   :  { %v1840_v12 = vadd.f32 %v1839_v9, %v1751_v38  ;;  %v1928_v59 = vpop.f32.mrf.mxu3  ;;  %v1664_v40 = vadd.f32 %v1663_v11, %v4854_v18  ;;  %v1752_v10 = vpop.f32.mrf.mxu1  ;;  %v5074_v11 = vor.u32 %v4275_v58, %v3366_v34  ;;  %v3390_v34 = vld [vmem:[#allocation3 + $0x150] sm:$0xf] }
 0x168   :  { %v4282_v58 = vld [vmem:[#allocation3 + $0x16c] sm:$0xf0] }
 0x169   :  { %v5068_v0 = vadd.f32 %v1928_v59, %v1840_v12  ;;  %v1753_v21 = vadd.f32 %v1752_v10, %v1664_v40  ;;  %5929 = vst [vmem:[#allocation80_spill] sm:$0xff] %v5074_v11  ;;  %v5077_v40 = vor.u32 %v4271_v48, %v3368_v7  ;;  %v4278_v48 = vld [vmem:[#allocation3 + $0x154] sm:$0xf] }
 0x16b   :  { %5930 = vst [vmem:[#allocation81_spill] sm:$0xff] %v5077_v40 }
 0x16e   :  { %v1841_v35 = vpop.f32.mrf.mxu2  ;;  %v1666_v17 = vpop.f32.mrf.mxu0 }
 0x16f   :  { %v1842_v38 = vadd.f32 %v1841_v35, %v1753_v21  ;;  %v1930_v9 = vpop.f32.mrf.mxu3  ;;  %v1667_v12 = vadd.f32 %v1666_v17, %v4854_v18  ;;  %v1755_v59 = vpop.f32.mrf.mxu1 }
 0x171   :  { %v5079_v10 = vadd.f32 %v1930_v9, %v1842_v38  ;;  %v1756_v28 = vadd.f32 %v1755_v59, %v1667_v12  ;;  %1981 = vmatmul.bf16.gmra.mxu0 %v5070_v49  ;;  %v3392_v38 = vld [vmem:[#allocation3 + $0x170] sm:$0xf0]  ;;  %v3398_v9 = vld [vmem:[#allocation3 + $0x158] sm:$0xf]  ;;  %v4279_v59 = vld [vmem:[#allocation3 + $0x15c] sm:$0xf] }
 0x172   :  { %2070 = vmatmul.bf16.gmra.mxu1 %v5072_v37  ;;  %v4283_v12 = vld [vmem:[#allocation3 + $0x174] sm:$0xf0]  ;;  %v5090_v27 = vor.u32 %v4278_v48, %v3392_v38 }
 0x173   :  { %5931 = vst [vmem:[#allocation82_spill] sm:$0xff] %v5079_v10  ;;  %2159 = vmatmul.bf16.gmra.mxu2 %v5074_v11  ;;  %v3400_v11 = vld [vmem:[#allocation3 + $0x178] sm:$0xf0] }
 0x174   :  { %2248 = vmatmul.bf16.gmra.mxu3 %v5077_v40  ;;  %v5088_v40 = vor.u32 %v4282_v58, %v3390_v34  ;;  %5934 = vst [vmem:[#allocation85_spill] sm:$0xff] %v5090_v27 }
 0x176   :  { %v1844_v35 = vpop.f32.mrf.mxu2  ;;  %v1668_v19 = vpop.f32.mrf.mxu0  ;;  %5933 = vst [vmem:[#allocation84_spill] sm:$0xff] %v5088_v40 }
 0x177   :  { %v1845_v21 = vadd.f32 %v1844_v35, %v1756_v28  ;;  %v1933_v45 = vpop.f32.mrf.mxu3  ;;  %v1669_v17 = vadd.f32 %v1668_v19, %v4854_v18  ;;  %v1757_v22 = vpop.f32.mrf.mxu1  ;;  %v5092_v19 = vor.u32 %v4283_v12, %v3398_v9  ;;  %v3422_v9 = vld [vmem:[#allocation3 + $0x190] sm:$0xf] }
 0x178   :  { %v4290_v12 = vld [vmem:[#allocation3 + $0x1ac] sm:$0xf0] }
 0x179   :  { %v5086_v7 = vadd.f32 %v1933_v45, %v1845_v21  ;;  %v1758_v39 = vadd.f32 %v1757_v22, %v1669_v17  ;;  %5935 = vst [vmem:[#allocation86_spill] sm:$0xff] %v5092_v19  ;;  %v5095_v17 = vor.u32 %v4279_v59, %v3400_v11  ;;  %v4286_v59 = vld [vmem:[#allocation3 + $0x194] sm:$0xf] }
 0x17b   :  { %5932 = vst [vmem:[#allocation83_spill] sm:$0xff] %v5086_v7 }
 0x17c   :  { %5936 = vst [vmem:[#allocation87_spill] sm:$0xff] %v5095_v17 }
 0x17e   :  { %v1846_v37 = vpop.f32.mrf.mxu2  ;;  %v1671_v49 = vpop.f32.mrf.mxu0 }
 0x17f   :  { %v1847_v28 = vadd.f32 %v1846_v37, %v1758_v39  ;;  %v1935_v35 = vpop.f32.mrf.mxu3  ;;  %v1672_v21 = vadd.f32 %v1671_v49, %v4854_v18  ;;  %v1760_v45 = vpop.f32.mrf.mxu1 }
 0x181   :  { %v5097_v22 = vadd.f32 %v1935_v35, %v1847_v28  ;;  %v1761_v26 = vadd.f32 %v1760_v45, %v1672_v21  ;;  %1986 = vmatmul.bf16.gmra.mxu0 %v5088_v40  ;;  %v3424_v28 = vld [vmem:[#allocation3 + $0x1b0] sm:$0xf0]  ;;  %v3430_v35 = vld [vmem:[#allocation3 + $0x198] sm:$0xf]  ;;  %v4287_v45 = vld [vmem:[#allocation3 + $0x19c] sm:$0xf] }
 0x182   :  { %2075 = vmatmul.bf16.gmra.mxu1 %v5090_v27  ;;  %v4291_v21 = vld [vmem:[#allocation3 + $0x1b4] sm:$0xf0] }
 0x183   :  { %5937 = vst [vmem:[#allocation88_spill] sm:$0xff] %v5097_v22  ;;  %2164 = vmatmul.bf16.gmra.mxu2 %v5092_v19  ;;  %v3432_v19 = vld [vmem:[#allocation3 + $0x1b8] sm:$0xf0]  ;;  %v5108_v22 = vor.u32 %v4286_v59, %v3424_v28 }
 0x184   :  { %2253 = vmatmul.bf16.gmra.mxu3 %v5095_v17  ;;  %v5106_v17 = vor.u32 %v4290_v12, %v3422_v9 }
 0x185   :  { %5940 = vst [vmem:[#allocation91_spill] sm:$0xff] %v5108_v22 }
 0x186   :  { %v1849_v37 = vpop.f32.mrf.mxu2  ;;  %v1673_v58 = vpop.f32.mrf.mxu0  ;;  %5939 = vst [vmem:[#allocation90_spill] sm:$0xff] %v5106_v17 }
 0x187   :  { %v1850_v39 = vadd.f32 %v1849_v37, %v1761_v26  ;;  %v1938_v34 = vpop.f32.mrf.mxu3  ;;  %v1674_v49 = vadd.f32 %v1673_v58, %v4854_v18  ;;  %v1762_v48 = vpop.f32.mrf.mxu1  ;;  %v5110_v58 = vor.u32 %v4291_v21, %v3430_v35  ;;  %v3454_v35 = vld [vmem:[#allocation3 + $0x1d0] sm:$0xf] }
 0x188   :  { %v4298_v21 = vld [vmem:[#allocation3 + $0x1ec] sm:$0xf0] }
 0x189   :  { %v5104_v11 = vadd.f32 %v1938_v34, %v1850_v39  ;;  %v1763_v38 = vadd.f32 %v1762_v48, %v1674_v49  ;;  %5941 = vst [vmem:[#allocation92_spill] sm:$0xff] %v5110_v58  ;;  %v5113_v49 = vor.u32 %v4287_v45, %v3432_v19  ;;  %v4294_v45 = vld [vmem:[#allocation3 + $0x1d4] sm:$0xf] }
 0x18b   :  { %5938 = vst [vmem:[#allocation89_spill] sm:$0xff] %v5104_v11 }
 0x18c   :  { %5942 = vst [vmem:[#allocation93_spill] sm:$0xff] %v5113_v49 }
 0x18e   :  { %v1851_v27 = vpop.f32.mrf.mxu2  ;;  %v1676_v40 = vpop.f32.mrf.mxu0 }
 0x18f   :  { %v1852_v26 = vadd.f32 %v1851_v27, %v1763_v38  ;;  %v1940_v37 = vpop.f32.mrf.mxu3  ;;  %v1677_v39 = vadd.f32 %v1676_v40, %v4854_v18  ;;  %v1765_v34 = vpop.f32.mrf.mxu1 }
 0x191   :  { %v5115_v48 = vadd.f32 %v1940_v37, %v1852_v26  ;;  %v1766_v11 = vadd.f32 %v1765_v34, %v1677_v39  ;;  %1991 = vmatmul.bf16.gmra.mxu0 %v5106_v17  ;;  %v3456_v26 = vld [vmem:[#allocation3 + $0x1f0] sm:$0xf0]  ;;  %v3462_v37 = vld [vmem:[#allocation3 + $0x1d8] sm:$0xf]  ;;  %v4295_v34 = vld [vmem:[#allocation3 + $0x1dc] sm:$0xf] }
 0x192   :  { %2080 = vmatmul.bf16.gmra.mxu1 %v5108_v22  ;;  %v4299_v39 = vld [vmem:[#allocation3 + $0x1f4] sm:$0xf0] }
 0x193   :  { %5943 = vst [vmem:[#allocation94_spill] sm:$0xff] %v5115_v48  ;;  %2169 = vmatmul.bf16.gmra.mxu2 %v5110_v58  ;;  %v3464_v58 = vld [vmem:[#allocation3 + $0x1f8] sm:$0xf0]  ;;  %v5126_v48 = vor.u32 %v4294_v45, %v3456_v26 }
 0x194   :  { %2258 = vmatmul.bf16.gmra.mxu3 %v5113_v49  ;;  %v5124_v49 = vor.u32 %v4298_v21, %v3454_v35 }
 0x195   :  { %5946 = vst [vmem:[#allocation97_spill] sm:$0xff] %v5126_v48 }
 0x196   :  { %v1854_v27 = vpop.f32.mrf.mxu2  ;;  %v1678_v12 = vpop.f32.mrf.mxu0  ;;  %5945 = vst [vmem:[#allocation96_spill] sm:$0xff] %v5124_v49 }
 0x197   :  { %v1855_v38 = vadd.f32 %v1854_v27, %v1766_v11  ;;  %v1943_v9 = vpop.f32.mrf.mxu3  ;;  %v1679_v40 = vadd.f32 %v1678_v12, %v4854_v18  ;;  %v1767_v59 = vpop.f32.mrf.mxu1  ;;  %v5128_v12 = vor.u32 %v4299_v39, %v3462_v37  ;;  %v3486_v37 = vld [vmem:[#allocation3 + $0x210] sm:$0xf] }
 0x198   :  { %v4306_v39 = vld [vmem:[#allocation3 + $0x22c] sm:$0xf0] }
 0x199   :  { %v5122_v19 = vadd.f32 %v1943_v9, %v1855_v38  ;;  %v1768_v28 = vadd.f32 %v1767_v59, %v1679_v40  ;;  %5947 = vst [vmem:[#allocation98_spill] sm:$0xff] %v5128_v12  ;;  %v5131_v40 = vor.u32 %v4295_v34, %v3464_v58  ;;  %v4302_v34 = vld [vmem:[#allocation3 + $0x214] sm:$0xf] }
 0x19b   :  { %5944 = vst [vmem:[#allocation95_spill] sm:$0xff] %v5122_v19 }
 0x19c   :  { %5948 = vst [vmem:[#allocation99_spill] sm:$0xff] %v5131_v40 }
 0x19e   :  { %v1856_v22 = vpop.f32.mrf.mxu2  ;;  %v1681_v17 = vpop.f32.mrf.mxu0 }
 0x19f   :  { %v1857_v11 = vadd.f32 %v1856_v22, %v1768_v28  ;;  %v1945_v27 = vpop.f32.mrf.mxu3  ;;  %v1682_v38 = vadd.f32 %v1681_v17, %v4854_v18  ;;  %v1770_v9 = vpop.f32.mrf.mxu1 }
 0x1a1   :  { %v5133_v59 = vadd.f32 %v1945_v27, %v1857_v11  ;;  %v1771_v19 = vadd.f32 %v1770_v9, %v1682_v38  ;;  %1996 = vmatmul.bf16.gmra.mxu0 %v5124_v49  ;;  %v3488_v11 = vld [vmem:[#allocation3 + $0x230] sm:$0xf0]  ;;  %v3494_v27 = vld [vmem:[#allocation3 + $0x218] sm:$0xf]  ;;  %v4303_v9 = vld [vmem:[#allocation3 + $0x21c] sm:$0xf] }
 0x1a2   :  { %2085 = vmatmul.bf16.gmra.mxu1 %v5126_v48  ;;  %v4307_v38 = vld [vmem:[#allocation3 + $0x234] sm:$0xf0] }
 0x1a3   :  { %5949 = vst [vmem:[#allocation100_spill] sm:$0xff] %v5133_v59  ;;  %2174 = vmatmul.bf16.gmra.mxu2 %v5128_v12  ;;  %v3496_v12 = vld [vmem:[#allocation3 + $0x238] sm:$0xf0]  ;;  %v5144_v59 = vor.u32 %v4302_v34, %v3488_v11  ;;  %v3518_v11 = vld [vmem:[#allocation3 + $0x250] sm:$0xf] }
 0x1a4   :  { %2263 = vmatmul.bf16.gmra.mxu3 %v5131_v40  ;;  %v5142_v40 = vor.u32 %v4306_v39, %v3486_v37 }
 0x1a5   :  { %5952 = vst [vmem:[#allocation103_spill] sm:$0xff] %v5144_v59 }
 0x1a6   :  { %v1859_v22 = vpop.f32.mrf.mxu2  ;;  %v1683_v21 = vpop.f32.mrf.mxu0  ;;  %5951 = vst [vmem:[#allocation102_spill] sm:$0xff] %v5142_v40 }
 0x1a7   :  { %v1860_v28 = vadd.f32 %v1859_v22, %v1771_v19  ;;  %v1948_v35 = vpop.f32.mrf.mxu3  ;;  %v1684_v17 = vadd.f32 %v1683_v21, %v4854_v18  ;;  %v1772_v45 = vpop.f32.mrf.mxu1  ;;  %v5146_v18 = vor.u32 %v4307_v38, %v3494_v27  ;;  %v5149_v21 = vor.u32 %v4303_v9, %v3496_v12  ;;  %v4314_v27 = vld [vmem:[#allocation3 + $0x26c] sm:$0xf0]  ;;  %v4310_v38 = vld [vmem:[#allocation3 + $0x254] sm:$0xf] }
 0x1a8   :  { %v3520_v9 = vld [vmem:[#allocation3 + $0x270] sm:$0xf0] }
 0x1a9   :  { %v5140_v58 = vadd.f32 %v1948_v35, %v1860_v28  ;;  %v1773_v26 = vadd.f32 %v1772_v45, %v1684_v17  ;;  %5953 = vst [vmem:[#allocation104_spill] sm:$0xff] %v5146_v18 }
 0x1aa   :  { %5954 = vst [vmem:[#allocation105_spill] sm:$0xff] %v5149_v21 }
 0x1ab   :  { %5950 = vst [vmem:[#allocation101_spill] sm:$0xff] %v5140_v58 }
 0x1ae   :  { %v1861_v48 = vpop.f32.mrf.mxu2  ;;  %v1962_v49 = vpop.f32.mrf.mxu0 }
 0x1af   :  { %v1862_v19 = vadd.f32 %v1861_v48, %v1773_v26  ;;  %v1950_v22 = vpop.f32.mrf.mxu3  ;;  %v1963_v28 = vadd.f32 %v1962_v49, %v4870_v61  ;;  %v2051_v35 = vpop.f32.mrf.mxu1 }
 0x1b1   :  { %v5151_v17 = vadd.f32 %v1950_v22, %v1862_v19  ;;  %v2052_v45 = vadd.f32 %v2051_v35, %v1963_v28  ;;  %2001 = vmatmul.bf16.gmra.mxu0 %v5142_v40  ;;  %v3526_v19 = vld [vmem:[#allocation3 + $0x258] sm:$0xf]  ;;  %v4311_v28 = vld [vmem:[#allocation3 + $0x25c] sm:$0xf]  ;;  %v5160_v40 = vor.u32 %v4310_v38, %v3520_v9 }
 0x1b2   :  { %2090 = vmatmul.bf16.gmra.mxu1 %v5144_v59  ;;  %v4315_v22 = vld [vmem:[#allocation3 + $0x274] sm:$0xf0]  ;;  %v3528_v35 = vld [vmem:[#allocation3 + $0x278] sm:$0xf0]  ;;  %v5158_v59 = vor.u32 %v4314_v27, %v3518_v11 }
 0x1b3   :  { %5955 = vst [vmem:[#allocation106_spill] sm:$0xff] %v5151_v17  ;;  %2179 = vmatmul.bf16.gmra.mxu2 %v5146_v18 }
 0x1b4   :  { %2268 = vmatmul.bf16.gmra.mxu3 %v5149_v21  ;;  %5956 = vst [vmem:[#allocation107_spill] sm:$0xff] %v5158_v59 }
 0x1b5   :  { %5957 = vst [vmem:[#allocation108_spill] sm:$0xff] %v5160_v40 }
 0x1b6   :  { %v2140_v48 = vpop.f32.mrf.mxu2  ;;  %v1964_v39 = vpop.f32.mrf.mxu0 }
 0x1b7   :  { %v2141_v26 = vadd.f32 %v2140_v48, %v2052_v45  ;;  %v2229_v37 = vpop.f32.mrf.mxu3  ;;  %v1965_v61 = vadd.f32 %v1964_v39, %v4881_v46  ;;  %v2053_v49 = vpop.f32.mrf.mxu1  ;;  %v5162_v46 = vor.u32 %v4315_v22, %v3526_v19  ;;  %v5165_v39 = vor.u32 %v4311_v28, %v3528_v35  ;;  %v3550_v28 = vld [vmem:[#allocation3 + $0x290] sm:$0xf] }
 0x1b8   :  { %v4322_v35 = vld [vmem:[#allocation3 + $0x2ac] sm:$0xf0] }
 0x1b9   :  { %v2230_v12 = vadd.f32 %v2229_v37, %v2141_v26  ;;  %v2054_v34 = vadd.f32 %v2053_v49, %v1965_v61  ;;  %5958 = vst [vmem:[#allocation109_spill] sm:$0xff] %v5162_v46 }
 0x1ba   :  { %5959 = vst [vmem:[#allocation110_spill] sm:$0xff] %v5165_v39 }
 0x1bb   :  { %4501 = vtanh.f32 %v2230_v12 }
 0x1be   :  { %v2142_v18 = vpop.f32.mrf.mxu2  ;;  %v1967_v48 = vpop.f32.mrf.mxu0 }
 0x1bf   :  { %v2143_v21 = vadd.f32 %v2142_v18, %v2054_v34  ;;  %v2231_v45 = vpop.f32.mrf.mxu3  ;;  %v1968_v26 = vadd.f32 %v1967_v48, %v4888_v63  ;;  %v2056_v37 = vpop.f32.mrf.mxu1  ;;  %v3552_v48 = vld [vmem:[#allocation3 + $0x2b0] sm:$0xf0] }
 0x1c1   :  { %v2232_v61 = vadd.f32 %v2231_v45, %v2143_v21  ;;  %v2057_v49 = vadd.f32 %v2056_v37, %v1968_v26  ;;  %2006 = vmatmul.bf16.gmra.mxu0 %v5158_v59  ;;  %v5171_v63 = vpop.eup %4501  ;;  %v4318_v45 = vld [vmem:[#allocation3 + $0x294] sm:$0xf]  ;;  %v3558_v26 = vld [vmem:[#allocation3 + $0x298] sm:$0xf] }
 0x1c2   :  { %2095 = vmatmul.bf16.gmra.mxu1 %v5160_v40  ;;  %5960 = vst [vmem:[#allocation111_spill] sm:$0xff] %v5171_v63  ;;  %v4323_v37 = vld [vmem:[#allocation3 + $0x2b4] sm:$0xf0]  ;;  %v5180_v40 = vor.u32 %v4318_v45, %v3552_v48 }
 0x1c3   :  { %4503 = vtanh.f32 %v2232_v61  ;;  %2184 = vmatmul.bf16.gmra.mxu2 %v5162_v46  ;;  %v4319_v61 = vld [vmem:[#allocation3 + $0x29c] sm:$0xf] }
 0x1c4   :  { %2273 = vmatmul.bf16.gmra.mxu3 %v5165_v39  ;;  %v5178_v39 = vor.u32 %v4322_v35, %v3550_v28  ;;  %5963 = vst [vmem:[#allocation114_spill] sm:$0xff] %v5180_v40  ;;  %v3912_v28 = vld [vmem:[#allocation6 + $0x178] sm:$0xf0] }
 0x1c6   :  { %v2145_v18 = vpop.f32.mrf.mxu2  ;;  %v1969_v27 = vpop.f32.mrf.mxu0  ;;  %5962 = vst [vmem:[#allocation113_spill] sm:$0xff] %v5178_v39 }
 0x1c7   :  { %v2146_v34 = vadd.f32 %v2145_v18, %v2057_v49  ;;  %v2234_v11 = vpop.f32.mrf.mxu3  ;;  %v1970_v38 = vadd.f32 %v1969_v27, %v4899_v62  ;;  %v2058_v21 = vpop.f32.mrf.mxu1  ;;  %v3560_v49 = vld [vmem:[#allocation3 + $0x2b8] sm:$0xf0] }
 0x1c9   :  { %v5174_v12 = vpop.eup %4503  ;;  %v2235_v9 = vadd.f32 %v2234_v11, %v2146_v34  ;;  %v2059_v19 = vadd.f32 %v2058_v21, %v1970_v38  ;;  %v5182_v34 = vor.u32 %v4323_v37, %v3558_v26  ;;  %v5185_v21 = vor.u32 %v4319_v61, %v3560_v49  ;;  %v3582_v49 = vld [vmem:[#allocation3 + $0x2d0] sm:$0xf] }
 0x1ca   :  { %5961 = vst [vmem:[#allocation112_spill] sm:$0xff] %v5174_v12 }
 0x1cb   :  { %5964 = vst [vmem:[#allocation115_spill] sm:$0xff] %v5182_v34  ;;  %4505 = vtanh.f32 %v2235_v9 }
 0x1cc   :  { %5965 = vst [vmem:[#allocation116_spill] sm:$0xff] %v5185_v21 }
 0x1ce   :  { %v2147_v18 = vpop.f32.mrf.mxu2  ;;  %v1972_v46 = vpop.f32.mrf.mxu0 }
 0x1cf   :  { %v2148_v62 = vadd.f32 %v2147_v18, %v2059_v19  ;;  %v2236_v27 = vpop.f32.mrf.mxu3  ;;  %v1973_v11 = vadd.f32 %v1972_v46, %v4906_v23  ;;  %v2061_v38 = vpop.f32.mrf.mxu1  ;;  %v4410_v19 = vld [vmem:[#allocation6 + $0x174] sm:$0xf]  ;;  %v4330_v18 = vld [vmem:[#allocation3 + $0x2ec] sm:$0xf0] }
 0x1d0   :  { %v3915_v35 = vor.u32 %v4410_v19, %v3912_v28  ;;  %v4331_v19 = vld [vmem:[#allocation3 + $0x2f4] sm:$0xf0]  ;;  %v4378_v28 = vld [vmem:[#allocation6 + $0x74] sm:$0xf] }
 0x1d1   :  { %v2237_v22 = vadd.f32 %v2236_v27, %v2148_v62  ;;  %v2062_v59 = vadd.f32 %v2061_v38, %v1973_v11  ;;  %2011 = vmatmul.bf16.gmra.mxu0 %v5178_v39  ;;  %v5191_v26 = vpop.eup %4505  ;;  %v4326_v27 = vld [vmem:[#allocation3 + $0x2d4] sm:$0xf]  ;;  %v3590_v38 = vld [vmem:[#allocation3 + $0x2d8] sm:$0xf]  ;;  %v3592_v39 = vld [vmem:[#allocation3 + $0x2f8] sm:$0xf0] }
 0x1d2   :  { %2100 = vmatmul.bf16.gmra.mxu1 %v5180_v40  ;;  %2487 = vmatpush.bf16.msra.mxu2 %v3915_v35  ;;  %5966 = vst [vmem:[#allocation117_spill] sm:$0xff] %v5191_v26  ;;  %v3584_v11 = vld [vmem:[#allocation3 + $0x2f0] sm:$0xf0]  ;;  %v3784_v35 = vld [vmem:[#allocation6 + $0x78] sm:$0xf0] }
 0x1d3   :  { %4507 = vtanh.f32 %v2237_v22  ;;  %2189 = vmatmul.bf16.gmra.mxu2 %v5182_v34  ;;  %v3976_v34 = vld [vmem:[#allocation6 + $0x1f8] sm:$0xf0]  ;;  %v5200_v12 = vor.u32 %v4326_v27, %v3584_v11  ;;  %v4404_v26 = vld [vmem:[#allocation6 + $0x144] sm:$0xf] }
 0x1d4   :  { %2278 = vmatmul.bf16.gmra.mxu3 %v5185_v21  ;;  %v3787_v21 = vor.u32 %v4378_v28, %v3784_v35  ;;  %v4327_v40 = vld [vmem:[#allocation3 + $0x2dc] sm:$0xf] }
 0x1d5   :  { %5969 = vst [vmem:[#allocation120_spill] sm:$0xff] %v5200_v12  ;;  %v5205_v25 = vor.u32 %v4327_v40, %v3592_v39  ;;  %v3768_v27 = vld [vmem:[#allocation6 + $0x58] sm:$0xf0] }
 0x1d6   :  { %v2150_v45 = vpop.f32.mrf.mxu2  ;;  %v1974_v48 = vpop.f32.mrf.mxu0  ;;  %2309 = vmatpush.bf16.msra.mxu0 %v3787_v21  ;;  %v3776_v21 = vld [vmem:[#allocation6 + $0x68] sm:$0xf0] }
 0x1d7   :  { %v2151_v23 = vadd.f32 %v2150_v45, %v2062_v59  ;;  %v2239_v46 = vpop.f32.mrf.mxu3  ;;  %v1975_v9 = vadd.f32 %v1974_v48, %v4917_v47  ;;  %v2063_v37 = vpop.f32.mrf.mxu1  ;;  %v4426_v45 = vld [vmem:[#allocation6 + $0x1f4] sm:$0xf]  ;;  %v3848_v48 = vld [vmem:[#allocation6 + $0xf8] sm:$0xf0]  ;;  %v5202_v59 = vor.u32 %v4331_v19, %v3590_v38  ;;  %5971 = vst [vmem:[#allocation122_spill] sm:$0xff] %v5205_v25 }
 0x1d8   :  { %v4394_v47 = vld [vmem:[#allocation6 + $0xf4] sm:$0xf] }
 0x1d9   :  { %v5194_v22 = vpop.eup %4507  ;;  %v2240_v61 = vadd.f32 %v2239_v46, %v2151_v23  ;;  %v2064_v62 = vadd.f32 %v2063_v37, %v1975_v9  ;;  %v3979_v23 = vor.u32 %v4426_v45, %v3976_v34  ;;  %v3851_v46 = vor.u32 %v4394_v47, %v3848_v48  ;;  %5970 = vst [vmem:[#allocation121_spill] sm:$0xff] %v5202_v59  ;;  %v3614_v48 = vld [vmem:[#allocation3 + $0x310] sm:$0xf] }
 0x1da   :  { %5967 = vst [vmem:[#allocation118_spill] sm:$0xff] %v5194_v22  ;;  %v5198_v9 = vor.u32 %v4330_v18, %v3582_v49 }
 0x1db   :  { %2576 = vmatpush.bf16.msra.mxu3 %v3979_v23  ;;  %2398 = vmatpush.bf16.msra.mxu1 %v3851_v46  ;;  %4509 = vtanh.f32 %v2240_v61  ;;  %v4338_v23 = vld [vmem:[#allocation3 + $0x32c] sm:$0xf0] }
 0x1dc   :  { %5968 = vst [vmem:[#allocation119_spill] sm:$0xff] %v5198_v9 }
 0x1de   :  { %v2152_v17 = vpop.f32.mrf.mxu2  ;;  %v1977_v63 = vpop.f32.mrf.mxu0 }
 0x1df   :  { %v2153_v37 = vadd.f32 %v2152_v17, %v2064_v62  ;;  %v2241_v58 = vpop.f32.mrf.mxu3  ;;  %v1978_v28 = vadd.f32 %v1977_v63, %v4924_v36  ;;  %v2066_v35 = vpop.f32.mrf.mxu1  ;;  %v4376_v17 = vld [vmem:[#allocation6 + $0x64] sm:$0xf]  ;;  %v4374_v62 = vld [vmem:[#allocation6 + $0x54] sm:$0xf] }
 0x1e0   :  { %v3779_v49 = vor.u32 %v4376_v17, %v3776_v21  ;;  %v3771_v19 = vor.u32 %v4374_v62, %v3768_v27  ;;  %v4335_v17 = vld [vmem:[#allocation3 + $0x31c] sm:$0xf] }
 0x1e1   :  { %v2242_v34 = vadd.f32 %v2241_v58, %v2153_v37  ;;  %v2067_v45 = vadd.f32 %v2066_v35, %v1978_v28  ;;  %2016 = vmatmul.bf16.gmra.mxu0 %v5198_v9  ;;  %v5211_v58 = vpop.eup %4509  ;;  %v4334_v37 = vld [vmem:[#allocation3 + $0x314] sm:$0xf]  ;;  %v3622_v35 = vld [vmem:[#allocation3 + $0x318] sm:$0xf]  ;;  %v3624_v21 = vld [vmem:[#allocation3 + $0x338] sm:$0xf0] }
 0x1e2   :  { %2105 = vmatmul.bf16.gmra.mxu1 %v5200_v12  ;;  %2310 = vmatpush.bf16.msra.mxu0 %v3779_v49  ;;  %5972 = vst [vmem:[#allocation123_spill] sm:$0xff] %v5211_v58  ;;  %v3616_v28 = vld [vmem:[#allocation3 + $0x330] sm:$0xf0]  ;;  %v5225_v46 = vor.u32 %v4335_v17, %v3624_v21  ;;  %v4008_v58 = vld [vmem:[#allocation6 + $0x238] sm:$0xf0] }
 0x1e3   :  { %4511 = vtanh.f32 %v2242_v34  ;;  %2194 = vmatmul.bf16.gmra.mxu2 %v5202_v59  ;;  %v4339_v34 = vld [vmem:[#allocation3 + $0x334] sm:$0xf0]  ;;  %v3752_v59 = vld [vmem:[#allocation6 + $0x38] sm:$0xf0] }
 0x1e4   :  { %2283 = vmatmul.bf16.gmra.mxu3 %v5205_v25  ;;  %v5222_v62 = vor.u32 %v4339_v34, %v3622_v35  ;;  %5977 = vst [vmem:[#allocation128_spill] sm:$0xff] %v5225_v46  ;;  %v4370_v25 = vld [vmem:[#allocation6 + $0x34] sm:$0xf] }
 0x1e6   :  { %v2155_v18 = vpop.f32.mrf.mxu2  ;;  %v1979_v40 = vpop.f32.mrf.mxu0  ;;  %2311 = vmatpush.bf16.msra.mxu0 %v3771_v19  ;;  %5976 = vst [vmem:[#allocation127_spill] sm:$0xff] %v5222_v62 }
 0x1e7   :  { %v2156_v36 = vadd.f32 %v2155_v18, %v2067_v45  ;;  %v2244_v63 = vpop.f32.mrf.mxu3  ;;  %v1980_v39 = vadd.f32 %v1979_v40, %v4935_v5  ;;  %v2068_v61 = vpop.f32.mrf.mxu1  ;;  %v4372_v45 = vld [vmem:[#allocation6 + $0x44] sm:$0xf]  ;;  %v3760_v5 = vld [vmem:[#allocation6 + $0x48] sm:$0xf0]  ;;  %v5218_v40 = vor.u32 %v4338_v23, %v3614_v48 }
 0x1e8   :  { %v3763_v49 = vor.u32 %v4372_v45, %v3760_v5  ;;  %v3755_v45 = vor.u32 %v4370_v25, %v3752_v59  ;;  %v4368_v23 = vld [vmem:[#allocation6 + $0x24] sm:$0xf]  ;;  %v3968_v59 = vld [vmem:[#allocation6 + $0x1e8] sm:$0xf0] }
 0x1e9   :  { %v5214_v11 = vpop.eup %4511  ;;  %v2245_v38 = vadd.f32 %v2244_v63, %v2156_v36  ;;  %v2069_v47 = vadd.f32 %v2068_v61, %v1980_v39  ;;  %5974 = vst [vmem:[#allocation125_spill] sm:$0xff] %v5218_v40  ;;  %v5220_v61 = vor.u32 %v4334_v37, %v3616_v28  ;;  %v3744_v28 = vld [vmem:[#allocation6 + $0x28] sm:$0xf0]  ;;  %v4424_v25 = vld [vmem:[#allocation6 + $0x1e4] sm:$0xf] }
 0x1ea   :  { %5973 = vst [vmem:[#allocation124_spill] sm:$0xff] %v5214_v11  ;;  %2312 = vmatpush.bf16.msra.mxu0 %v3763_v49  ;;  %v3747_v34 = vor.u32 %v4368_v23, %v3744_v28  ;;  %v3971_v21 = vor.u32 %v4424_v25, %v3968_v59  ;;  %v3840_v49 = vld [vmem:[#allocation6 + $0xe8] sm:$0xf0]  ;;  %v4346_v23 = vld [vmem:[#allocation3 + $0x36c] sm:$0xf0] }
 0x1eb   :  { %5975 = vst [vmem:[#allocation126_spill] sm:$0xff] %v5220_v61  ;;  %4513 = vtanh.f32 %v2245_v38  ;;  %v4392_v38 = vld [vmem:[#allocation6 + $0xe4] sm:$0xf]  ;;  %v3654_v25 = vld [vmem:[#allocation3 + $0x358] sm:$0xf] }
 0x1ec   :  { %2577 = vmatpush.bf16.msra.mxu3 %v3971_v21  ;;  %v4347_v59 = vld [vmem:[#allocation3 + $0x374] sm:$0xf0] }
 0x1ee   :  { %v2157_v18 = vpop.f32.mrf.mxu2  ;;  %v1982_v39 = vpop.f32.mrf.mxu0  ;;  %2313 = vmatpush.bf16.msra.mxu0 %v3755_v45 }
 0x1ef   :  { %v2158_v36 = vadd.f32 %v2157_v18, %v2069_v47  ;;  %v2246_v63 = vpop.f32.mrf.mxu3  ;;  %v1983_v27 = vadd.f32 %v1982_v39, %v4942_v52  ;;  %v2071_v19 = vpop.f32.mrf.mxu1  ;;  %v4408_v52 = vld [vmem:[#allocation6 + $0x164] sm:$0xf]  ;;  %v3904_v47 = vld [vmem:[#allocation6 + $0x168] sm:$0xf0]  ;;  %v3843_v39 = vor.u32 %v4392_v38, %v3840_v49  ;;  %v3896_v49 = vld [vmem:[#allocation6 + $0x158] sm:$0xf0] }
 0x1f0   :  { %v3907_v37 = vor.u32 %v4408_v52, %v3904_v47  ;;  %v3646_v47 = vld [vmem:[#allocation3 + $0x350] sm:$0xf] }
 0x1f1   :  { %v2247_v12 = vadd.f32 %v2246_v63, %v2158_v36  ;;  %v2072_v48 = vadd.f32 %v2071_v19, %v1983_v27  ;;  %2021 = vmatmul.bf16.gmra.mxu0 %v5218_v40  ;;  %v5231_v18 = vpop.eup %4513  ;;  %v4366_v27 = vld [vmem:[#allocation6 + $0x14] sm:$0xf]  ;;  %v3736_v19 = vld [vmem:[#allocation6 + $0x18] sm:$0xf0]  ;;  %2399 = vmatpush.bf16.msra.mxu1 %v3843_v39  ;;  %v5238_v7 = vor.u32 %v4346_v23, %v3646_v47 }
 0x1f2   :  { %2110 = vmatmul.bf16.gmra.mxu1 %v5220_v61  ;;  %2488 = vmatpush.bf16.msra.mxu2 %v3907_v37  ;;  %v4342_v37 = vld [vmem:[#allocation3 + $0x354] sm:$0xf]  ;;  %v4040_v39 = vld [vmem:[#allocation6 + $0x278] sm:$0xf0] }
 0x1f3   :  { %4515 = vtanh.f32 %v2247_v12  ;;  %2199 = vmatmul.bf16.gmra.mxu2 %v5222_v62  ;;  %2314 = vmatpush.bf16.msra.mxu0 %v3747_v34  ;;  %v4422_v62 = vld [vmem:[#allocation6 + $0x1d4] sm:$0xf]  ;;  %5978 = vst [vmem:[#allocation129_spill] sm:$0xff] %v5238_v7 }
 0x1f4   :  { %2288 = vmatmul.bf16.gmra.mxu3 %v5225_v46  ;;  %v4390_v46 = vld [vmem:[#allocation6 + $0xd4] sm:$0xf] }
 0x1f5   :  { %v4442_v40 = vld [vmem:[#allocation6 + $0x274] sm:$0xf] }
 0x1f6   :  { %v2160_v35 = vpop.f32.mrf.mxu2  ;;  %v1984_v12 = vpop.f32.mrf.mxu0  ;;  %v4043_v34 = vor.u32 %v4442_v40, %v4040_v39 }
 0x1f7   :  { %v2161_v5 = vadd.f32 %v2160_v35, %v2072_v48  ;;  %v2249_v17 = vpop.f32.mrf.mxu3  ;;  %v1985_v36 = vadd.f32 %v1984_v12, %v4953_v29  ;;  %v2073_v63 = vpop.f32.mrf.mxu1  ;;  %v3739_v48 = vor.u32 %v4366_v27, %v3736_v19  ;;  %v3648_v35 = vld [vmem:[#allocation3 + $0x370] sm:$0xf0]  ;;  %v3832_v29 = vld [vmem:[#allocation6 + $0xd8] sm:$0xf0] }
 0x1f8   :  { %v4406_v12 = vld [vmem:[#allocation6 + $0x154] sm:$0xf]  ;;  %v3835_v38 = vor.u32 %v4390_v46, %v3832_v29  ;;  %v3656_v19 = vld [vmem:[#allocation3 + $0x378] sm:$0xf0]  ;;  %v4388_v46 = vld [vmem:[#allocation6 + $0xc4] sm:$0xf] }
 0x1f9   :  { %v5234_v45 = vpop.eup %4515  ;;  %v2250_v52 = vadd.f32 %v2249_v17, %v2161_v5  ;;  %v2074_v28 = vadd.f32 %v2073_v63, %v1985_v36  ;;  %v3960_v5 = vld [vmem:[#allocation6 + $0x1d8] sm:$0xf0]  ;;  %2315 = vmatpush.bf16.msra.mxu0 %v3739_v48  ;;  %v3899_v21 = vor.u32 %v4406_v12, %v3896_v49  ;;  %v4364_v36 = vld [vmem:[#allocation6 + $0x4] sm:$0xf]  ;;  %v3728_v63 = vld [vmem:[#allocation6 + $0x8] sm:$0xf0]  ;;  %v5240_v12 = vor.u32 %v4342_v37, %v3648_v35 }
 0x1fa   :  { %v4343_v17 = vld [vmem:[#allocation3 + $0x35c] sm:$0xf]  ;;  %v3963_v27 = vor.u32 %v4422_v62, %v3960_v5  ;;  %v3731_v61 = vor.u32 %v4364_v36, %v3728_v63  ;;  %2400 = vmatpush.bf16.msra.mxu1 %v3835_v38  ;;  %v3824_v29 = vld [vmem:[#allocation6 + $0xc8] sm:$0xf0]  ;;  %v5242_v62 = vor.u32 %v4347_v59, %v3654_v25  ;;  %v4420_v36 = vld [vmem:[#allocation6 + $0x1c4] sm:$0xf] }
 0x1fb   :  { %2489 = vmatpush.bf16.msra.mxu2 %v3899_v21  ;;  %5979 = vst [vmem:[#allocation130_spill] sm:$0xff] %v5240_v12  ;;  %v3827_v49 = vor.u32 %v4388_v46, %v3824_v29  ;;  %v3888_v5 = vld [vmem:[#allocation6 + $0x148] sm:$0xf0]  ;;  %v5244_v23 = vor.u32 %v4343_v17, %v3656_v19  ;;  %4517 = vtanh.f32 %v2250_v52  ;;  %v4402_v37 = vld [vmem:[#allocation6 + $0x134] sm:$0xf] }
 0x1fc   :  { %5980 = vst [vmem:[#allocation131_spill] sm:$0xff] %v5242_v62  ;;  %2578 = vmatpush.bf16.msra.mxu3 %v3963_v27  ;;  %v3952_v63 = vld [vmem:[#allocation6 + $0x1c8] sm:$0xf0]  ;;  %v3891_v40 = vor.u32 %v4404_v26, %v3888_v5  ;;  %v4386_v26 = vld [vmem:[#allocation6 + $0xb4] sm:$0xf] }
 0x1fd   :  { %5981 = vst [vmem:[#allocation132_spill] sm:$0xff] %v5244_v23  ;;  %2316 = vmatpush.bf16.msra.mxu0 %v3731_v61  ;;  %v3955_v21 = vor.u32 %v4420_v36, %v3952_v63  ;;  %v4032_v61 = vld [vmem:[#allocation6 + $0x268] sm:$0xf0]  ;;  %v3880_v35 = vld [vmem:[#allocation6 + $0x138] sm:$0xf0] }
 0x1fe   :  { %v2162_v9 = vpop.f32.mrf.mxu2  ;;  %v1987_v48 = vpop.f32.mrf.mxu0  ;;  %2401 = vmatpush.bf16.msra.mxu1 %v3827_v49  ;;  %v4418_v25 = vld [vmem:[#allocation6 + $0x1b4] sm:$0xf]  ;;  %v3944_v17 = vld [vmem:[#allocation6 + $0x1b8] sm:$0xf0]  ;;  %v3808_v49 = vld [vmem:[#allocation6 + $0xa8] sm:$0xf0] }
 0x1ff   :  { %v2163_v22 = vadd.f32 %v2162_v9, %v2074_v28  ;;  %v2251_v10 = vpop.f32.mrf.mxu3  ;;  %v2076_v47 = vpop.f32.mrf.mxu1  ;;  %v4440_v9 = vld [vmem:[#allocation6 + $0x264] sm:$0xf]  ;;  %v1988_v28 = vadd.f32 %v1987_v48, %v4960_v50  ;;  %2490 = vmatpush.bf16.msra.mxu2 %v3891_v40  ;;  %v4438_v27 = vld [vmem:[#allocation6 + $0x254] sm:$0xf]  ;;  %v4024_v19 = vld [vmem:[#allocation6 + $0x258] sm:$0xf0]  ;;  %v3947_v50 = vor.u32 %v4418_v25, %v3944_v17 }
 0x200   :  { %2579 = vmatpush.bf16.msra.mxu3 %v3955_v21  ;;  %v4027_v29 = vor.u32 %v4438_v27, %v4024_v19  ;;  %v4384_v48 = vld [vmem:[#allocation6 + $0xa4] sm:$0xf]  ;;  %v3872_v21 = vld [vmem:[#allocation6 + $0x128] sm:$0xf0]  ;;  %v4350_v19 = vld [vmem:[#allocation3 + $0x394] sm:$0xf] }
 0x201   :  { %v2252_v38 = vadd.f32 %v2251_v10, %v2163_v22  ;;  %2665 = vmatpush.bf16.msrb.mxu0 %v4043_v34  ;;  %v3816_v10 = vld [vmem:[#allocation6 + $0xb8] sm:$0xf0]  ;;  %v4035_v22 = vor.u32 %v4440_v9, %v4032_v61  ;;  %v3883_v34 = vor.u32 %v4402_v37, %v3880_v35  ;;  %v4400_v5 = vld [vmem:[#allocation6 + $0x124] sm:$0xf]  ;;  %v5251_v36 = vpop.eup %4517  ;;  %v2077_v63 = vadd.f32 %v2076_v47, %v1988_v28  ;;  %v3936_v61 = vld [vmem:[#allocation6 + $0x1a8] sm:$0xf0] }
 0x202   :  { %2026 = vmatmul.bf16.gmra.mxu0 %v5238_v7  ;;  %2115 = vmatmul.bf16.gmra.mxu1 %v5240_v12  ;;  %v3819_v52 = vor.u32 %v4386_v26, %v3816_v10  ;;  %v4416_v9 = vld [vmem:[#allocation6 + $0x1a4] sm:$0xf]  ;;  %v3875_v37 = vor.u32 %v4400_v5, %v3872_v21  ;;  %v4016_v17 = vld [vmem:[#allocation6 + $0x248] sm:$0xf0]  ;;  %v3680_v47 = vld [vmem:[#allocation3 + $0x3b0] sm:$0xf0] }
 0x203   :  { %4519 = vtanh.f32 %v2252_v38  ;;  %2204 = vmatmul.bf16.gmra.mxu2 %v5242_v62  ;;  %v3811_v38 = vor.u32 %v4384_v48, %v3808_v49  ;;  %v3939_v35 = vor.u32 %v4416_v9, %v3936_v61  ;;  %v4436_v25 = vld [vmem:[#allocation6 + $0x244] sm:$0xf]  ;;  %v4382_v28 = vld [vmem:[#allocation6 + $0x94] sm:$0xf]  ;;  %v3686_v5 = vld [vmem:[#allocation3 + $0x398] sm:$0xf]  ;;  %v5260_v15 = vor.u32 %v4350_v19, %v3680_v47 }
 0x204   :  { %2293 = vmatmul.bf16.gmra.mxu3 %v5244_v23  ;;  %2402 = vmatpush.bf16.msra.mxu1 %v3819_v52  ;;  %v4354_v52 = vld [vmem:[#allocation3 + $0x3ac] sm:$0xf0]  ;;  %v4398_v48 = vld [vmem:[#allocation6 + $0x114] sm:$0xf]  ;;  %v4019_v23 = vor.u32 %v4436_v25, %v4016_v17  ;;  %v4355_v21 = vld [vmem:[#allocation3 + $0x3b4] sm:$0xf0] }
 0x205   :  { %2666 = vmatpush.bf16.msrb.mxu0 %v4035_v22  ;;  %2491 = vmatpush.bf16.msra.mxu2 %v3883_v34  ;;  %v3678_v22 = vld [vmem:[#allocation3 + $0x390] sm:$0xf]  ;;  %v3800_v34 = vld [vmem:[#allocation6 + $0x98] sm:$0xf0]  ;;  %v4414_v62 = vld [vmem:[#allocation6 + $0x194] sm:$0xf] }
 0x206   :  { %v2165_v59 = vpop.f32.mrf.mxu2  ;;  %v1989_v46 = vpop.f32.mrf.mxu0  ;;  %2580 = vmatpush.bf16.msra.mxu3 %v3947_v50  ;;  %v3928_v50 = vld [vmem:[#allocation6 + $0x198] sm:$0xf0]  ;;  %v4434_v7 = vld [vmem:[#allocation6 + $0x234] sm:$0xf]  ;;  %v3792_v25 = vld [vmem:[#allocation6 + $0x88] sm:$0xf0] }
 0x207   :  { %v2254_v39 = vpop.f32.mrf.mxu3  ;;  %v2078_v40 = vpop.f32.mrf.mxu1  ;;  %v1990_v10 = vadd.f32 %v1989_v46, %v4971_v33  ;;  %v2166_v27 = vadd.f32 %v2165_v59, %v2077_v63  ;;  %v3803_v33 = vor.u32 %v4382_v28, %v3800_v34  ;;  %v3864_v46 = vld [vmem:[#allocation6 + $0x118] sm:$0xf0]  ;;  %v3931_v12 = vor.u32 %v4414_v62, %v3928_v50  ;;  %v4396_v17 = vld [vmem:[#allocation6 + $0x104] sm:$0xf] }
 0x208   :  { %2403 = vmatpush.bf16.msra.mxu1 %v3811_v38  ;;  %v4351_v9 = vld [vmem:[#allocation3 + $0x39c] sm:$0xf]  ;;  %v3867_v59 = vor.u32 %v4398_v48, %v3864_v46  ;;  %v4380_v38 = vld [vmem:[#allocation6 + $0x84] sm:$0xf]  ;;  %v4000_v46 = vld [vmem:[#allocation6 + $0x228] sm:$0xf0] }
 0x209   :  { %v5253_v26 = vpop.eup %4519  ;;  %2667 = vmatpush.bf16.msrb.mxu0 %v4027_v29  ;;  %2492 = vmatpush.bf16.msra.mxu2 %v3875_v37  ;;  %v2079_v63 = vadd.f32 %v2078_v40, %v1990_v10  ;;  %v3688_v61 = vld [vmem:[#allocation3 + $0x3b8] sm:$0xf0]  ;;  %v2255_v11 = vadd.f32 %v2254_v39, %v2166_v27  ;;  %v5258_v29 = vor.u32 %v4354_v52, %v3678_v22  ;;  %v3856_v40 = vld [vmem:[#allocation6 + $0x108] sm:$0xf0]  ;;  %v4412_v62 = vld [vmem:[#allocation6 + $0x184] sm:$0xf] }
 0x20a   :  { %2581 = vmatpush.bf16.msra.mxu3 %v3939_v35  ;;  %v5262_v37 = vor.u32 %v4355_v21, %v3686_v5  ;;  %v3920_v10 = vld [vmem:[#allocation6 + $0x188] sm:$0xf0]  ;;  %v5264_v39 = vor.u32 %v4351_v9, %v3688_v61  ;;  %v4011_v22 = vor.u32 %v4434_v7, %v4008_v58  ;;  %v3795_v27 = vor.u32 %v4380_v38, %v3792_v25  ;;  %v4430_v58 = vld [vmem:[#allocation6 + $0x214] sm:$0xf]  ;;  %v3710_v25 = vld [vmem:[#allocation3 + $0x3d0] sm:$0xf] }
 0x20b   :  { %v3859_v48 = vor.u32 %v4396_v17, %v3856_v40  ;;  %4521 = vtanh.f32 %v2255_v11  ;;  %v3923_v19 = vor.u32 %v4412_v62, %v3920_v10  ;;  %v4362_v17 = vld [vmem:[#allocation3 + $0x3ec] sm:$0xf0]  ;;  %v3718_v40 = vld [vmem:[#allocation3 + $0x3d8] sm:$0xf] }
 0x20c   :  { %2404 = vmatpush.bf16.msra.mxu1 %v3803_v33  ;;  %v4363_v62 = vld [vmem:[#allocation3 + $0x3f4] sm:$0xf0] }
 0x20d   :  { %2668 = vmatpush.bf16.msrb.mxu0 %v4019_v23  ;;  %2493 = vmatpush.bf16.msra.mxu2 %v3867_v59 }
 0x20e   :  { %v2167_v49 = vpop.f32.mrf.mxu2  ;;  %v1992_v16 = vpop.f32.mrf.mxu0  ;;  %2582 = vmatpush.bf16.msra.mxu3 %v3931_v12  ;;  %v3992_v12 = vld [vmem:[#allocation6 + $0x218] sm:$0xf0] }
 0x20f   :  { %v2168_v28 = vadd.f32 %v2167_v49, %v2079_v63  ;;  %v2256_v34 = vpop.f32.mrf.mxu3  ;;  %v2081_v35 = vpop.f32.mrf.mxu1  ;;  %v4432_v49 = vld [vmem:[#allocation6 + $0x224] sm:$0xf]  ;;  %v1993_v23 = vadd.f32 %v1992_v16, %v4978_v60  ;;  %v3995_v9 = vor.u32 %v4430_v58, %v3992_v12  ;;  %v3984_v63 = vld [vmem:[#allocation6 + $0x208] sm:$0xf0] }
 0x210   :  { %v4003_v7 = vor.u32 %v4432_v49, %v4000_v46  ;;  %2405 = vmatpush.bf16.msra.mxu1 %v3795_v27  ;;  %v4428_v60 = vld [vmem:[#allocation6 + $0x204] sm:$0xf] }
 0x211   :  { %v2257_v52 = vadd.f32 %v2256_v34, %v2168_v28  ;;  %2669 = vmatpush.bf16.msrb.mxu0 %v4011_v22  ;;  %2494 = vmatpush.bf16.msra.mxu2 %v3859_v48  ;;  %v5271_v50 = vpop.eup %4521  ;;  %v2082_v5 = vadd.f32 %v2081_v35, %v1993_v23  ;;  %v4358_v28 = vld [vmem:[#allocation3 + $0x3d4] sm:$0xf]  ;;  %v3987_v10 = vor.u32 %v4428_v60, %v3984_v63  ;;  %v4359_v22 = vld [vmem:[#allocation3 + $0x3dc] sm:$0xf] }
 0x212   :  { %2031 = vmatmul.bf16.gmra.mxu0 %v5258_v29  ;;  %2120 = vmatmul.bf16.gmra.mxu1 %v5260_v15  ;;  %v3712_v34 = vld [vmem:[#allocation3 + $0x3f0] sm:$0xf0] }
 0x213   :  { %4523 = vtanh.f32 %v2257_v52  ;;  %2209 = vmatmul.bf16.gmra.mxu2 %v5262_v37  ;;  %2583 = vmatpush.bf16.msra.mxu3 %v3923_v19  ;;  %v3720_v52 = vld [vmem:[#allocation3 + $0x3f8] sm:$0xf0]  ;;  %v5280_v23 = vor.u32 %v4358_v28, %v3712_v34 }
 0x214   :  { %2298 = vmatmul.bf16.gmra.mxu3 %v5264_v39  ;;  %v5284_v12 = vor.u32 %v4359_v22, %v3720_v52 }
 0x215   :  { %2670 = vmatpush.bf16.msrb.mxu0 %v4003_v7  ;;  %v5282_v7 = vor.u32 %v4363_v62, %v3718_v40 }
 0x216   :  { %v2170_v47 = vpop.f32.mrf.mxu2  ;;  %v1994_v33 = vpop.f32.mrf.mxu0 }
 0x217   :  { %v2259_v11 = vpop.f32.mrf.mxu3  ;;  %v2083_v21 = vpop.f32.mrf.mxu1  ;;  %v1995_v16 = vadd.f32 %v1994_v33, %v4989_v57  ;;  %v2171_v61 = vadd.f32 %v2170_v47, %v2082_v5  ;;  %v5278_v57 = vor.u32 %v4362_v17, %v3710_v25 }
 0x219   :  { %v5273_v59 = vpop.eup %4523  ;;  %2671 = vmatpush.bf16.msrb.mxu0 %v3995_v9  ;;  %v2084_v35 = vadd.f32 %v2083_v21, %v1995_v16  ;;  %v2260_v27 = vadd.f32 %v2259_v11, %v2171_v61 }
 0x21a   :  { %v3096_v38 = vpack.c.bf16 %v5273_v59, %v5271_v50  ;;  %v5982_v50 = vpack.c.bf16 %v5253_v26, %v5251_v36 }
 0x21b   :  { %4525 = vtanh.f32 %v2260_v27 }
 0x21d   :  { %2672 = vmatpush.bf16.msrb.mxu0 %v3987_v10 }
 0x21e   :  { %v2172_v48 = vpop.f32.mrf.mxu2  ;;  %v1997_v19 = vpop.f32.mrf.mxu0 }
 0x21f   :  { %v2173_v49 = vadd.f32 %v2172_v48, %v2084_v35  ;;  %v2261_v46 = vpop.f32.mrf.mxu3  ;;  %v2086_v58 = vpop.f32.mrf.mxu1  ;;  %v1998_v11 = vadd.f32 %v1997_v19, %v4996_v20 }
 0x221   :  { %v2262_v47 = vadd.f32 %v2261_v46, %v2173_v49  ;;  %v4526_v9 = vpop.eup %4525  ;;  %v2087_v16 = vadd.f32 %v2086_v58, %v1998_v11 }
 0x222   :  { %2036 = vmatmul.bf16.gmra.mxu0 %v5278_v57  ;;  %2125 = vmatmul.bf16.gmra.mxu1 %v5280_v23 }
 0x223   :  { %4527 = vtanh.f32 %v2262_v47  ;;  %2214 = vmatmul.bf16.gmra.mxu2 %v5282_v7 }
 0x224   :  { %2303 = vmatmul.bf16.gmra.mxu3 %v5284_v12 }
 0x226   :  { %v2175_v33 = vpop.f32.mrf.mxu2  ;;  %v1999_v21 = vpop.f32.mrf.mxu0 }
 0x227   :  { %v2264_v5 = vpop.f32.mrf.mxu3  ;;  %v2088_v60 = vpop.f32.mrf.mxu1  ;;  %v2000_v61 = vadd.f32 %v1999_v21, %v5007_v32  ;;  %v2176_v25 = vadd.f32 %v2175_v33, %v2087_v16 }
 0x229   :  { %v4528_v63 = vpop.eup %4527  ;;  %v2089_v28 = vadd.f32 %v2088_v60, %v2000_v61  ;;  %v2265_v34 = vadd.f32 %v2264_v5, %v2176_v25 }
 0x22a   :  { %v3098_v17 = vpack.c.bf16 %v4528_v63, %v4526_v9 }
 0x22b   :  { %4529 = vtanh.f32 %v2265_v34 }
 0x22e   :  { %v2177_v40 = vpop.f32.mrf.mxu2  ;;  %v2002_v35 = vpop.f32.mrf.mxu0 }
 0x22f   :  { %v2178_v62 = vadd.f32 %v2177_v40, %v2089_v28  ;;  %v2266_v10 = vpop.f32.mrf.mxu3  ;;  %v2003_v20 = vadd.f32 %v2002_v35, %v5014_v51  ;;  %v2091_v22 = vpop.f32.mrf.mxu1 }
 0x231   :  { %v2267_v52 = vadd.f32 %v2266_v10, %v2178_v62  ;;  %v2092_v27 = vadd.f32 %v2091_v22, %v2003_v20  ;;  %v4530_v19 = vpop.eup %4529 }
 0x232   :  { %2317 = vmatmul.bf16.vlgmr.msra.gmra.mxu0 %v4755_v41  ;;  %2406 = vmatmul.bf16.vlgmr.msra.gmra.mxu1 %v4757_v42 }
 0x233   :  { %4531 = vtanh.f32 %v2267_v52  ;;  %2495 = vmatmul.bf16.vlgmr.msra.gmra.mxu2 %v4759_v43 }
 0x234   :  { %2584 = vmatmul.bf16.vlgmr.msra.gmra.mxu3 %v4761_v44 }
 0x236   :  { %v2180_v32 = vpop.f32.mrf.mxu2  ;;  %v2004_v46 = vpop.f32.mrf.mxu0 }
 0x237   :  { %v2181_v48 = vadd.f32 %v2180_v32, %v2092_v27  ;;  %v2269_v49 = vpop.f32.mrf.mxu3  ;;  %v2005_v51 = vadd.f32 %v2004_v46, %v5025_v30  ;;  %v2093_v58 = vpop.f32.mrf.mxu1 }
 0x239   :  { %v4532_v47 = vpop.eup %4531  ;;  %v2270_v11 = vadd.f32 %v2269_v49, %v2181_v48  ;;  %v2094_v33 = vadd.f32 %v2093_v58, %v2005_v51 }
 0x23a   :  { %v3100_v5 = vpack.c.bf16 %v4532_v47, %v4530_v19 }
 0x23b   :  { %4533 = vtanh.f32 %v2270_v11  ;;  %v5984_v11 = vld [vmem:[#allocation12_spill] sm:$0xff] }
 0x23c   :  { %3131 = vmatpush.bf16.xpose.msra.mxu0 %v3100_v5 }
 0x23e   :  { %v2182_v41 = vpop.f32.mrf.mxu2  ;;  %v2007_v9 = vpop.f32.mrf.mxu0 }
 0x23f   :  { %v2183_v21 = vadd.f32 %v2182_v41, %v2094_v33  ;;  %v2271_v42 = vpop.f32.mrf.mxu3  ;;  %v2008_v43 = vadd.f32 %v2007_v9, %v5032_v8  ;;  %v2096_v44 = vpop.f32.mrf.mxu1  ;;  %v5985_v33 = vld [vmem:[#allocation13_spill] sm:$0xff] }
 0x241   :  { %v2272_v16 = vadd.f32 %v2271_v42, %v2183_v21  ;;  %v2097_v60 = vadd.f32 %v2096_v44, %v2008_v43  ;;  %v5303_v28 = vpop.eup %4533  ;;  %v5989_v43 = vld [vmem:[#allocation82_spill] sm:$0xff] }
 0x242   :  { %2322 = vmatmul.bf16.gmra.mxu0 %v4767_v53  ;;  %2411 = vmatmul.bf16.gmra.mxu1 %v4769_v54 }
 0x243   :  { %4535 = vtanh.f32 %v2272_v16  ;;  %2500 = vmatmul.bf16.gmra.mxu2 %v4771_v55 }
 0x244   :  { %2589 = vmatmul.bf16.gmra.mxu3 %v4773_v56  ;;  %3132 = vmatpush.bf16.xpose.msra.mxu0 %v3098_v17 }
 0x246   :  { %v2185_v30 = vpop.f32.mrf.mxu2  ;;  %v2009_v25 = vpop.f32.mrf.mxu0 }
 0x247   :  { %v2186_v63 = vadd.f32 %v2185_v30, %v2097_v60  ;;  %v2274_v61 = vpop.f32.mrf.mxu3  ;;  %v2010_v8 = vadd.f32 %v2009_v25, %v5043_v31  ;;  %v2098_v34 = vpop.f32.mrf.mxu1 }
 0x249   :  { %v5306_v40 = vpop.eup %4535  ;;  %v2275_v53 = vadd.f32 %v2274_v61, %v2186_v63  ;;  %v2099_v62 = vadd.f32 %v2098_v34, %v2010_v8  ;;  %v5990_v63 = vld [vmem:[#allocation118_spill] sm:$0xff]  ;;  %v5991_v61 = vld [vmem:[#allocation117_spill] sm:$0xff] }
 0x24a   :  { %v3102_v54 = vpack.c.bf16 %v5306_v40, %v5303_v28  ;;  %v5992_v25 = vpack.c.bf16 %v5990_v63, %v5991_v61  ;;  %v6006_v61 = vld [vmem:[#allocation21_spill] sm:$0xff]  ;;  %v4454_v28 = vld [vmem:[#allocation6 + $0x2d4] sm:$0xf]  ;;  %v4088_v40 = vld [vmem:[#allocation6 + $0x2d8] sm:$0xf0] }
 0x24b   :  { %4537 = vtanh.f32 %v2275_v53 }
 0x24c   :  { %3133 = vmatpush.bf16.xpose.msra.mxu0 %v3096_v38 }
 0x24e   :  { %v2187_v55 = vpop.f32.mrf.mxu2  ;;  %v2012_v10 = vpop.f32.mrf.mxu0 }
 0x24f   :  { %v2188_v56 = vadd.f32 %v2187_v55, %v2099_v62  ;;  %v2276_v17 = vpop.f32.mrf.mxu3  ;;  %v2013_v35 = vadd.f32 %v2012_v10, %v5050_v6  ;;  %v2101_v20 = vpop.f32.mrf.mxu1  ;;  %v5993_v55 = vld [vmem:[#allocation83_spill] sm:$0xff] }
 0x251   :  { %v2277_v31 = vadd.f32 %v2276_v17, %v2188_v56  ;;  %v2102_v22 = vadd.f32 %v2101_v20, %v2013_v35  ;;  %v5321_v27 = vpop.eup %4537  ;;  %v5994_v20 = vld [vmem:[#allocation14_spill] sm:$0xff] }
 0x252   :  { %2327 = vmatmul.bf16.gmra.mxu0 %v4779_v1  ;;  %2416 = vmatmul.bf16.gmra.mxu1 %v4781_v2 }
 0x253   :  { %4539 = vtanh.f32 %v2277_v31  ;;  %2505 = vmatmul.bf16.gmra.mxu2 %v4783_v3  ;;  %v5995_v31 = vld [vmem:[#allocation15_spill] sm:$0xff] }
 0x254   :  { %2594 = vmatmul.bf16.gmra.mxu3 %v4785_v4  ;;  %3134 = vmatpush.bf16.xpose.msra.mxu0 %v5982_v50  ;;  %v5983_v4 = vpack.c.bf16 %v5234_v45, %v5231_v18  ;;  %v5986_v18 = vld [vmem:[#allocation124_spill] sm:$0xff]  ;;  %v5987_v45 = vld [vmem:[#allocation123_spill] sm:$0xff]  ;;  %v5997_v50 = vld [vmem:[#allocation17_spill] sm:$0xff] }
 0x255   :  { %v5988_v5 = vpack.c.bf16 %v5986_v18, %v5987_v45 }
 0x256   :  { %v2190_v59 = vpop.f32.mrf.mxu2  ;;  %v2014_v52 = vpop.f32.mrf.mxu0 }
 0x257   :  { %v2191_v38 = vadd.f32 %v2190_v59, %v2102_v22  ;;  %v2279_v6 = vpop.f32.mrf.mxu3  ;;  %v2015_v32 = vadd.f32 %v2014_v52, %v5061_v24  ;;  %v2103_v1 = vpop.f32.mrf.mxu1  ;;  %v5996_v22 = vld [vmem:[#allocation16_spill] sm:$0xff] }
 0x258   :  { %v5998_v59 = vld [vmem:[#allocation112_spill] sm:$0xff] }
 0x259   :  { %v5324_v48 = vpop.eup %4539  ;;  %v2280_v2 = vadd.f32 %v2279_v6, %v2191_v38  ;;  %v2104_v49 = vadd.f32 %v2103_v1, %v2015_v32  ;;  %v5999_v38 = vld [vmem:[#allocation111_spill] sm:$0xff] }
 0x25a   :  { %v3104_v3 = vpack.c.bf16 %v5324_v48, %v5321_v27  ;;  %v6000_v6 = vpack.c.bf16 %v5998_v59, %v5999_v38  ;;  %v4488_v48 = vld [vmem:[#allocation6 + $0x3e4] sm:$0xf] }
 0x25b   :  { %4541 = vtanh.f32 %v2280_v2 }
 0x25c   :  { %3135 = vmatpush.bf16.xpose.msra.mxu0 %v5983_v4  ;;  %v6001_v4 = vld [vmem:[#allocation88_spill] sm:$0xff] }
 0x25e   :  { %v2192_v36 = vpop.f32.mrf.mxu2  ;;  %v2017_v19 = vpop.f32.mrf.mxu0 }
 0x25f   :  { %v2193_v26 = vadd.f32 %v2192_v36, %v2104_v49  ;;  %v2281_v46 = vpop.f32.mrf.mxu3  ;;  %v2018_v51 = vadd.f32 %v2017_v19, %v5068_v0  ;;  %v2106_v58 = vpop.f32.mrf.mxu1 }
 0x261   :  { %v2282_v24 = vadd.f32 %v2281_v46, %v2193_v26  ;;  %v2107_v47 = vadd.f32 %v2106_v58, %v2018_v51  ;;  %v5339_v9 = vpop.eup %4541 }
 0x262   :  { %2332 = vmatmul.bf16.gmra.mxu0 %v4791_v13  ;;  %2421 = vmatmul.bf16.gmra.mxu1 %v4793_v14 }
 0x263   :  { %4543 = vtanh.f32 %v2282_v24  ;;  %2510 = vmatmul.bf16.gmra.mxu2 %v5984_v11  ;;  %v4474_v24 = vld [vmem:[#allocation6 + $0x374] sm:$0xf] }
 0x264   :  { %2599 = vmatmul.bf16.gmra.mxu3 %v5985_v33  ;;  %3136 = vmatpush.bf16.xpose.msra.mxu0 %v5988_v5 }
 0x266   :  { %v2195_v41 = vpop.f32.mrf.mxu2  ;;  %v2019_v42 = vpop.f32.mrf.mxu0 }
 0x267   :  { %v2196_v21 = vadd.f32 %v2195_v41, %v2107_v47  ;;  %v2284_v0 = vpop.f32.mrf.mxu3  ;;  %v2020_v44 = vadd.f32 %v2019_v42, %v5989_v43  ;;  %v2108_v13 = vpop.f32.mrf.mxu1  ;;  %v4168_v47 = vld [vmem:[#allocation6 + $0x378] sm:$0xf0]  ;;  %v4160_v42 = vld [vmem:[#allocation6 + $0x368] sm:$0xf0]  ;;  %v6002_v43 = vld [vmem:[#allocation18_spill] sm:$0xff] }
 0x268   :  { %v4171_v33 = vor.u32 %v4474_v24, %v4168_v47 }
 0x269   :  { %v5342_v16 = vpop.eup %4543  ;;  %v2285_v14 = vadd.f32 %v2284_v0, %v2196_v21  ;;  %v2109_v60 = vadd.f32 %v2108_v13, %v2020_v44  ;;  %v4472_v0 = vld [vmem:[#allocation6 + $0x364] sm:$0xf]  ;;  %v6003_v13 = vld [vmem:[#allocation19_spill] sm:$0xff] }
 0x26a   :  { %v3106_v30 = vpack.c.bf16 %v5342_v16, %v5339_v9  ;;  %2843 = vmatpush.bf16.msrb.mxu2 %v4171_v33  ;;  %v4163_v44 = vor.u32 %v4472_v0, %v4160_v42  ;;  %v4128_v33 = vld [vmem:[#allocation6 + $0x328] sm:$0xf0] }
 0x26b   :  { %4545 = vtanh.f32 %v2285_v14  ;;  %v6004_v14 = vld [vmem:[#allocation20_spill] sm:$0xff]  ;;  %v6012_v42 = vld [vmem:[#allocation25_spill] sm:$0xff] }
 0x26c   :  { %3137 = vmatpush.bf16.xpose.msra.mxu0 %v5992_v25  ;;  %v4470_v25 = vld [vmem:[#allocation6 + $0x354] sm:$0xf] }
 0x26e   :  { %v2197_v8 = vpop.f32.mrf.mxu2  ;;  %v2022_v62 = vpop.f32.mrf.mxu0  ;;  %2844 = vmatpush.bf16.msrb.mxu2 %v4163_v44  ;;  %v4120_v44 = vld [vmem:[#allocation6 + $0x318] sm:$0xf0] }
 0x26f   :  { %v2198_v34 = vadd.f32 %v2197_v8, %v2109_v60  ;;  %v2286_v53 = vpop.f32.mrf.mxu3  ;;  %v2023_v56 = vadd.f32 %v2022_v62, %v5993_v55  ;;  %v2111_v17 = vpop.f32.mrf.mxu1  ;;  %v6005_v60 = vld [vmem:[#allocation89_spill] sm:$0xff]  ;;  %v4152_v8 = vld [vmem:[#allocation6 + $0x358] sm:$0xf0] }
 0x271   :  { %v2287_v10 = vadd.f32 %v2286_v53, %v2198_v34  ;;  %v2112_v35 = vadd.f32 %v2111_v17, %v2023_v56  ;;  %v5357_v49 = vpop.eup %4545  ;;  %v4155_v53 = vor.u32 %v4470_v25, %v4152_v8 }
 0x272   :  { %2337 = vmatmul.bf16.gmra.mxu0 %v5994_v20  ;;  %2426 = vmatmul.bf16.gmra.mxu1 %v5995_v31  ;;  %v6007_v20 = vld [vmem:[#allocation94_spill] sm:$0xff] }
 0x273   :  { %4547 = vtanh.f32 %v2287_v10  ;;  %2515 = vmatmul.bf16.gmra.mxu2 %v5996_v22  ;;  %v4468_v22 = vld [vmem:[#allocation6 + $0x344] sm:$0xf] }
 0x274   :  { %2604 = vmatmul.bf16.gmra.mxu3 %v5997_v50  ;;  %3138 = vmatpush.bf16.xpose.msra.mxu0 %v6000_v6  ;;  %v4144_v50 = vld [vmem:[#allocation6 + $0x348] sm:$0xf0] }
 0x275   :  { %2845 = vmatpush.bf16.msrb.mxu2 %v4155_v53  ;;  %v4147_v38 = vor.u32 %v4468_v22, %v4144_v50  ;;  %v6013_v53 = vld [vmem:[#allocation100_spill] sm:$0xff] }
 0x276   :  { %v2200_v52 = vpop.f32.mrf.mxu2  ;;  %v2024_v2 = vpop.f32.mrf.mxu0 }
 0x277   :  { %v2201_v32 = vadd.f32 %v2200_v52, %v2112_v35  ;;  %v2289_v1 = vpop.f32.mrf.mxu3  ;;  %v2025_v36 = vadd.f32 %v2024_v2, %v6001_v4  ;;  %v2113_v26 = vpop.f32.mrf.mxu1 }
 0x279   :  { %v5360_v46 = vpop.eup %4547  ;;  %v2290_v19 = vadd.f32 %v2289_v1, %v2201_v32  ;;  %v2114_v51 = vadd.f32 %v2113_v26, %v2025_v36  ;;  %2846 = vmatpush.bf16.msrb.mxu2 %v4147_v38  ;;  %v4466_v32 = vld [vmem:[#allocation6 + $0x334] sm:$0xf]  ;;  %v4136_v1 = vld [vmem:[#allocation6 + $0x338] sm:$0xf0] }
 0x27a   :  { %v3108_v58 = vpack.c.bf16 %v5360_v46, %v5357_v49  ;;  %v4139_v36 = vor.u32 %v4466_v32, %v4136_v1  ;;  %v6035_v49 = vld [vmem:[#allocation45_spill] sm:$0xff] }
 0x27b   :  { %4549 = vtanh.f32 %v2290_v19 }
 0x27d   :  { %2847 = vmatpush.bf16.msrb.mxu2 %v4139_v36  ;;  %v6015_v36 = vld [vmem:[#allocation27_spill] sm:$0xff] }
 0x27e   :  { %v2202_v11 = vpop.f32.mrf.mxu2 }
 0x27f   :  { %v2203_v18 = vadd.f32 %v2202_v11, %v2114_v51  ;;  %v2291_v45 = vpop.f32.mrf.mxu3  ;;  %v2027_v5 = vpop.f32.mrf.mxu0  ;;  %v4464_v11 = vld [vmem:[#allocation6 + $0x324] sm:$0xf] }
 0x280   :  { %v2116_v41 = vpop.f32.mrf.mxu1  ;;  %v2028_v63 = vadd.f32 %v2027_v5, %v6005_v60  ;;  %v6009_v5 = vld [vmem:[#allocation23_spill] sm:$0xff] }
 0x281   :  { %v2292_v21 = vadd.f32 %v2291_v45, %v2203_v18  ;;  %v5369_v56 = vpop.eup %4549  ;;  %v6008_v18 = vld [vmem:[#allocation22_spill] sm:$0xff]  ;;  %v4131_v45 = vor.u32 %v4464_v11, %v4128_v33 }
 0x282   :  { %2342 = vmatmul.bf16.gmra.mxu0 %v6002_v43  ;;  %2431 = vmatmul.bf16.gmra.mxu1 %v6003_v13  ;;  %v2117_v17 = vadd.f32 %v2116_v41, %v2028_v63  ;;  %v6010_v41 = vld [vmem:[#allocation24_spill] sm:$0xff]  ;;  %v4462_v43 = vld [vmem:[#allocation6 + $0x314] sm:$0xf] }
 0x283   :  { %4551 = vtanh.f32 %v2292_v21  ;;  %2520 = vmatmul.bf16.gmra.mxu2 %v6004_v14  ;;  %v6011_v21 = vld [vmem:[#allocation95_spill] sm:$0xff]  ;;  %v4123_v14 = vor.u32 %v4462_v43, %v4120_v44  ;;  %v4629_v44 = vld [vmem:[%s5745_s2] sm:$0x3] }
 0x284   :  { %2609 = vmatmul.bf16.gmra.mxu3 %v6006_v61  ;;  %2848 = vmatpush.bf16.msrb.mxu2 %v4131_v45 }
 0x286   :  { %v2205_v34 = vpop.f32.mrf.mxu2 }
 0x287   :  { %v2294_v62 = vpop.f32.mrf.mxu3  ;;  %v2029_v55 = vpop.f32.mrf.mxu0  ;;  %v2206_v59 = vadd.f32 %v2205_v34, %v2117_v17  ;;  %v4112_v17 = vld [vmem:[#allocation6 + $0x308] sm:$0xf0] }
 0x288   :  { %v2118_v10 = vpop.f32.mrf.mxu1  ;;  %v2030_v31 = vadd.f32 %v2029_v55, %v6007_v20  ;;  %2849 = vmatpush.bf16.msrb.mxu2 %v4123_v14  ;;  %v4460_v55 = vld [vmem:[#allocation6 + $0x304] sm:$0xf] }
 0x289   :  { %v5371_v35 = vpop.eup %4551  ;;  %v2295_v2 = vadd.f32 %v2294_v62, %v2206_v59  ;;  %v4115_v20 = vor.u32 %v4460_v55, %v4112_v17 }
 0x28a   :  { %v3110_v6 = vpack.c.bf16 %v5371_v35, %v5369_v56  ;;  %v2119_v52 = vadd.f32 %v2118_v10, %v2030_v31 }
 0x28b   :  { %4553 = vtanh.f32 %v2295_v2 }
 0x28c   :  { %2850 = vmatpush.bf16.msrb.mxu2 %v4115_v20  ;;  %v6020_v20 = vld [vmem:[#allocation30_spill] sm:$0xff] }
 0x28e   :  { %v2207_v4 = vpop.f32.mrf.mxu2 }
 0x28f   :  { %v2208_v26 = vadd.f32 %v2207_v4, %v2119_v52  ;;  %v2296_v19 = vpop.f32.mrf.mxu3  ;;  %v2032_v51 = vpop.f32.mrf.mxu0  ;;  %v6014_v4 = vld [vmem:[#allocation26_spill] sm:$0xff] }
 0x290   :  { %v2121_v24 = vpop.f32.mrf.mxu1  ;;  %v2033_v0 = vadd.f32 %v2032_v51, %v6011_v21  ;;  %v6019_v21 = vld [vmem:[#allocation106_spill] sm:$0xff] }
 0x291   :  { %v2297_v47 = vadd.f32 %v2296_v19, %v2208_v26  ;;  %v5381_v61 = vpop.eup %4553  ;;  %v6016_v26 = vld [vmem:[#allocation28_spill] sm:$0xff]  ;;  %v6017_v19 = vld [vmem:[#allocation101_spill] sm:$0xff] }
 0x292   :  { %2347 = vmatmul.bf16.gmra.mxu0 %v6008_v18  ;;  %2436 = vmatmul.bf16.gmra.mxu1 %v6009_v5  ;;  %v2122_v25 = vadd.f32 %v2121_v24, %v2033_v0  ;;  %v6018_v24 = vld [vmem:[#allocation29_spill] sm:$0xff] }
 0x293   :  { %4555 = vtanh.f32 %v2297_v47  ;;  %2525 = vmatmul.bf16.gmra.mxu2 %v6010_v41 }
 0x294   :  { %2614 = vmatmul.bf16.gmra.mxu3 %v6012_v42 }
 0x296   :  { %v2210_v13 = vpop.f32.mrf.mxu2 }
 0x297   :  { %v2299_v60 = vpop.f32.mrf.mxu3  ;;  %v2034_v63 = vpop.f32.mrf.mxu0  ;;  %v2211_v10 = vadd.f32 %v2210_v13, %v2122_v25  ;;  %v5397_v13 = vperm.slane %v4629_v44, 1  ;;  %v6026_v44 = vld [vmem:[#allocation36_spill] sm:$0xff] }
 0x298   :  { %v2123_v8 = vpop.f32.mrf.mxu1  ;;  %v2035_v62 = vadd.f32 %v2034_v63, %v6013_v53 }
 0x299   :  { %v5383_v34 = vpop.eup %4555  ;;  %v2300_v50 = vadd.f32 %v2299_v60, %v2211_v10 }
 0x29a   :  { %v3112_v31 = vpack.c.bf16 %v5383_v34, %v5381_v61  ;;  %v2124_v22 = vadd.f32 %v2123_v8, %v2035_v62 }
 0x29b   :  { %4557 = vtanh.f32 %v2300_v50  ;;  %v6022_v50 = vld [vmem:[#allocation32_spill] sm:$0xff] }
 0x29e   :  { %v2212_v59 = vpop.f32.mrf.mxu2 }
 0x29f   :  { %v2213_v38 = vadd.f32 %v2212_v59, %v2124_v22  ;;  %v2301_v52 = vpop.f32.mrf.mxu3  ;;  %v2037_v32 = vpop.f32.mrf.mxu0  ;;  %v6021_v22 = vld [vmem:[#allocation31_spill] sm:$0xff]  ;;  %v6023_v59 = vld [vmem:[#allocation33_spill] sm:$0xff] }
 0x2a0   :  { %v2126_v1 = vpop.f32.mrf.mxu1  ;;  %v2038_v51 = vadd.f32 %v2037_v32, %v6017_v19 }
 0x2a1   :  { %v2302_v2 = vadd.f32 %v2301_v52, %v2213_v38  ;;  %v4558_v18 = vpop.eup %4557 }
 0x2a2   :  { %2352 = vmatmul.bf16.gmra.mxu0 %v6014_v4  ;;  %2441 = vmatmul.bf16.gmra.mxu1 %v6015_v36  ;;  %v2127_v45 = vadd.f32 %v2126_v1, %v2038_v51 }
 0x2a3   :  { %4559 = vtanh.f32 %v2302_v2  ;;  %2530 = vmatmul.bf16.gmra.mxu2 %v6016_v26 }
 0x2a4   :  { %2619 = vmatmul.bf16.gmra.mxu3 %v6018_v24 }
 0x2a6   :  { %v2215_v47 = vpop.f32.mrf.mxu2 }
 0x2a7   :  { %v2304_v11 = vpop.f32.mrf.mxu3  ;;  %v2039_v33 = vpop.f32.mrf.mxu0  ;;  %v2216_v42 = vadd.f32 %v2215_v47, %v2127_v45 }
 0x2a8   :  { %v2128_v5 = vpop.f32.mrf.mxu1  ;;  %v2040_v0 = vadd.f32 %v2039_v33, %v6019_v21 }
 0x2a9   :  { %v4560_v41 = vpop.eup %4559  ;;  %v2305_v60 = vadd.f32 %v2304_v11, %v2216_v42  ;;  %v6025_v42 = vld [vmem:[#allocation35_spill] sm:$0xff] }
 0x2aa   :  { %v3114_v43 = vpack.c.bf16 %v4560_v41, %v4558_v18  ;;  %v2129_v14 = vadd.f32 %v2128_v5, %v2040_v0  ;;  %v6024_v0 = vld [vmem:[#allocation34_spill] sm:$0xff] }
 0x2ab   :  { %4561 = vtanh.f32 %v2305_v60 }
 0x2ae   :  { %v2217_v63 = vpop.f32.mrf.mxu2 }
 0x2af   :  { %v2218_v25 = vadd.f32 %v2217_v63, %v2129_v14  ;;  %v2306_v8 = vpop.f32.mrf.mxu3  ;;  %v2318_v53 = vpop.f32.mrf.mxu0  ;;  %v6027_v14 = vld [vmem:[#allocation37_spill] sm:$0xff] }
 0x2b0   :  { %v2319_v62 = vadd.f32 %v2318_v53, %v5397_v13  ;;  %v2407_v55 = vpop.f32.mrf.mxu1 }
 0x2b1   :  { %v2307_v17 = vadd.f32 %v2306_v8, %v2218_v25  ;;  %v4562_v2 = vpop.eup %4561 }
 0x2b2   :  { %v2408_v10 = vadd.f32 %v2407_v55, %v2319_v62  ;;  %2357 = vmatmul.bf16.gmra.mxu0 %v6020_v20  ;;  %2446 = vmatmul.bf16.gmra.mxu1 %v6021_v22 }
 0x2b3   :  { %4563 = vtanh.f32 %v2307_v17  ;;  %2535 = vmatmul.bf16.gmra.mxu2 %v6022_v50 }
 0x2b4   :  { %2624 = vmatmul.bf16.gmra.mxu3 %v6023_v59 }
 0x2b6   :  { %v2496_v38 = vpop.f32.mrf.mxu2 }
 0x2b7   :  { %v2497_v52 = vadd.f32 %v2496_v38, %v2408_v10  ;;  %v2585_v32 = vpop.f32.mrf.mxu3  ;;  %v2320_v1 = vpop.f32.mrf.mxu0 }
 0x2b8   :  { %v2321_v4 = vadd.f32 %v2320_v1, %v5397_v13  ;;  %v2409_v36 = vpop.f32.mrf.mxu1  ;;  %v6029_v1 = vld [vmem:[#allocation39_spill] sm:$0xff] }
 0x2b9   :  { %v4564_v26 = vpop.eup %4563  ;;  %v5405_v19 = vadd.f32 %v2585_v32, %v2497_v52  ;;  %v6028_v32 = vld [vmem:[#allocation38_spill] sm:$0xff] }
 0x2ba   :  { %v2410_v51 = vadd.f32 %v2409_v36, %v2321_v4  ;;  %v3116_v24 = vpack.c.bf16 %v4564_v26, %v4562_v2  ;;  %v6030_v2 = vld [vmem:[#allocation40_spill] sm:$0xff]  ;;  %v6031_v4 = vld [vmem:[#allocation41_spill] sm:$0xff] }
 0x2bc   :  { %3157 = vmatpush.bf16.xpose.msra.mxu2 %v3116_v24 }
 0x2be   :  { %v2498_v47 = vpop.f32.mrf.mxu2 }
 0x2bf   :  { %v2499_v11 = vadd.f32 %v2498_v47, %v2410_v51  ;;  %v2587_v33 = vpop.f32.mrf.mxu3  ;;  %v2323_v18 = vpop.f32.mrf.mxu0  ;;  %v4490_v47 = vld [vmem:[#allocation6 + $0x3f4] sm:$0xf] }
 0x2c0   :  { %v2324_v45 = vadd.f32 %v2323_v18, %v5397_v13  ;;  %v2412_v5 = vpop.f32.mrf.mxu1 }
 0x2c1   :  { %v5408_v41 = vadd.f32 %v2587_v33, %v2499_v11  ;;  %v4232_v11 = vld [vmem:[#allocation6 + $0x3f8] sm:$0xf0] }
 0x2c2   :  { %v2413_v21 = vadd.f32 %v2412_v5, %v2324_v45  ;;  %2362 = vmatmul.bf16.gmra.mxu0 %v6024_v0  ;;  %2451 = vmatmul.bf16.gmra.mxu1 %v6025_v42  ;;  %v4235_v18 = vor.u32 %v4490_v47, %v4232_v11  ;;  %v4458_v45 = vld [vmem:[#allocation6 + $0x2f4] sm:$0xf]  ;;  %v4104_v5 = vld [vmem:[#allocation6 + $0x2f8] sm:$0xf0]  ;;  %v4096_v47 = vld [vmem:[#allocation6 + $0x2e8] sm:$0xf0] }
 0x2c3   :  { %2540 = vmatmul.bf16.gmra.mxu2 %v6026_v44 }
 0x2c4   :  { %2629 = vmatmul.bf16.gmra.mxu3 %v6027_v14  ;;  %3158 = vmatpush.bf16.xpose.msra.mxu2 %v3114_v43 }
 0x2c5   :  { %2932 = vmatpush.bf16.msrb.mxu3 %v4235_v18 }
 0x2c6   :  { %v2501_v60 = vpop.f32.mrf.mxu2 }
 0x2c7   :  { %v2502_v63 = vadd.f32 %v2501_v60, %v2413_v21  ;;  %v2590_v25 = vpop.f32.mrf.mxu3  ;;  %v2325_v8 = vpop.f32.mrf.mxu0  ;;  %v4107_v21 = vor.u32 %v4458_v45, %v4104_v5 }
 0x2c8   :  { %v2326_v53 = vadd.f32 %v2325_v8, %v5397_v13  ;;  %v2414_v62 = vpop.f32.mrf.mxu1  ;;  %v6034_v8 = vld [vmem:[#allocation44_spill] sm:$0xff] }
 0x2c9   :  { %v5415_v55 = vadd.f32 %v2590_v25, %v2502_v63  ;;  %2754 = vmatpush.bf16.msrb.mxu1 %v4107_v21  ;;  %v6032_v63 = vld [vmem:[#allocation42_spill] sm:$0xff]  ;;  %v6033_v25 = vld [vmem:[#allocation43_spill] sm:$0xff]  ;;  %v4091_v21 = vor.u32 %v4454_v28, %v4088_v40 }
 0x2ca   :  { %v2415_v17 = vadd.f32 %v2414_v62, %v2326_v53  ;;  %v4478_v28 = vld [vmem:[#allocation6 + $0x394] sm:$0xf] }
 0x2cc   :  { %3159 = vmatpush.bf16.xpose.msra.mxu2 %v3112_v31 }
 0x2ce   :  { %v2503_v10 = vpop.f32.mrf.mxu2 }
 0x2cf   :  { %v2504_v20 = vadd.f32 %v2503_v10, %v2415_v17  ;;  %v2592_v22 = vpop.f32.mrf.mxu3  ;;  %v2328_v50 = vpop.f32.mrf.mxu0 }
 0x2d0   :  { %v2329_v43 = vadd.f32 %v2328_v50, %v5397_v13  ;;  %v2417_v59 = vpop.f32.mrf.mxu1 }
 0x2d1   :  { %v5421_v38 = vadd.f32 %v2592_v22, %v2504_v20 }
 0x2d2   :  { %v2418_v52 = vadd.f32 %v2417_v59, %v2329_v43  ;;  %2367 = vmatmul.bf16.gmra.mxu0 %v6028_v32  ;;  %2456 = vmatmul.bf16.gmra.mxu1 %v6029_v1  ;;  %v6036_v1 = vld [vmem:[#allocation46_spill] sm:$0xff] }
 0x2d3   :  { %2545 = vmatmul.bf16.gmra.mxu2 %v6030_v2  ;;  %v6037_v2 = vld [vmem:[#allocation47_spill] sm:$0xff] }
 0x2d4   :  { %2634 = vmatmul.bf16.gmra.mxu3 %v6031_v4  ;;  %3160 = vmatpush.bf16.xpose.msra.mxu2 %v3110_v6  ;;  %v6038_v4 = vld [vmem:[#allocation48_spill] sm:$0xff] }
 0x2d6   :  { %v2506_v61 = vpop.f32.mrf.mxu2 }
 0x2d7   :  { %v2507_v34 = vadd.f32 %v2506_v61, %v2418_v52  ;;  %v2595_v31 = vpop.f32.mrf.mxu3  ;;  %v2330_v36 = vpop.f32.mrf.mxu0  ;;  %v6039_v61 = vld [vmem:[#allocation49_spill] sm:$0xff] }
 0x2d8   :  { %v2331_v26 = vadd.f32 %v2330_v36, %v5397_v13  ;;  %v2419_v51 = vpop.f32.mrf.mxu1 }
 0x2d9   :  { %v5431_v24 = vadd.f32 %v2595_v31, %v2507_v34  ;;  %v4456_v34 = vld [vmem:[#allocation6 + $0x2e4] sm:$0xf] }
 0x2da   :  { %v2420_v33 = vadd.f32 %v2419_v51, %v2331_v26  ;;  %v4099_v18 = vor.u32 %v4456_v34, %v4096_v47 }
 0x2dc   :  { %3161 = vmatpush.bf16.xpose.msra.mxu2 %v3108_v58  ;;  %2755 = vmatpush.bf16.msrb.mxu1 %v4099_v18  ;;  %v4446_v18 = vld [vmem:[#allocation6 + $0x294] sm:$0xf] }
 0x2de   :  { %v2508_v56 = vpop.f32.mrf.mxu2 }
 0x2df   :  { %v2509_v35 = vadd.f32 %v2508_v56, %v2420_v33  ;;  %v2597_v6 = vpop.f32.mrf.mxu3  ;;  %v2333_v0 = vpop.f32.mrf.mxu0  ;;  %v4216_v56 = vld [vmem:[#allocation6 + $0x3d8] sm:$0xf0] }
 0x2e0   :  { %v2334_v42 = vadd.f32 %v2333_v0, %v5397_v13  ;;  %v2422_v44 = vpop.f32.mrf.mxu1  ;;  %2756 = vmatpush.bf16.msrb.mxu1 %v4091_v21  ;;  %v4452_v0 = vld [vmem:[#allocation6 + $0x2c4] sm:$0xf] }
 0x2e1   :  { %v5437_v14 = vadd.f32 %v2597_v6, %v2509_v35 }
 0x2e2   :  { %v2423_v60 = vadd.f32 %v2422_v44, %v2334_v42  ;;  %2372 = vmatmul.bf16.gmra.mxu0 %v6032_v63  ;;  %2461 = vmatmul.bf16.gmra.mxu1 %v6033_v25  ;;  %v4080_v42 = vld [vmem:[#allocation6 + $0x2c8] sm:$0xf0]  ;;  %v4484_v44 = vld [vmem:[#allocation6 + $0x3c4] sm:$0xf] }
 0x2e3   :  { %2550 = vmatmul.bf16.gmra.mxu2 %v6034_v8  ;;  %v4083_v8 = vor.u32 %v4452_v0, %v4080_v42  ;;  %v4476_v0 = vld [vmem:[#allocation6 + $0x384] sm:$0xf] }
 0x2e4   :  { %2639 = vmatmul.bf16.gmra.mxu3 %v6035_v49  ;;  %3162 = vmatpush.bf16.xpose.msra.mxu2 %v3106_v30  ;;  %v4208_v49 = vld [vmem:[#allocation6 + $0x3c8] sm:$0xf0] }
 0x2e5   :  { %2757 = vmatpush.bf16.msrb.mxu1 %v4083_v8 }
 0x2e6   :  { %v2511_v46 = vpop.f32.mrf.mxu2 }
 0x2e7   :  { %v2512_v58 = vadd.f32 %v2511_v46, %v2423_v60  ;;  %v2600_v53 = vpop.f32.mrf.mxu3  ;;  %v2335_v62 = vpop.f32.mrf.mxu0 }
 0x2e8   :  { %v2336_v17 = vadd.f32 %v2335_v62, %v5397_v13  ;;  %v2424_v10 = vpop.f32.mrf.mxu1  ;;  %v4211_v62 = vor.u32 %v4484_v44, %v4208_v49 }
 0x2e9   :  { %v5447_v20 = vadd.f32 %v2600_v53, %v2512_v58 }
 0x2ea   :  { %v2425_v22 = vadd.f32 %v2424_v10, %v2336_v17  ;;  %v6040_v10 = vld [vmem:[#allocation50_spill] sm:$0xff] }
 0x2ec   :  { %3163 = vmatpush.bf16.xpose.msra.mxu2 %v3104_v3  ;;  %v4224_v3 = vld [vmem:[#allocation6 + $0x3e8] sm:$0xf0] }
 0x2ed   :  { %v4227_v51 = vor.u32 %v4488_v48, %v4224_v3 }
 0x2ee   :  { %v2513_v50 = vpop.f32.mrf.mxu2 }
 0x2ef   :  { %v2514_v43 = vadd.f32 %v2513_v50, %v2425_v22  ;;  %v2602_v59 = vpop.f32.mrf.mxu3  ;;  %v2338_v52 = vpop.f32.mrf.mxu0  ;;  %2933 = vmatpush.bf16.msrb.mxu3 %v4227_v51  ;;  %v4450_v22 = vld [vmem:[#allocation6 + $0x2b4] sm:$0xf]  ;;  %v4072_v50 = vld [vmem:[#allocation6 + $0x2b8] sm:$0xf0] }
 0x2f0   :  { %v2339_v9 = vadd.f32 %v2338_v52, %v5397_v13  ;;  %v2427_v16 = vpop.f32.mrf.mxu1  ;;  %v6042_v52 = vld [vmem:[#allocation52_spill] sm:$0xff] }
 0x2f1   :  { %v5453_v30 = vadd.f32 %v2602_v59, %v2514_v43  ;;  %v4482_v43 = vld [vmem:[#allocation6 + $0x3b4] sm:$0xf]  ;;  %v6041_v59 = vld [vmem:[#allocation51_spill] sm:$0xff] }
 0x2f2   :  { %v2428_v32 = vadd.f32 %v2427_v16, %v2339_v9  ;;  %2377 = vmatmul.bf16.gmra.mxu0 %v6036_v1  ;;  %2466 = vmatmul.bf16.gmra.mxu1 %v6037_v2  ;;  %v4075_v9 = vor.u32 %v4450_v22, %v4072_v50  ;;  %v4200_v16 = vld [vmem:[#allocation6 + $0x3b8] sm:$0xf0]  ;;  %v6046_v22 = vld [vmem:[#allocation56_spill] sm:$0xff]  ;;  %v6047_v50 = vld [vmem:[#allocation57_spill] sm:$0xff] }
 0x2f3   :  { %2555 = vmatmul.bf16.gmra.mxu2 %v6038_v4  ;;  %v4203_v1 = vor.u32 %v4482_v43, %v4200_v16  ;;  %v4448_v4 = vld [vmem:[#allocation6 + $0x2a4] sm:$0xf] }
 0x2f4   :  { %2644 = vmatmul.bf16.gmra.mxu3 %v6039_v61  ;;  %3164 = vmatpush.bf16.xpose.msra.mxu2 %v3102_v54  ;;  %v4486_v54 = vld [vmem:[#allocation6 + $0x3d4] sm:$0xf]  ;;  %v4064_v61 = vld [vmem:[#allocation6 + $0x2a8] sm:$0xf0] }
 0x2f5   :  { %v4219_v35 = vor.u32 %v4486_v54, %v4216_v56  ;;  %2758 = vmatpush.bf16.msrb.mxu1 %v4075_v9  ;;  %v4184_v54 = vld [vmem:[#allocation6 + $0x398] sm:$0xf0] }
 0x2f6   :  { %v2516_v27 = vpop.f32.mrf.mxu2  ;;  %v4187_v21 = vor.u32 %v4478_v28, %v4184_v54 }
 0x2f7   :  { %v2517_v31 = vadd.f32 %v2516_v27, %v2428_v32  ;;  %v2605_v36 = vpop.f32.mrf.mxu3  ;;  %v2340_v26 = vpop.f32.mrf.mxu0  ;;  %2934 = vmatpush.bf16.msrb.mxu3 %v4219_v35  ;;  %v6043_v32 = vld [vmem:[#allocation53_spill] sm:$0xff]  ;;  %v4480_v27 = vld [vmem:[#allocation6 + $0x3a4] sm:$0xf] }
 0x2f8   :  { %v2341_v11 = vadd.f32 %v2340_v26, %v5397_v13  ;;  %v2429_v33 = vpop.f32.mrf.mxu1  ;;  %v4444_v35 = vld [vmem:[#allocation6 + $0x284] sm:$0xf] }
 0x2f9   :  { %v5463_v45 = vadd.f32 %v2605_v36, %v2517_v31  ;;  %v4067_v31 = vor.u32 %v4448_v4, %v4064_v61  ;;  %v4192_v36 = vld [vmem:[#allocation6 + $0x3a8] sm:$0xf0] }
 0x2fa   :  { %v2430_v5 = vadd.f32 %v2429_v33, %v2341_v11  ;;  %v4195_v11 = vor.u32 %v4480_v27, %v4192_v36 }
 0x2fb   :  { %2935 = vmatpush.bf16.msrb.mxu3 %v4211_v62  ;;  %2759 = vmatpush.bf16.msrb.mxu1 %v4067_v31 }
 0x2fe   :  { %v2518_v6 = vpop.f32.mrf.mxu2 }
 0x2ff   :  { %v2519_v60 = vadd.f32 %v2518_v6, %v2430_v5  ;;  %v2607_v63 = vpop.f32.mrf.mxu3  ;;  %v2343_v25 = vpop.f32.mrf.mxu0  ;;  %2936 = vmatpush.bf16.msrb.mxu3 %v4203_v1  ;;  %v4056_v5 = vld [vmem:[#allocation6 + $0x298] sm:$0xf0]  ;;  %v4048_v6 = vld [vmem:[#allocation6 + $0x288] sm:$0xf0] }
 0x300   :  { %v2344_v46 = vadd.f32 %v2343_v25, %v5397_v13  ;;  %v2432_v58 = vpop.f32.mrf.mxu1  ;;  %v4059_v40 = vor.u32 %v4446_v18, %v4056_v5  ;;  %v4176_v25 = vld [vmem:[#allocation6 + $0x388] sm:$0xf0] }
 0x301   :  { %v5466_v53 = vadd.f32 %v2607_v63, %v2519_v60  ;;  %v4051_v63 = vor.u32 %v4444_v35, %v4048_v6 }
 0x302   :  { %v2433_v17 = vadd.f32 %v2432_v58, %v2344_v46  ;;  %2382 = vmatmul.bf16.gmra.mxu0 %v6040_v10  ;;  %2471 = vmatmul.bf16.gmra.mxu1 %v6041_v59  ;;  %v4179_v58 = vor.u32 %v4476_v0, %v4176_v25  ;;  %v6045_v10 = vld [vmem:[#allocation55_spill] sm:$0xff] }
 0x303   :  { %2560 = vmatmul.bf16.gmra.mxu2 %v6042_v52  ;;  %2937 = vmatpush.bf16.msrb.mxu3 %v4195_v11  ;;  %v6050_v11 = vld [vmem:[#allocation60_spill] sm:$0xff] }
 0x304   :  { %2649 = vmatmul.bf16.gmra.mxu3 %v6043_v32  ;;  %2760 = vmatpush.bf16.msrb.mxu1 %v4059_v40 }
 0x306   :  { %v2521_v2 = vpop.f32.mrf.mxu2 }
 0x307   :  { %v2522_v48 = vadd.f32 %v2521_v2, %v2433_v17  ;;  %v2610_v3 = vpop.f32.mrf.mxu3  ;;  %v2345_v34 = vpop.f32.mrf.mxu0  ;;  %2938 = vmatpush.bf16.msrb.mxu3 %v4187_v21  ;;  %v6044_v17 = vld [vmem:[#allocation54_spill] sm:$0xff] }
 0x308   :  { %v2346_v26 = vadd.f32 %v2345_v34, %v5397_v13  ;;  %v2434_v51 = vpop.f32.mrf.mxu1  ;;  %2761 = vmatpush.bf16.msrb.mxu1 %v4051_v63 }
 0x309   :  { %v5473_v47 = vadd.f32 %v2610_v3, %v2522_v48 }
 0x30a   :  { %v2435_v33 = vadd.f32 %v2434_v51, %v2346_v26  ;;  %v6048_v26 = vld [vmem:[#allocation58_spill] sm:$0xff]  ;;  %v6049_v51 = vld [vmem:[#allocation59_spill] sm:$0xff] }
 0x30b   :  { %2939 = vmatpush.bf16.msrb.mxu3 %v4179_v58  ;;  %v6053_v58 = vld [vmem:[#allocation63_spill] sm:$0xff] }
 0x30e   :  { %v2523_v56 = vpop.f32.mrf.mxu2 }
 0x30f   :  { %v2524_v42 = vadd.f32 %v2523_v56, %v2435_v33  ;;  %v2612_v44 = vpop.f32.mrf.mxu3  ;;  %v2348_v60 = vpop.f32.mrf.mxu0  ;;  %v6051_v33 = vld [vmem:[#allocation61_spill] sm:$0xff] }
 0x310   :  { %v2349_v8 = vadd.f32 %v2348_v60, %v5397_v13  ;;  %v2437_v49 = vpop.f32.mrf.mxu1 }
 0x311   :  { %v5476_v46 = vadd.f32 %v2612_v44, %v2524_v42 }
 0x312   :  { %v2438_v62 = vadd.f32 %v2437_v49, %v2349_v8  ;;  %2387 = vmatmul.bf16.gmra.mxu0 %v6044_v17  ;;  %2476 = vmatmul.bf16.gmra.mxu1 %v6045_v10  ;;  %v6052_v49 = vld [vmem:[#allocation62_spill] sm:$0xff]  ;;  %v6055_v17 = vld [vmem:[#allocation65_spill] sm:$0xff] }
 0x313   :  { %2565 = vmatmul.bf16.gmra.mxu2 %v6046_v22 }
 0x314   :  { %2654 = vmatmul.bf16.gmra.mxu3 %v6047_v50 }
 0x316   :  { %v2526_v43 = vpop.f32.mrf.mxu2 }
 0x317   :  { %v2527_v59 = vadd.f32 %v2526_v43, %v2438_v62  ;;  %v2615_v52 = vpop.f32.mrf.mxu3  ;;  %v2350_v9 = vpop.f32.mrf.mxu0  ;;  %v6054_v62 = vld [vmem:[#allocation64_spill] sm:$0xff] }
 0x318   :  { %v2351_v16 = vadd.f32 %v2350_v9, %v5397_v13  ;;  %v2439_v32 = vpop.f32.mrf.mxu1 }
 0x319   :  { %v5483_v1 = vadd.f32 %v2615_v52, %v2527_v59 }
 0x31a   :  { %v2440_v2 = vadd.f32 %v2439_v32, %v2351_v16 }
 0x31e   :  { %v2528_v4 = vpop.f32.mrf.mxu2 }
 0x31f   :  { %v2529_v61 = vadd.f32 %v2528_v4, %v2440_v2  ;;  %v2617_v27 = vpop.f32.mrf.mxu3  ;;  %v2353_v48 = vpop.f32.mrf.mxu0 }
 0x320   :  { %v2354_v3 = vadd.f32 %v2353_v48, %v5397_v13  ;;  %v2442_v34 = vpop.f32.mrf.mxu1 }
 0x321   :  { %v5486_v31 = vadd.f32 %v2617_v27, %v2529_v61 }
 0x322   :  { %v2443_v36 = vadd.f32 %v2442_v34, %v2354_v3  ;;  %2392 = vmatmul.bf16.gmra.mxu0 %v6048_v26  ;;  %2481 = vmatmul.bf16.gmra.mxu1 %v6049_v51  ;;  %v6057_v26 = vld [vmem:[#allocation67_spill] sm:$0xff]  ;;  %v6058_v51 = vld [vmem:[#allocation68_spill] sm:$0xff] }
 0x323   :  { %2570 = vmatmul.bf16.gmra.mxu2 %v6050_v11  ;;  %v6059_v11 = vld [vmem:[#allocation69_spill] sm:$0xff] }
 0x324   :  { %2659 = vmatmul.bf16.gmra.mxu3 %v6051_v33 }
 0x326   :  { %v2531_v18 = vpop.f32.mrf.mxu2 }
 0x327   :  { %v2532_v5 = vadd.f32 %v2531_v18, %v2443_v36  ;;  %v2620_v28 = vpop.f32.mrf.mxu3  ;;  %v2355_v40 = vpop.f32.mrf.mxu0  ;;  %v6056_v36 = vld [vmem:[#allocation66_spill] sm:$0xff] }
 0x328   :  { %v2356_v54 = vadd.f32 %v2355_v40, %v5397_v13  ;;  %v2444_v21 = vpop.f32.mrf.mxu1 }
 0x329   :  { %v5493_v56 = vadd.f32 %v2620_v28, %v2532_v5 }
 0x32a   :  { %v2445_v35 = vadd.f32 %v2444_v21, %v2356_v54 }
 0x32e   :  { %v2533_v6 = vpop.f32.mrf.mxu2 }
 0x32f   :  { %v2534_v0 = vadd.f32 %v2533_v6, %v2445_v35  ;;  %v2622_v42 = vpop.f32.mrf.mxu3  ;;  %v2358_v44 = vpop.f32.mrf.mxu0 }
 0x330   :  { %v2359_v60 = vadd.f32 %v2358_v44, %v5397_v13  ;;  %v2447_v63 = vpop.f32.mrf.mxu1 }
 0x331   :  { %v5496_v25 = vadd.f32 %v2622_v42, %v2534_v0 }
 0x332   :  { %v2448_v8 = vadd.f32 %v2447_v63, %v2359_v60  ;;  %2673 = vmatmul.bf16.vlgmr.msrb.gmra.mxu0 %v6052_v49  ;;  %2762 = vmatmul.bf16.vlgmr.msrb.gmra.mxu1 %v6053_v58  ;;  %v6060_v58 = vld [vmem:[#allocation70_spill] sm:$0xff] }
 0x333   :  { %2851 = vmatmul.bf16.vlgmr.msrb.gmra.mxu2 %v6054_v62  ;;  %v6061_v62 = vld [vmem:[#allocation71_spill] sm:$0xff] }
 0x334   :  { %2940 = vmatmul.bf16.vlgmr.msrb.gmra.mxu3 %v6055_v17  ;;  %v6062_v17 = vld [vmem:[#allocation72_spill] sm:$0xff] }
 0x336   :  { %v2536_v10 = vpop.f32.mrf.mxu2 }
 0x337   :  { %v2537_v22 = vadd.f32 %v2536_v10, %v2448_v8  ;;  %v2625_v50 = vpop.f32.mrf.mxu3  ;;  %v2360_v43 = vpop.f32.mrf.mxu0  ;;  %v6063_v10 = vld [vmem:[#allocation73_spill] sm:$0xff] }
 0x338   :  { %v2361_v59 = vadd.f32 %v2360_v43, %v5397_v13  ;;  %v2449_v52 = vpop.f32.mrf.mxu1 }
 0x339   :  { %v5503_v9 = vadd.f32 %v2625_v50, %v2537_v22 }
 0x33a   :  { %v2450_v16 = vadd.f32 %v2449_v52, %v2361_v59 }
 0x33e   :  { %v2538_v32 = vpop.f32.mrf.mxu2 }
 0x33f   :  { %v2539_v2 = vadd.f32 %v2538_v32, %v2450_v16  ;;  %v2627_v4 = vpop.f32.mrf.mxu3  ;;  %v2363_v61 = vpop.f32.mrf.mxu0 }
 0x340   :  { %v2364_v27 = vadd.f32 %v2363_v61, %v5397_v13  ;;  %v2452_v48 = vpop.f32.mrf.mxu1 }
 0x341   :  { %v5506_v3 = vadd.f32 %v2627_v4, %v2539_v2 }
 0x342   :  { %v2453_v34 = vadd.f32 %v2452_v48, %v2364_v27  ;;  %2678 = vmatmul.bf16.gmra.mxu0 %v6056_v36  ;;  %2767 = vmatmul.bf16.gmra.mxu1 %v6057_v26 }
 0x343   :  { %2856 = vmatmul.bf16.gmra.mxu2 %v6058_v51 }
 0x344   :  { %2945 = vmatmul.bf16.gmra.mxu3 %v6059_v11  ;;  %v6064_v11 = vld [vmem:[#allocation74_spill] sm:$0xff] }
 0x346   :  { %v2541_v33 = vpop.f32.mrf.mxu2 }
 0x347   :  { %v2542_v18 = vadd.f32 %v2541_v33, %v2453_v34  ;;  %v2630_v5 = vpop.f32.mrf.mxu3  ;;  %v2365_v28 = vpop.f32.mrf.mxu0  ;;  %v6065_v33 = vld [vmem:[#allocation75_spill] sm:$0xff] }
 0x348   :  { %v2366_v40 = vadd.f32 %v2365_v28, %v5397_v13  ;;  %v2454_v54 = vpop.f32.mrf.mxu1 }
 0x349   :  { %v5513_v21 = vadd.f32 %v2630_v5, %v2542_v18  ;;  %v6066_v18 = vld [vmem:[#allocation76_spill] sm:$0xff]  ;;  %v6067_v5 = vld [vmem:[#allocation77_spill] sm:$0xff] }
 0x34a   :  { %v2455_v35 = vadd.f32 %v2454_v54, %v2366_v40 }
 0x34e   :  { %v2543_v6 = vpop.f32.mrf.mxu2 }
 0x34f   :  { %v2544_v0 = vadd.f32 %v2543_v6, %v2455_v35  ;;  %v2632_v42 = vpop.f32.mrf.mxu3  ;;  %v2368_v44 = vpop.f32.mrf.mxu0 }
 0x350   :  { %v2369_v60 = vadd.f32 %v2368_v44, %v5397_v13  ;;  %v2457_v63 = vpop.f32.mrf.mxu1 }
 0x351   :  { %v5516_v8 = vadd.f32 %v2632_v42, %v2544_v0 }
 0x352   :  { %v2458_v49 = vadd.f32 %v2457_v63, %v2369_v60  ;;  %2683 = vmatmul.bf16.gmra.mxu0 %v6060_v58  ;;  %2772 = vmatmul.bf16.gmra.mxu1 %v6061_v62 }
 0x353   :  { %2861 = vmatmul.bf16.gmra.mxu2 %v6062_v17 }
 0x354   :  { %2950 = vmatmul.bf16.gmra.mxu3 %v6063_v10 }
 0x356   :  { %v2546_v22 = vpop.f32.mrf.mxu2 }
 0x357   :  { %v2547_v50 = vadd.f32 %v2546_v22, %v2458_v49  ;;  %v2635_v43 = vpop.f32.mrf.mxu3  ;;  %v2370_v59 = vpop.f32.mrf.mxu0 }
 0x358   :  { %v2371_v52 = vadd.f32 %v2370_v59, %v5397_v13  ;;  %v2459_v16 = vpop.f32.mrf.mxu1  ;;  %v6070_v59 = vld [vmem:[#allocation80_spill] sm:$0xff] }
 0x359   :  { %v5523_v32 = vadd.f32 %v2635_v43, %v2547_v50  ;;  %v6068_v50 = vld [vmem:[#allocation78_spill] sm:$0xff]  ;;  %v6069_v43 = vld [vmem:[#allocation79_spill] sm:$0xff] }
 0x35a   :  { %v2460_v2 = vadd.f32 %v2459_v16, %v2371_v52  ;;  %v6071_v52 = vld [vmem:[#allocation81_spill] sm:$0xff] }
 0x35e   :  { %v2548_v4 = vpop.f32.mrf.mxu2 }
 0x35f   :  { %v2549_v61 = vadd.f32 %v2548_v4, %v2460_v2  ;;  %v2637_v27 = vpop.f32.mrf.mxu3  ;;  %v2373_v48 = vpop.f32.mrf.mxu0 }
 0x360   :  { %v2374_v34 = vadd.f32 %v2373_v48, %v5397_v13  ;;  %v2462_v36 = vpop.f32.mrf.mxu1 }
 0x361   :  { %v5526_v26 = vadd.f32 %v2637_v27, %v2549_v61 }
 0x362   :  { %v2463_v51 = vadd.f32 %v2462_v36, %v2374_v34  ;;  %2688 = vmatmul.bf16.gmra.mxu0 %v6064_v11  ;;  %2777 = vmatmul.bf16.gmra.mxu1 %v6065_v33 }
 0x363   :  { %2866 = vmatmul.bf16.gmra.mxu2 %v6066_v18 }
 0x364   :  { %2955 = vmatmul.bf16.gmra.mxu3 %v6067_v5 }
 0x366   :  { %v2551_v28 = vpop.f32.mrf.mxu2 }
 0x367   :  { %v2552_v40 = vadd.f32 %v2551_v28, %v2463_v51  ;;  %v2640_v54 = vpop.f32.mrf.mxu3  ;;  %v2375_v35 = vpop.f32.mrf.mxu0 }
 0x368   :  { %v2376_v6 = vadd.f32 %v2375_v35, %v5397_v13  ;;  %v2464_v0 = vpop.f32.mrf.mxu1  ;;  %v6072_v35 = vld [vmem:[#allocation84_spill] sm:$0xff] }
 0x369   :  { %v5533_v42 = vadd.f32 %v2640_v54, %v2552_v40 }
 0x36a   :  { %v2465_v44 = vadd.f32 %v2464_v0, %v2376_v6  ;;  %v6073_v6 = vld [vmem:[#allocation85_spill] sm:$0xff]  ;;  %v6074_v0 = vld [vmem:[#allocation86_spill] sm:$0xff] }
 0x36e   :  { %v2553_v60 = vpop.f32.mrf.mxu2 }
 0x36f   :  { %v2554_v63 = vadd.f32 %v2553_v60, %v2465_v44  ;;  %v2642_v49 = vpop.f32.mrf.mxu3  ;;  %v2378_v58 = vpop.f32.mrf.mxu0  ;;  %v6075_v44 = vld [vmem:[#allocation87_spill] sm:$0xff] }
 0x370   :  { %v2379_v62 = vadd.f32 %v2378_v58, %v5397_v13  ;;  %v2467_v17 = vpop.f32.mrf.mxu1 }
 0x371   :  { %v5536_v10 = vadd.f32 %v2642_v49, %v2554_v63 }
 0x372   :  { %v2468_v22 = vadd.f32 %v2467_v17, %v2379_v62  ;;  %2693 = vmatmul.bf16.gmra.mxu0 %v6068_v50  ;;  %2782 = vmatmul.bf16.gmra.mxu1 %v6069_v43 }
 0x373   :  { %2871 = vmatmul.bf16.gmra.mxu2 %v6070_v59 }
 0x374   :  { %2960 = vmatmul.bf16.gmra.mxu3 %v6071_v52 }
 0x376   :  { %v2556_v16 = vpop.f32.mrf.mxu2 }
 0x377   :  { %v2557_v2 = vadd.f32 %v2556_v16, %v2468_v22  ;;  %v2645_v4 = vpop.f32.mrf.mxu3  ;;  %v2380_v61 = vpop.f32.mrf.mxu0 }
 0x378   :  { %v2381_v27 = vadd.f32 %v2380_v61, %v5397_v13  ;;  %v2469_v48 = vpop.f32.mrf.mxu1 }
 0x379   :  { %v5543_v34 = vadd.f32 %v2645_v4, %v2557_v2 }
 0x37a   :  { %v2470_v36 = vadd.f32 %v2469_v48, %v2381_v27  ;;  %v6076_v48 = vld [vmem:[#allocation90_spill] sm:$0xff] }
 0x37e   :  { %v2558_v51 = vpop.f32.mrf.mxu2 }
 0x37f   :  { %v2559_v11 = vadd.f32 %v2558_v51, %v2470_v36  ;;  %v2647_v33 = vpop.f32.mrf.mxu3  ;;  %v2383_v18 = vpop.f32.mrf.mxu0  ;;  %v6077_v36 = vld [vmem:[#allocation91_spill] sm:$0xff]  ;;  %v6078_v51 = vld [vmem:[#allocation92_spill] sm:$0xff] }
 0x380   :  { %v2384_v5 = vadd.f32 %v2383_v18, %v5397_v13  ;;  %v2472_v28 = vpop.f32.mrf.mxu1 }
 0x381   :  { %v5546_v40 = vadd.f32 %v2647_v33, %v2559_v11  ;;  %v6079_v11 = vld [vmem:[#allocation93_spill] sm:$0xff] }
 0x382   :  { %v2473_v54 = vadd.f32 %v2472_v28, %v2384_v5  ;;  %2698 = vmatmul.bf16.gmra.mxu0 %v6072_v35  ;;  %2787 = vmatmul.bf16.gmra.mxu1 %v6073_v6 }
 0x383   :  { %2876 = vmatmul.bf16.gmra.mxu2 %v6074_v0 }
 0x384   :  { %2965 = vmatmul.bf16.gmra.mxu3 %v6075_v44 }
 0x386   :  { %v2561_v60 = vpop.f32.mrf.mxu2 }
 0x387   :  { %v2562_v63 = vadd.f32 %v2561_v60, %v2473_v54  ;;  %v2650_v49 = vpop.f32.mrf.mxu3  ;;  %v2385_v58 = vpop.f32.mrf.mxu0 }
 0x388   :  { %v2386_v62 = vadd.f32 %v2385_v58, %v5397_v13  ;;  %v2474_v17 = vpop.f32.mrf.mxu1 }
 0x389   :  { %v5553_v22 = vadd.f32 %v2650_v49, %v2562_v63 }
 0x38a   :  { %v2475_v50 = vadd.f32 %v2474_v17, %v2386_v62 }
 0x38e   :  { %v2563_v43 = vpop.f32.mrf.mxu2 }
 0x38f   :  { %v2564_v59 = vadd.f32 %v2563_v43, %v2475_v50  ;;  %v2652_v52 = vpop.f32.mrf.mxu3  ;;  %v2388_v16 = vpop.f32.mrf.mxu0  ;;  %v6080_v43 = vld [vmem:[#allocation96_spill] sm:$0xff] }
 0x390   :  { %v2389_v2 = vadd.f32 %v2388_v16, %v5397_v13  ;;  %v2477_v4 = vpop.f32.mrf.mxu1  ;;  %v6083_v16 = vld [vmem:[#allocation99_spill] sm:$0xff] }
 0x391   :  { %v5556_v61 = vadd.f32 %v2652_v52, %v2564_v59  ;;  %v6081_v59 = vld [vmem:[#allocation97_spill] sm:$0xff]  ;;  %v6082_v52 = vld [vmem:[#allocation98_spill] sm:$0xff] }
 0x392   :  { %v2478_v27 = vadd.f32 %v2477_v4, %v2389_v2  ;;  %2703 = vmatmul.bf16.gmra.mxu0 %v6076_v48  ;;  %2792 = vmatmul.bf16.gmra.mxu1 %v6077_v36 }
 0x393   :  { %2881 = vmatmul.bf16.gmra.mxu2 %v6078_v51 }
 0x394   :  { %2970 = vmatmul.bf16.gmra.mxu3 %v6079_v11 }
 0x396   :  { %v2566_v33 = vpop.f32.mrf.mxu2 }
 0x397   :  { %v2567_v18 = vadd.f32 %v2566_v33, %v2478_v27  ;;  %v2655_v5 = vpop.f32.mrf.mxu3  ;;  %v2390_v28 = vpop.f32.mrf.mxu0 }
 0x398   :  { %v2391_v54 = vadd.f32 %v2390_v28, %v5397_v13  ;;  %v2479_v35 = vpop.f32.mrf.mxu1 }
 0x399   :  { %v5563_v6 = vadd.f32 %v2655_v5, %v2567_v18 }
 0x39a   :  { %v2480_v0 = vadd.f32 %v2479_v35, %v2391_v54 }
 0x39e   :  { %v2568_v44 = vpop.f32.mrf.mxu2 }
 0x39f   :  { %v2569_v60 = vadd.f32 %v2568_v44, %v2480_v0  ;;  %v2657_v63 = vpop.f32.mrf.mxu3  ;;  %v2393_v49 = vpop.f32.mrf.mxu0 }
 0x3a0   :  { %v2394_v58 = vadd.f32 %v2393_v49, %v5397_v13  ;;  %v2482_v62 = vpop.f32.mrf.mxu1  ;;  %v6085_v49 = vld [vmem:[#allocation103_spill] sm:$0xff] }
 0x3a1   :  { %v5566_v17 = vadd.f32 %v2657_v63, %v2569_v60  ;;  %v6084_v63 = vld [vmem:[#allocation102_spill] sm:$0xff] }
 0x3a2   :  { %v2483_v50 = vadd.f32 %v2482_v62, %v2394_v58  ;;  %2708 = vmatmul.bf16.gmra.mxu0 %v6080_v43  ;;  %2797 = vmatmul.bf16.gmra.mxu1 %v6081_v59  ;;  %v6086_v58 = vld [vmem:[#allocation104_spill] sm:$0xff] }
 0x3a3   :  { %2886 = vmatmul.bf16.gmra.mxu2 %v6082_v52 }
 0x3a4   :  { %2975 = vmatmul.bf16.gmra.mxu3 %v6083_v16 }
 0x3a6   :  { %v2571_v2 = vpop.f32.mrf.mxu2 }
 0x3a7   :  { %v2572_v4 = vadd.f32 %v2571_v2, %v2483_v50  ;;  %v2660_v27 = vpop.f32.mrf.mxu3  ;;  %v2395_v48 = vpop.f32.mrf.mxu0 }
 0x3a8   :  { %v2396_v36 = vadd.f32 %v2395_v48, %v5397_v13  ;;  %v2484_v51 = vpop.f32.mrf.mxu1  ;;  %v6087_v13 = vld [vmem:[#allocation105_spill] sm:$0xff] }
 0x3a9   :  { %v5573_v11 = vadd.f32 %v2660_v27, %v2572_v4 }
 0x3aa   :  { %v2485_v33 = vadd.f32 %v2484_v51, %v2396_v36 }
 0x3ae   :  { %v2573_v18 = vpop.f32.mrf.mxu2 }
 0x3af   :  { %v2574_v5 = vadd.f32 %v2573_v18, %v2485_v33  ;;  %v2662_v28 = vpop.f32.mrf.mxu3  ;;  %v2674_v54 = vpop.f32.mrf.mxu0 }
 0x3b0   :  { %v2675_v35 = vadd.f32 %v2674_v54, %v5405_v19  ;;  %v2763_v0 = vpop.f32.mrf.mxu1  ;;  %v6089_v54 = vld [vmem:[#allocation108_spill] sm:$0xff] }
 0x3b1   :  { %v5576_v44 = vadd.f32 %v2662_v28, %v2574_v5  ;;  %v6088_v28 = vld [vmem:[#allocation107_spill] sm:$0xff] }
 0x3b2   :  { %v2764_v60 = vadd.f32 %v2763_v0, %v2675_v35  ;;  %2713 = vmatmul.bf16.gmra.mxu0 %v6084_v63  ;;  %2802 = vmatmul.bf16.gmra.mxu1 %v6085_v49  ;;  %v6090_v35 = vld [vmem:[#allocation109_spill] sm:$0xff] }
 0x3b3   :  { %2891 = vmatmul.bf16.gmra.mxu2 %v6086_v58 }
 0x3b4   :  { %2980 = vmatmul.bf16.gmra.mxu3 %v6087_v13 }
 0x3b6   :  { %v2852_v62 = vpop.f32.mrf.mxu2 }
 0x3b7   :  { %v2853_v50 = vadd.f32 %v2852_v62, %v2764_v60  ;;  %v2941_v43 = vpop.f32.mrf.mxu3  ;;  %v2676_v59 = vpop.f32.mrf.mxu0 }
 0x3b8   :  { %v2677_v52 = vadd.f32 %v2676_v59, %v5408_v41  ;;  %v2765_v16 = vpop.f32.mrf.mxu1  ;;  %v6091_v41 = vld [vmem:[#allocation110_spill] sm:$0xff] }
 0x3b9   :  { %v2942_v19 = vadd.f32 %v2941_v43, %v2853_v50 }
 0x3ba   :  { %v2766_v2 = vadd.f32 %v2765_v16, %v2677_v52 }
 0x3bb   :  { %4565 = vtanh.f32 %v2942_v19 }
 0x3be   :  { %v2854_v4 = vpop.f32.mrf.mxu2 }
 0x3bf   :  { %v2855_v27 = vadd.f32 %v2854_v4, %v2766_v2  ;;  %v2943_v48 = vpop.f32.mrf.mxu3  ;;  %v2679_v36 = vpop.f32.mrf.mxu0 }
 0x3c0   :  { %v2680_v51 = vadd.f32 %v2679_v36, %v5415_v55  ;;  %v2768_v33 = vpop.f32.mrf.mxu1 }
 0x3c1   :  { %v2944_v18 = vadd.f32 %v2943_v48, %v2855_v27  ;;  %v5588_v58 = vpop.eup %4565 }
 0x3c2   :  { %v2769_v5 = vadd.f32 %v2768_v33, %v2680_v51  ;;  %2718 = vmatmul.bf16.gmra.mxu0 %v6088_v28  ;;  %2807 = vmatmul.bf16.gmra.mxu1 %v6089_v54  ;;  %v6092_v51 = vld [vmem:[#allocation113_spill] sm:$0xff]  ;;  %v6094_v33 = vld [vmem:[#allocation115_spill] sm:$0xff] }
 0x3c3   :  { %4567 = vtanh.f32 %v2944_v18  ;;  %2896 = vmatmul.bf16.gmra.mxu2 %v6090_v35  ;;  %v6095_v18 = vld [vmem:[#allocation116_spill] sm:$0xff] }
 0x3c4   :  { %2985 = vmatmul.bf16.gmra.mxu3 %v6091_v41 }
 0x3c6   :  { %v2857_v0 = vpop.f32.mrf.mxu2 }
 0x3c7   :  { %v2858_v60 = vadd.f32 %v2857_v0, %v2769_v5  ;;  %v2946_v63 = vpop.f32.mrf.mxu3  ;;  %v2681_v49 = vpop.f32.mrf.mxu0 }
 0x3c8   :  { %v2682_v55 = vadd.f32 %v2681_v49, %v5421_v38  ;;  %v2770_v13 = vpop.f32.mrf.mxu1  ;;  %v6093_v38 = vld [vmem:[#allocation114_spill] sm:$0xff] }
 0x3c9   :  { %v5591_v62 = vpop.eup %4567  ;;  %v2947_v50 = vadd.f32 %v2946_v63, %v2858_v60 }
 0x3ca   :  { %v2771_v43 = vadd.f32 %v2770_v13, %v2682_v55  ;;  %v3087_v59 = vpack.c.bf16 %v5591_v62, %v5588_v58 }
 0x3cb   :  { %4569 = vtanh.f32 %v2947_v50 }
 0x3ce   :  { %v2859_v52 = vpop.f32.mrf.mxu2 }
 0x3cf   :  { %v2860_v16 = vadd.f32 %v2859_v52, %v2771_v43  ;;  %v2948_v19 = vpop.f32.mrf.mxu3  ;;  %v2684_v2 = vpop.f32.mrf.mxu0 }
 0x3d0   :  { %v2685_v4 = vadd.f32 %v2684_v2, %v5431_v24  ;;  %v2773_v27 = vpop.f32.mrf.mxu1 }
 0x3d1   :  { %v2949_v48 = vadd.f32 %v2948_v19, %v2860_v16  ;;  %v5600_v41 = vpop.eup %4569 }
 0x3d2   :  { %v2774_v36 = vadd.f32 %v2773_v27, %v2685_v4  ;;  %2723 = vmatmul.bf16.gmra.mxu0 %v6092_v51  ;;  %2812 = vmatmul.bf16.gmra.mxu1 %v6093_v38  ;;  %v6096_v27 = vld [vmem:[#allocation119_spill] sm:$0xff] }
 0x3d3   :  { %4571 = vtanh.f32 %v2949_v48  ;;  %2901 = vmatmul.bf16.gmra.mxu2 %v6094_v33  ;;  %v6098_v48 = vld [vmem:[#allocation121_spill] sm:$0xff] }
 0x3d4   :  { %2990 = vmatmul.bf16.gmra.mxu3 %v6095_v18 }
 0x3d6   :  { %v2862_v5 = vpop.f32.mrf.mxu2 }
 0x3d7   :  { %v2863_v28 = vadd.f32 %v2862_v5, %v2774_v36  ;;  %v2951_v54 = vpop.f32.mrf.mxu3  ;;  %v2686_v35 = vpop.f32.mrf.mxu0  ;;  %v6099_v36 = vld [vmem:[#allocation122_spill] sm:$0xff] }
 0x3d8   :  { %v2687_v24 = vadd.f32 %v2686_v35, %v5437_v14  ;;  %v2775_v0 = vpop.f32.mrf.mxu1  ;;  %v6097_v14 = vld [vmem:[#allocation120_spill] sm:$0xff] }
 0x3d9   :  { %v5603_v60 = vpop.eup %4571  ;;  %v2952_v63 = vadd.f32 %v2951_v54, %v2863_v28 }
 0x3da   :  { %v2776_v49 = vadd.f32 %v2775_v0, %v2687_v24  ;;  %v3089_v55 = vpack.c.bf16 %v5603_v60, %v5600_v41 }
 0x3db   :  { %4573 = vtanh.f32 %v2952_v63 }
 0x3de   :  { %v2864_v13 = vpop.f32.mrf.mxu2 }
 0x3df   :  { %v2865_v50 = vadd.f32 %v2864_v13, %v2776_v49  ;;  %v2953_v43 = vpop.f32.mrf.mxu3  ;;  %v2689_v52 = vpop.f32.mrf.mxu0 }
 0x3e0   :  { %v2690_v16 = vadd.f32 %v2689_v52, %v5447_v20  ;;  %v2778_v19 = vpop.f32.mrf.mxu1 }
 0x3e1   :  { %v2954_v2 = vadd.f32 %v2953_v43, %v2865_v50  ;;  %v5612_v5 = vpop.eup %4573 }
 0x3e2   :  { %v2779_v4 = vadd.f32 %v2778_v19, %v2690_v16  ;;  %2728 = vmatmul.bf16.gmra.mxu0 %v6096_v27  ;;  %2817 = vmatmul.bf16.gmra.mxu1 %v6097_v14  ;;  %v6103_v27 = vld [vmem:[#allocation128_spill] sm:$0xff] }
 0x3e3   :  { %4575 = vtanh.f32 %v2954_v2  ;;  %2906 = vmatmul.bf16.gmra.mxu2 %v6098_v48  ;;  %v6100_v2 = vld [vmem:[#allocation125_spill] sm:$0xff] }
 0x3e4   :  { %2995 = vmatmul.bf16.gmra.mxu3 %v6099_v36 }
 0x3e6   :  { %v2867_v51 = vpop.f32.mrf.mxu2 }
 0x3e7   :  { %v2868_v38 = vadd.f32 %v2867_v51, %v2779_v4  ;;  %v2956_v33 = vpop.f32.mrf.mxu3  ;;  %v2691_v18 = vpop.f32.mrf.mxu0  ;;  %v6102_v4 = vld [vmem:[#allocation127_spill] sm:$0xff] }
 0x3e8   :  { %v2692_v20 = vadd.f32 %v2691_v18, %v5453_v30  ;;  %v2780_v28 = vpop.f32.mrf.mxu1  ;;  %v6101_v30 = vld [vmem:[#allocation126_spill] sm:$0xff] }
 0x3e9   :  { %v5615_v54 = vpop.eup %4575  ;;  %v2957_v35 = vadd.f32 %v2956_v33, %v2868_v38 }
 0x3ea   :  { %v2781_v24 = vadd.f32 %v2780_v28, %v2692_v20  ;;  %v3091_v0 = vpack.c.bf16 %v5615_v54, %v5612_v5 }
 0x3eb   :  { %4577 = vtanh.f32 %v2957_v35 }
 0x3ee   :  { %v2869_v63 = vpop.f32.mrf.mxu2 }
 0x3ef   :  { %v2870_v49 = vadd.f32 %v2869_v63, %v2781_v24  ;;  %v2958_v13 = vpop.f32.mrf.mxu3  ;;  %v2694_v50 = vpop.f32.mrf.mxu0 }
 0x3f0   :  { %v2695_v43 = vadd.f32 %v2694_v50, %v5463_v45  ;;  %v2783_v52 = vpop.f32.mrf.mxu1 }
 0x3f1   :  { %v2959_v16 = vadd.f32 %v2958_v13, %v2870_v49  ;;  %v5624_v38 = vpop.eup %4577 }
 0x3f2   :  { %v2784_v19 = vadd.f32 %v2783_v52, %v2695_v43  ;;  %2733 = vmatmul.bf16.gmra.mxu0 %v6100_v2  ;;  %2822 = vmatmul.bf16.gmra.mxu1 %v6101_v30  ;;  %v6104_v52 = vld [vmem:[#allocation129_spill] sm:$0xff]  ;;  %v6107_v2 = vld [vmem:[#allocation132_spill] sm:$0xff] }
 0x3f3   :  { %4579 = vtanh.f32 %v2959_v16  ;;  %2911 = vmatmul.bf16.gmra.mxu2 %v6102_v4  ;;  %v6105_v16 = vld [vmem:[#allocation130_spill] sm:$0xff] }
 0x3f4   :  { %3000 = vmatmul.bf16.gmra.mxu3 %v6103_v27 }
 0x3f6   :  { %v2872_v14 = vpop.f32.mrf.mxu2 }
 0x3f7   :  { %v2873_v48 = vadd.f32 %v2872_v14, %v2784_v19  ;;  %v2961_v36 = vpop.f32.mrf.mxu3  ;;  %v2696_v51 = vpop.f32.mrf.mxu0  ;;  %v6106_v19 = vld [vmem:[#allocation131_spill] sm:$0xff] }
 0x3f8   :  { %v2785_v45 = vpop.f32.mrf.mxu1  ;;  %v2697_v20 = vadd.f32 %v2696_v51, %v5466_v53 }
 0x3f9   :  { %v5626_v33 = vpop.eup %4579  ;;  %v2962_v18 = vadd.f32 %v2961_v36, %v2873_v48 }
 0x3fa   :  { %v3093_v28 = vpack.c.bf16 %v5626_v33, %v5624_v38  ;;  %v2786_v35 = vadd.f32 %v2785_v45, %v2697_v20 }
 0x3fb   :  { %4581 = vtanh.f32 %v2962_v18 }
 0x3fe   :  { %v2874_v24 = vpop.f32.mrf.mxu2 }
 0x3ff   :  { %v2875_v63 = vadd.f32 %v2874_v24, %v2786_v35  ;;  %v2963_v49 = vpop.f32.mrf.mxu3  ;;  %v2699_v13 = vpop.f32.mrf.mxu0 }
 0x400   :  { %v2788_v50 = vpop.f32.mrf.mxu1  ;;  %v2700_v53 = vadd.f32 %v2699_v13, %v5473_v47 }
 0x401   :  { %v2964_v43 = vadd.f32 %v2963_v49, %v2875_v63  ;;  %v5636_v14 = vpop.eup %4581 }
 0x402   :  { %2738 = vmatmul.bf16.gmra.mxu0 %v6104_v52  ;;  %2827 = vmatmul.bf16.gmra.mxu1 %v6105_v16  ;;  %v2789_v48 = vadd.f32 %v2788_v50, %v2700_v53 }
 0x403   :  { %4583 = vtanh.f32 %v2964_v43  ;;  %2916 = vmatmul.bf16.gmra.mxu2 %v6106_v19 }
 0x404   :  { %3005 = vmatmul.bf16.gmra.mxu3 %v6107_v2 }
 0x406   :  { %v2877_v30 = vpop.f32.mrf.mxu2 }
 0x407   :  { %v2966_v4 = vpop.f32.mrf.mxu3  ;;  %v2701_v27 = vpop.f32.mrf.mxu0  ;;  %v2878_v18 = vadd.f32 %v2877_v30, %v2789_v48 }
 0x408   :  { %v2790_v36 = vpop.f32.mrf.mxu1  ;;  %v2702_v45 = vadd.f32 %v2701_v27, %v5476_v46 }
 0x409   :  { %v5638_v51 = vpop.eup %4583  ;;  %v2967_v24 = vadd.f32 %v2966_v4, %v2878_v18 }
 0x40a   :  { %v3095_v20 = vpack.c.bf16 %v5638_v51, %v5636_v14  ;;  %v2791_v35 = vadd.f32 %v2790_v36, %v2702_v45 }
 0x40b   :  { %4585 = vtanh.f32 %v2967_v24 }
 0x40e   :  { %v2879_v47 = vpop.f32.mrf.mxu2 }
 0x40f   :  { %v2880_v63 = vadd.f32 %v2879_v47, %v2791_v35  ;;  %v2968_v49 = vpop.f32.mrf.mxu3  ;;  %v2704_v13 = vpop.f32.mrf.mxu0 }
 0x410   :  { %v2793_v43 = vpop.f32.mrf.mxu1  ;;  %v2705_v46 = vadd.f32 %v2704_v13, %v5483_v1 }
 0x411   :  { %v2969_v52 = vadd.f32 %v2968_v49, %v2880_v63  ;;  %v5648_v53 = vpop.eup %4585 }
 0x412   :  { %2743 = vmatmul.bf16.gmra.mxu0 %v5258_v29  ;;  %2832 = vmatmul.bf16.gmra.mxu1 %v5260_v15  ;;  %v2794_v2 = vadd.f32 %v2793_v43, %v2705_v46 }
 0x413   :  { %4587 = vtanh.f32 %v2969_v52  ;;  %2921 = vmatmul.bf16.gmra.mxu2 %v5262_v37 }
 0x414   :  { %3010 = vmatmul.bf16.gmra.mxu3 %v5264_v39 }
 0x416   :  { %v2882_v50 = vpop.f32.mrf.mxu2 }
 0x417   :  { %v2971_v16 = vpop.f32.mrf.mxu3  ;;  %v2706_v19 = vpop.f32.mrf.mxu0  ;;  %v2883_v27 = vadd.f32 %v2882_v50, %v2794_v2 }
 0x418   :  { %v2795_v30 = vpop.f32.mrf.mxu1  ;;  %v2707_v29 = vadd.f32 %v2706_v19, %v5486_v31 }
 0x419   :  { %v5650_v4 = vpop.eup %4587  ;;  %v2972_v48 = vadd.f32 %v2971_v16, %v2883_v27 }
 0x41a   :  { %v3097_v15 = vpack.c.bf16 %v5650_v4, %v5648_v53  ;;  %v2796_v37 = vadd.f32 %v2795_v30, %v2707_v29 }
 0x41b   :  { %4589 = vtanh.f32 %v2972_v48 }
 0x41e   :  { %v2884_v1 = vpop.f32.mrf.mxu2 }
 0x41f   :  { %v2885_v36 = vadd.f32 %v2884_v1, %v2796_v37  ;;  %v2973_v39 = vpop.f32.mrf.mxu3  ;;  %v2709_v45 = vpop.f32.mrf.mxu0 }
 0x420   :  { %v2798_v18 = vpop.f32.mrf.mxu1  ;;  %v2710_v31 = vadd.f32 %v2709_v45, %v5493_v56 }
 0x421   :  { %v2974_v35 = vadd.f32 %v2973_v39, %v2885_v36  ;;  %v4590_v49 = vpop.eup %4589 }
 0x422   :  { %2748 = vmatmul.bf16.gmra.mxu0 %v5278_v57  ;;  %2837 = vmatmul.bf16.gmra.mxu1 %v5280_v23  ;;  %v2799_v13 = vadd.f32 %v2798_v18, %v2710_v31 }
 0x423   :  { %4591 = vtanh.f32 %v2974_v35  ;;  %2926 = vmatmul.bf16.gmra.mxu2 %v5282_v7 }
 0x424   :  { %3015 = vmatmul.bf16.gmra.mxu3 %v5284_v12 }
 0x426   :  { %v2887_v24 = vpop.f32.mrf.mxu2 }
 0x427   :  { %v2976_v47 = vpop.f32.mrf.mxu3  ;;  %v2711_v63 = vpop.f32.mrf.mxu0  ;;  %v2888_v50 = vadd.f32 %v2887_v24, %v2799_v13 }
 0x428   :  { %v2800_v43 = vpop.f32.mrf.mxu1  ;;  %v2712_v46 = vadd.f32 %v2711_v63, %v5496_v25 }
 0x429   :  { %v4592_v52 = vpop.eup %4591  ;;  %v2977_v19 = vadd.f32 %v2976_v47, %v2888_v50 }
 0x42a   :  { %v3099_v57 = vpack.c.bf16 %v4592_v52, %v4590_v49  ;;  %v2801_v16 = vadd.f32 %v2800_v43, %v2712_v46 }
 0x42b   :  { %4593 = vtanh.f32 %v2977_v19 }
 0x42e   :  { %v2889_v23 = vpop.f32.mrf.mxu2 }
 0x42f   :  { %v2890_v2 = vadd.f32 %v2889_v23, %v2801_v16  ;;  %v2978_v7 = vpop.f32.mrf.mxu3  ;;  %v2714_v30 = vpop.f32.mrf.mxu0 }
 0x430   :  { %v2715_v56 = vadd.f32 %v2714_v30, %v5503_v9  ;;  %v2803_v12 = vpop.f32.mrf.mxu1 }
 0x431   :  { %v2979_v29 = vadd.f32 %v2978_v7, %v2890_v2  ;;  %v4594_v25 = vpop.eup %4593 }
 0x432   :  { %v2804_v27 = vadd.f32 %v2803_v12, %v2715_v56 }
 0x433   :  { %4595 = vtanh.f32 %v2979_v29 }
 0x436   :  { %v2892_v37 = vpop.f32.mrf.mxu2 }
 0x437   :  { %v2893_v48 = vadd.f32 %v2892_v37, %v2804_v27  ;;  %v2981_v1 = vpop.f32.mrf.mxu3  ;;  %v2716_v36 = vpop.f32.mrf.mxu0 }
 0x438   :  { %v2717_v39 = vadd.f32 %v2716_v36, %v5506_v3  ;;  %v2805_v45 = vpop.f32.mrf.mxu1 }
 0x439   :  { %v4596_v18 = vpop.eup %4595  ;;  %v2982_v35 = vadd.f32 %v2981_v1, %v2893_v48 }
 0x43a   :  { %v2806_v31 = vadd.f32 %v2805_v45, %v2717_v39  ;;  %v3101_v24 = vpack.c.bf16 %v4596_v18, %v4594_v25 }
 0x43b   :  { %4597 = vtanh.f32 %v2982_v35 }
 0x43c   :  { %3144 = vmatpush.bf16.xpose.msra.mxu1 %v3101_v24 }
 0x43e   :  { %v2894_v47 = vpop.f32.mrf.mxu2 }
 0x43f   :  { %v2895_v9 = vadd.f32 %v2894_v47, %v2806_v31  ;;  %v2983_v63 = vpop.f32.mrf.mxu3  ;;  %v2719_v49 = vpop.f32.mrf.mxu0 }
 0x440   :  { %v2720_v13 = vadd.f32 %v2719_v49, %v5513_v21  ;;  %v2808_v43 = vpop.f32.mrf.mxu1 }
 0x441   :  { %v2984_v52 = vadd.f32 %v2983_v63, %v2895_v9  ;;  %v5664_v23 = vpop.eup %4597 }
 0x442   :  { %v2809_v46 = vadd.f32 %v2808_v43, %v2720_v13 }
 0x443   :  { %4599 = vtanh.f32 %v2984_v52 }
 0x444   :  { %3145 = vmatpush.bf16.xpose.msra.mxu1 %v3099_v57 }
 0x446   :  { %v2897_v50 = vpop.f32.mrf.mxu2 }
 0x447   :  { %v2898_v3 = vadd.f32 %v2897_v50, %v2809_v46  ;;  %v2986_v16 = vpop.f32.mrf.mxu3  ;;  %v2721_v19 = vpop.f32.mrf.mxu0 }
 0x448   :  { %v2722_v2 = vadd.f32 %v2721_v19, %v5516_v8  ;;  %v2810_v7 = vpop.f32.mrf.mxu1 }
 0x449   :  { %v5667_v30 = vpop.eup %4599  ;;  %v2987_v56 = vadd.f32 %v2986_v16, %v2898_v3 }
 0x44a   :  { %v2811_v12 = vadd.f32 %v2810_v7, %v2722_v2  ;;  %v3103_v21 = vpack.c.bf16 %v5667_v30, %v5664_v23 }
 0x44b   :  { %4601 = vtanh.f32 %v2987_v56 }
 0x44c   :  { %3146 = vmatpush.bf16.xpose.msra.mxu1 %v3097_v15 }
 0x44e   :  { %v2899_v57 = vpop.f32.mrf.mxu2 }
 0x44f   :  { %v2900_v29 = vadd.f32 %v2899_v57, %v2811_v12  ;;  %v2988_v27 = vpop.f32.mrf.mxu3  ;;  %v2724_v37 = vpop.f32.mrf.mxu0 }
 0x450   :  { %v2725_v48 = vadd.f32 %v2724_v37, %v5523_v32  ;;  %v2813_v1 = vpop.f32.mrf.mxu1 }
 0x451   :  { %v2989_v8 = vadd.f32 %v2988_v27, %v2900_v29  ;;  %v5678_v4 = vpop.eup %4601 }
 0x452   :  { %v2814_v36 = vadd.f32 %v2813_v1, %v2725_v48 }
 0x453   :  { %4603 = vtanh.f32 %v2989_v8 }
 0x454   :  { %3147 = vmatpush.bf16.xpose.msra.mxu1 %v3095_v20 }
 0x456   :  { %v2902_v25 = vpop.f32.mrf.mxu2 }
 0x457   :  { %v2903_v39 = vadd.f32 %v2902_v25, %v2814_v36  ;;  %v2991_v45 = vpop.f32.mrf.mxu3  ;;  %v2726_v53 = vpop.f32.mrf.mxu0 }
 0x458   :  { %v2727_v15 = vadd.f32 %v2726_v53, %v5526_v26  ;;  %v2815_v18 = vpop.f32.mrf.mxu1 }
 0x459   :  { %v5681_v35 = vpop.eup %4603  ;;  %v2992_v32 = vadd.f32 %v2991_v45, %v2903_v39 }
 0x45a   :  { %v2816_v31 = vadd.f32 %v2815_v18, %v2727_v15  ;;  %v3105_v24 = vpack.c.bf16 %v5681_v35, %v5678_v4 }
 0x45b   :  { %4605 = vtanh.f32 %v2992_v32 }
 0x45c   :  { %3148 = vmatpush.bf16.xpose.msra.mxu1 %v3093_v28 }
 0x45e   :  { %v2904_v14 = vpop.f32.mrf.mxu2 }
 0x45f   :  { %v2905_v51 = vadd.f32 %v2904_v14, %v2816_v31  ;;  %v2993_v20 = vpop.f32.mrf.mxu3  ;;  %v2729_v47 = vpop.f32.mrf.mxu0 }
 0x460   :  { %v2730_v9 = vadd.f32 %v2729_v47, %v5533_v42  ;;  %v2818_v63 = vpop.f32.mrf.mxu1 }
 0x461   :  { %v2994_v26 = vadd.f32 %v2993_v20, %v2905_v51  ;;  %v5692_v33 = vpop.eup %4605 }
 0x462   :  { %v2819_v49 = vadd.f32 %v2818_v63, %v2730_v9 }
 0x463   :  { %4607 = vtanh.f32 %v2994_v26 }
 0x464   :  { %3149 = vmatpush.bf16.xpose.msra.mxu1 %v3091_v0 }
 0x466   :  { %v2907_v13 = vpop.f32.mrf.mxu2 }
 0x467   :  { %v2908_v43 = vadd.f32 %v2907_v13, %v2819_v49  ;;  %v2996_v52 = vpop.f32.mrf.mxu3  ;;  %v2731_v38 = vpop.f32.mrf.mxu0 }
 0x468   :  { %v2732_v28 = vadd.f32 %v2731_v38, %v5536_v10  ;;  %v2820_v46 = vpop.f32.mrf.mxu1 }
 0x469   :  { %v5695_v50 = vpop.eup %4607  ;;  %v2997_v42 = vadd.f32 %v2996_v52, %v2908_v43 }
 0x46a   :  { %v2821_v3 = vadd.f32 %v2820_v46, %v2732_v28  ;;  %v3107_v16 = vpack.c.bf16 %v5695_v50, %v5692_v33  ;;  %v3189_v50 = vlaneseq }
 0x46b   :  { %4609 = vtanh.f32 %v2997_v42 }
 0x46c   :  { %3150 = vmatpush.bf16.xpose.msra.mxu1 %v3089_v55  ;;  %vm3191_vm1 = vcmp.lt.s32.totalorder %v3189_v50, 256 }
 0x46e   :  { %v2909_v5 = vpop.f32.mrf.mxu2 }
 0x46f   :  { %v2910_v54 = vadd.f32 %v2909_v5, %v2821_v3  ;;  %v2998_v0 = vpop.f32.mrf.mxu3  ;;  %v2734_v19 = vpop.f32.mrf.mxu0 }
 0x470   :  { %v2735_v2 = vadd.f32 %v2734_v19, %v5543_v34  ;;  %v2823_v7 = vpop.f32.mrf.mxu1 }
 0x471   :  { %v2999_v10 = vadd.f32 %v2998_v0, %v2910_v54  ;;  %v5706_v60 = vpop.eup %4609 }
 0x472   :  { %v2824_v56 = vadd.f32 %v2823_v7, %v2735_v2 }
 0x473   :  { %4611 = vtanh.f32 %v2999_v10 }
 0x474   :  { %3151 = vmatpush.bf16.xpose.msra.mxu1 %v3087_v59 }
 0x476   :  { %v2912_v12 = vpop.f32.mrf.mxu2 }
 0x477   :  { %v2913_v57 = vadd.f32 %v2912_v12, %v2824_v56  ;;  %v3001_v29 = vpop.f32.mrf.mxu3  ;;  %v2736_v41 = vpop.f32.mrf.mxu0 }
 0x478   :  { %v2737_v55 = vadd.f32 %v2736_v41, %v5546_v40  ;;  %v2825_v27 = vpop.f32.mrf.mxu1 }
 0x479   :  { %v5709_v37 = vpop.eup %4611  ;;  %v3002_v34 = vadd.f32 %v3001_v29, %v2913_v57 }
 0x47a   :  { %v2826_v48 = vadd.f32 %v2825_v27, %v2737_v55  ;;  %v3109_v1 = vpack.c.bf16 %v5709_v37, %v5706_v60 }
 0x47b   :  { %4613 = vtanh.f32 %v3002_v34 }
 0x47e   :  { %v2914_v8 = vpop.f32.mrf.mxu2 }
 0x47f   :  { %v2915_v36 = vadd.f32 %v2914_v8, %v2826_v48  ;;  %v3003_v58 = vpop.f32.mrf.mxu3  ;;  %v2739_v62 = vpop.f32.mrf.mxu0 }
 0x480   :  { %v2828_v59 = vpop.f32.mrf.mxu1  ;;  %v2740_v39 = vadd.f32 %v2739_v62, %v5553_v22 }
 0x481   :  { %v3004_v25 = vadd.f32 %v3003_v58, %v2915_v36  ;;  %v5714_v15 = vpop.eup %4613 }
 0x482   :  { %v2829_v18 = vadd.f32 %v2828_v59, %v2740_v39 }
 0x483   :  { %4615 = vtanh.f32 %v3004_v25 }
 0x486   :  { %v2917_v45 = vpop.f32.mrf.mxu2 }
 0x487   :  { %v3006_v40 = vpop.f32.mrf.mxu3  ;;  %v2741_v53 = vpop.f32.mrf.mxu0  ;;  %v2918_v51 = vadd.f32 %v2917_v45, %v2829_v18 }
 0x488   :  { %v2830_v32 = vpop.f32.mrf.mxu1  ;;  %v2742_v14 = vadd.f32 %v2741_v53, %v5556_v61 }
 0x489   :  { %v5716_v31 = vpop.eup %4615  ;;  %v3007_v9 = vadd.f32 %v3006_v40, %v2918_v51  ;;  %v3118_v51 = vld [vmem:[#allocation2] sm:$0x1] }
 0x48a   :  { %v3111_v20 = vpack.c.bf16 %v5716_v31, %v5714_v15  ;;  %v2831_v47 = vadd.f32 %v2830_v32, %v2742_v14 }
 0x48b   :  { %4617 = vtanh.f32 %v3007_v9 }
 0x48e   :  { %v2919_v63 = vpop.f32.mrf.mxu2 }
 0x48f   :  { %v2920_v26 = vadd.f32 %v2919_v63, %v2831_v47  ;;  %v3008_v22 = vpop.f32.mrf.mxu3  ;;  %v2744_v49 = vpop.f32.mrf.mxu0  ;;  %v4714_v47 = vmov 0  }
 0x490   :  { %v2833_v13 = vpop.f32.mrf.mxu1  ;;  %v2745_v52 = vadd.f32 %v2744_v49, %v5563_v6  ;;  %4500 = vset.pattern.permute.xlu0 %v4714_v47 }
 0x491   :  { %v3009_v43 = vadd.f32 %v3008_v22, %v2920_v26  ;;  %v4618_v61 = vpop.eup %4617  ;;  %3121 = vperm.xlu0 %4500, %v3118_v51  }
 0x492   :  { %v2834_v42 = vadd.f32 %v2833_v13, %v2745_v52 }
 0x493   :  { %4619 = vtanh.f32 %v3009_v43 }
 0x496   :  { %v2922_v38 = vpop.f32.mrf.mxu2 }
 0x497   :  { %v3011_v28 = vpop.f32.mrf.mxu3  ;;  %v2746_v46 = vpop.f32.mrf.mxu0  ;;  %v2923_v0 = vadd.f32 %v2922_v38, %v2834_v42 }
 0x498   :  { %v2835_v3 = vpop.f32.mrf.mxu1  ;;  %v2747_v54 = vadd.f32 %v2746_v46, %v5566_v17 }
 0x499   :  { %v4620_v5 = vpop.eup %4619  ;;  %v3012_v7 = vadd.f32 %v3011_v28, %v2923_v0 }
 0x49a   :  { %v3113_v19 = vpack.c.bf16 %v4620_v5, %v4618_v61  ;;  %v2836_v2 = vadd.f32 %v2835_v3, %v2747_v54 }
 0x49b   :  { %4621 = vtanh.f32 %v3012_v7 }
 0x49e   :  { %v2924_v10 = vpop.f32.mrf.mxu2 }
 0x49f   :  { %v2925_v56 = vadd.f32 %v2924_v10, %v2836_v2  ;;  %v3013_v12 = vpop.f32.mrf.mxu3  ;;  %v2749_v57 = vpop.f32.mrf.mxu0 }
 0x4a0   :  { %v2838_v6 = vpop.f32.mrf.mxu1  ;;  %v2750_v41 = vadd.f32 %v2749_v57, %v5573_v11 }
 0x4a1   :  { %v3014_v29 = vadd.f32 %v3013_v12, %v2925_v56  ;;  %v4622_v48 = vpop.eup %4621 }
 0x4a2   :  { %v2839_v8 = vadd.f32 %v2838_v6, %v2750_v41 }
 0x4a3   :  { %4623 = vtanh.f32 %v3014_v29 }
 0x4a6   :  { %v2927_v55 = vpop.f32.mrf.mxu2 }
 0x4a7   :  { %v3016_v27 = vpop.f32.mrf.mxu3  ;;  %v2751_v34 = vpop.f32.mrf.mxu0  ;;  %v2928_v58 = vadd.f32 %v2927_v55, %v2839_v8 }
 0x4a8   :  { %v2752_v36 = vadd.f32 %v2751_v34, %v5576_v44  ;;  %v2840_v59 = vpop.f32.mrf.mxu1  ;;  %v3085_v44 = vld [vmem:[%s5746_s3] sm:$0x3]  ;;  %s4715_s3 = smov [#allocation8]  }
 0x4a9   :  { %v4624_v17 = vpop.eup %4623  ;;  %v3017_v39 = vadd.f32 %v3016_v27, %v2928_v58  ;;  %3126 = vst [vmem:[#allocation1] ss:$9 sm:$0xff] %v3085_v44  ;;  %s3199_s11 = sshll.u32 %s4715_s3, 4  ;;  %s3200_s11 = int_to_ptr.vmem [resolvable:$true] %s3199_s11 }
 0x4aa   :  { %v3115_v62 = vpack.c.bf16 %v4624_v17, %v4622_v48  ;;  %v2841_v25 = vadd.f32 %v2840_v59, %v2752_v36 }
 0x4ab   :  { %4625 = vtanh.f32 %v3017_v39 }
 0x4ae   :  { %v2929_v45 = vpop.f32.mrf.mxu2 }
 0x4af   :  { %v2930_v40 = vadd.f32 %v2929_v45, %v2841_v25  ;;  %v3018_v53 = vpop.f32.mrf.mxu3 }
 0x4b0   :  { %v3127_v31 = vld [vmem:[#allocation1] sm:$0xff]  ;;  %v3128_v14 = vld [vmem:[#allocation1 + $0x9] sm:$0xff] }
 0x4b1   :  { %v3019_v15 = vadd.f32 %v3018_v53, %v2930_v40  ;;  %v4626_v11 = vpop.eup %4625  ;;  %3165 = vmatmul.bf16.vlgmr.msra.gmra.mxu2 %v3127_v31  ;;  %3139 = vmatmul.bf16.vlgmr.msra.gmra.mxu0 %v3127_v31 }
 0x4b2   :  { %3152 = vmatmul.bf16.vlgmr.msra.gmra.mxu1 %v3128_v14 }
 0x4b3   :  { %4627 = vtanh.f32 %v3019_v15 }
 0x4b9   :  { %v4628_v18 = vpop.eup %4627 }
 0x4ba   :  { %v3117_v32 = vpack.c.bf16 %v4628_v18, %v4626_v11 }
 0x4bc   :  { %3170 = vmatpush.bf16.xpose.msra.mxu3 %v3117_v32 }
 0x4c4   :  { %3171 = vmatpush.bf16.xpose.msra.mxu3 %v3115_v62 }
 0x4cc   :  { %3172 = vmatpush.bf16.xpose.msra.mxu3 %v3113_v19 }
 0x4d4   :  { %3173 = vmatpush.bf16.xpose.msra.mxu3 %v3111_v20 }
 0x4dc   :  { %3174 = vmatpush.bf16.xpose.msra.mxu3 %v3109_v1 }
 0x4e4   :  { %3175 = vmatpush.bf16.xpose.msra.mxu3 %v3107_v16 }
 0x4ec   :  { %3176 = vmatpush.bf16.xpose.msra.mxu3 %v3105_v24 }
 0x4f4   :  { %3177 = vmatpush.bf16.xpose.msra.mxu3 %v3103_v21 }
 0x4fb   :  { %3178 = vmatmul.bf16.vlgmr.msra.gmra.mxu3 %v3128_v14 }
 0x503   :  { %v3122_v26 = vpop.permute.xlu0 %3121 }
 0x504   :  { %v3124_v22 = vperm.slane %v3122_v26, 0 }
 0x52e   :  { %v3140_v20 = vpop.f32.mrf.mxu0 }
 0x52f   :  { %v3153_v9 = vpop.f32.mrf.mxu1  ;;  %v3141_v33 = vadd.f32 %v3140_v20, %v3124_v22 }
 0x531   :  { %v3154_v23 = vadd.f32 %v3153_v9, %v3141_v33 }
 0x534   :  { %v3166_v60 = vpop.f32.mrf.mxu2 }
 0x535   :  { %v3167_v49 = vadd.f32 %v3166_v60, %v3124_v22 }
 0x536   :  { %v3142_v37 = vpop.f32.mrf.mxu0 }
 0x537   :  { %v3155_v1 = vpop.f32.mrf.mxu1 }
 0x53c   :  { %v3168_v63 = vpop.f32.mrf.mxu2 }
 0x57e   :  { %v3179_v16 = vpop.f32.mrf.mxu3 }
 0x57f   :  { %v3180_v13 = vadd.f32 %v3179_v16, %v3167_v49 }
 0x581   :  { %v3185_v30 = vrot.slane %v3180_v13, 7 }
 0x583   :  { %v3187_v21 = vsel %vm3186_vm0, %v3154_v23, %v3185_v30 }
 0x584   :  { %3193 = vst.msk [vmem:[#allocation8] sm:$0x3] %vm3191_vm1, %v3187_v21 }
 0x585   :  { %3204 = dma.vmem_to_hbm [thread:$0]  %s3200_s11, 32, %s3202_s14, [#allocation5]  }
 0x586   :  { %v3181_v4 = vpop.f32.mrf.mxu3 }
 0x587   :  { %4706 = dma.done.wait [#allocation5], 32  }
 0x588   :  { %4707 = vsyncadd [#allocation5], 4294967264 }
 0x589   :  { %3209 = vsyncpa [#allocation4], 1 }
 0x58a   :  { %3210 = vsyncpa [#allocation7], 1 }
 0x58b   :  { %3211 = vsyncpa [#allocation5], 1 }

</bundles_post_ra>
